<compile_context>
chip_gen: v7x
topology: tpu7x:2x2x1
jax: 0.10.0
libtpu: 0.0.40
codegen_flags: <defaults>
</compile_context>

<pallas_src>
import functools

import jax
import jax.numpy as jnp
from jax.experimental import pallas as pl
from jax.experimental.pallas import tpu as pltpu


# ----------------------------------------------------------------------------
# Pallas kernel: fused conv (KH*KW shifted-window matmuls) + offset + activation
# ----------------------------------------------------------------------------
def _fused_conv_kernel(
    x_ref,    # (1, HP, WP, IC)   padded NHWC input for batch n (VMEM resident)
    w_ref,    # (KH*KW, IC, TOC)  scale-folded weight slice for this OC tile
    off_ref,  # (1, TOC)          f32 bias / folded-BN offset
    o_ref,    # (1, TH, OW, TOC)  output tile (lane dense: TOC % 128 == 0)
    *,
    kh, kw, stride, th, ow, act, slope,
):
    ic = x_ref.shape[-1]
    toc = o_ref.shape[-1]
    row0 = pl.program_id(1) * (th * stride)   # first padded input row of this OH tile
    span_h = (th - 1) * stride + 1
    span_w = (ow - 1) * stride + 1

    acc = jnp.zeros((th * ow, toc), jnp.float32)
    for i in range(kh):                       # unrolled: kh, kw are small & static
        for j in range(kw):
            win = x_ref[0, pl.ds(row0 + i, span_h), pl.ds(j, span_w), :]
            if stride > 1:
                win = win[::stride, ::stride, :]
            p = win.reshape(th * ow, ic)
            acc = acc + jnp.dot(p, w_ref[i * kw + j],
                                preferred_element_type=jnp.float32)

    acc = acc + off_ref[...]                  # (1, TOC) broadcasts over rows
    if act == "relu":
        acc = jnp.maximum(acc, 0.0)
    elif act == "leaky_relu":
        acc = jnp.where(acc >= 0.0, acc, slope * acc)
    o_ref[...] = acc.reshape(1, th, ow, toc).astype(o_ref.dtype)


def _pick_row_tile(oh, ow, toc, budget_bytes):
    """Largest divisor of OH whose f32 accumulator (TH*OW*TOC) fits the budget."""
    th = 1
    for cand in range(1, oh + 1):
        if oh % cand == 0 and cand * ow * toc * 4 <= budget_bytes:
            th = cand
    return th


# ----------------------------------------------------------------------------
# Wrapper: ConvUnit forward (NCHW in / NCHW out, matching the PyTorch module)
# ----------------------------------------------------------------------------
def conv_unit_forward(
    x,                        # [N, C, H, W]   (PyTorch NCHW)
    weight,                   # [OC, IC, KH, KW]
    bias=None,                # [OC] or None
    bn_params=None,           # (gamma, beta, running_mean, running_var, eps) or None
    *,
    stride=1,
    padding=1,
    non_linearity="relu",     # 'relu' | 'leaky_relu' | None
    leaky_slope=0.2,
    compute_dtype=jnp.bfloat16,   # MXU input dtype; accumulation stays f32
    oc_tile=256,                  # OC tile width (multiple of 128)
    acc_budget_bytes=2 << 20,     # cap on per-step f32 accumulator (VMEM/vreg pressure)
    return_layout="NCHW",         # "NHWC" skips the final transpose when chaining layers
):
    n, c, h, w = x.shape
    oc, ic, kh, kw = weight.shape
    assert c == ic, (c, ic)
    assert oc_tile % 128 == 0
    oh = (h + 2 * padding - kh) // stride + 1
    ow = (w + 2 * padding - kw) // stride + 1
    hp, wp = h + 2 * padding, w + 2 * padding

    # ---- glue (plain JAX): layout + spatial pad + parameter folding ---------
    x_nhwc = jnp.transpose(x, (0, 2, 3, 1))                # channels -> lane dim
    xp = jnp.pad(x_nhwc, ((0, 0), (padding, padding), (padding, padding), (0, 0)))
    xp = xp.astype(compute_dtype)

    offset = jnp.zeros((oc,), jnp.float32) if bias is None else bias.astype(jnp.float32)
    scale = jnp.ones((oc,), jnp.float32)
    if bn_params is not None:
        # eval-mode BatchNorm folded into scale/offset
        gamma, beta, mean, var, eps = bn_params
        inv = gamma.astype(jnp.float32) * jax.lax.rsqrt(var.astype(jnp.float32) + eps)
        scale = inv
        offset = (offset - mean.astype(jnp.float32)) * inv + beta.astype(jnp.float32)

    # weight (OC, IC, KH, KW) -> (KH*KW, IC, OC) with scale folded in.
    w_k = jnp.transpose(weight.astype(jnp.float32) * scale[:, None, None, None],
                        (2, 3, 1, 0)).reshape(kh * kw, ic, oc)

    # Lane-dense OC: pad to a multiple of 128, then tile by `toc`.
    oc_pad = pl.cdiv(oc, 128) * 128
    toc = min(oc_tile, oc_pad)
    oc_pad = pl.cdiv(oc_pad, toc) * toc
    if oc_pad != oc:
        w_k = jnp.pad(w_k, ((0, 0), (0, 0), (0, oc_pad - oc)))
        offset = jnp.pad(offset, (0, oc_pad - oc))
    w_k = w_k.astype(compute_dtype)
    offset = offset.reshape(1, oc_pad)

    th = _pick_row_tile(oh, ow, toc, acc_budget_bytes)
    grid = (n, oh // th, oc_pad // toc)

    act = non_linearity if non_linearity in ("relu", "leaky_relu") else None
    kernel = functools.partial(
        _fused_conv_kernel, kh=kh, kw=kw, stride=stride, th=th, ow=ow,
        act=act, slope=leaky_slope,
    )

    # VMEM budget (double-buffered blocks + accumulator). Only raise the limit
    # above the 32 MiB scoped default when needed (v7x has only 64 MiB total).
    in_bytes = jnp.dtype(compute_dtype).itemsize
    vmem_est = (2 * hp * ((wp + 7) // 8 * 8) * max(ic, 128) * in_bytes   # x block
                + 2 * kh * kw * max(ic, 8) * toc * in_bytes              # weight block
                + 2 * oc_pad * 4                                         # offset
                + 2 * th * ow * toc * 4                                  # output block
                + th * ow * toc * 4)                                     # accumulator
    cp_kwargs = dict(dimension_semantics=("parallel", "parallel", "parallel"))
    if vmem_est > 24 * 1024 * 1024:
        cp_kwargs["vmem_limit_bytes"] = min(int(vmem_est * 3 // 2), 100 * 1024 * 1024)

    out = pl.pallas_call(
        kernel,
        out_shape=jax.ShapeDtypeStruct((n, oh, ow, oc_pad), jnp.float32),
        grid_spec=pltpu.PrefetchScalarGridSpec(
            num_scalar_prefetch=0,
            grid=grid,
            in_specs=[
                # Full padded image of batch element `nb`: block index depends
                # only on the leading grid axis, so it stays VMEM-resident
                # across the inner (OH, OC) axes — no halo re-DMA.
                pl.BlockSpec((1, hp, wp, ic), lambda nb, i, j: (nb, 0, 0, 0)),
                pl.BlockSpec((kh * kw, ic, toc), lambda nb, i, j: (0, 0, j)),
                pl.BlockSpec((1, toc), lambda nb, i, j: (0, j)),
            ],
            out_specs=pl.BlockSpec((1, th, ow, toc), lambda nb, i, j: (nb, i, 0, j)),
        ),
        compiler_params=pltpu.CompilerParams(**cp_kwargs),
    )(xp, w_k, offset)

    out = out[..., :oc]                                    # drop OC lane padding
    if return_layout == "NHWC":
        return out
    # TODO(synk): when chaining ConvUnits keep activations NHWC and skip this
    # full-tensor transpose (it costs an extra read+write of the output).
    return jnp.transpose(out, (0, 3, 1, 2))                # NHWC -> NCHW


# ----------------------------------------------------------------------------
# Pure-JAX reference (mirrors the kernel's bf16 input rounding) for checking
# ----------------------------------------------------------------------------
def conv_unit_reference(x, weight, bias=None, bn_params=None, *, stride=1, padding=1,
                        non_linearity="relu", leaky_slope=0.2,
                        compute_dtype=jnp.bfloat16):
    oc = weight.shape[0]
    offset = jnp.zeros((oc,), jnp.float32) if bias is None else bias.astype(jnp.float32)
    scale = jnp.ones((oc,), jnp.float32)
    if bn_params is not None:
        gamma, beta, mean, var, eps = bn_params
        inv = gamma.astype(jnp.float32) * jax.lax.rsqrt(var.astype(jnp.float32) + eps)
        scale = inv
        offset = (offset - mean.astype(jnp.float32)) * inv + beta.astype(jnp.float32)
    w_eff = (weight.astype(jnp.float32) * scale[:, None, None, None]
             ).astype(compute_dtype).astype(jnp.float32)
    xq = x.astype(compute_dtype).astype(jnp.float32)
    out = jax.lax.conv_general_dilated(
        xq, w_eff, window_strides=(stride, stride),
        padding=[(padding, padding), (padding, padding)],
        dimension_numbers=("NCHW", "OIHW", "NCHW"))
    out = out + offset[None, :, None, None]
    if non_linearity == "relu":
        out = jnp.maximum(out, 0.0)
    elif non_linearity == "leaky_relu":
        out = jnp.where(out >= 0.0, out, leaky_slope * out)
    return out


if __name__ == "__main__":
    # ConvUnit(in_channels=4, out_channels=8, kernel_size=3, stride=1, padding=1)
    N, C, H, W = 2, 4, 16, 16
    OC, KH, KW = 8, 3, 3
    stride, padding = 1, 1

    key = jax.random.PRNGKey(0)
    kx, kw_, kb, kg, kbeta, km, kv = jax.random.split(key, 7)
    x = jax.random.normal(kx, (N, C, H, W), jnp.float32)
    fan_in = C * KH * KW
    bound = (1.0 / fan_in) ** 0.5
    weight = jax.random.uniform(kw_, (OC, C, KH, KW), jnp.float32,
                                minval=-bound, maxval=bound)

    # --- case 1: plain conv + ReLU (module defaults: bias=False, no BN) -------
    out = conv_unit_forward(x, weight, stride=stride, padding=padding,
                            non_linearity="relu")
    out = jax.block_until_ready(out)
    ref = conv_unit_reference(x, weight, stride=stride, padding=padding,
                              non_linearity="relu")
    assert out.shape == (N, OC, H, W), out.shape
    assert jnp.allclose(out, ref, atol=1e-4, rtol=1e-3), \
        float(jnp.max(jnp.abs(out - ref)))

    # --- case 2: bias + eval-mode BatchNorm + LeakyReLU(0.2) ------------------
    bias = 0.1 * jax.random.normal(kb, (OC,), jnp.float32)
    gamma = jax.random.uniform(kg, (OC,), jnp.float32, minval=0.5, maxval=1.5)
    beta = 0.1 * jax.random.normal(kbeta, (OC,), jnp.float32)
    mean = 0.1 * jax.random.normal(km, (OC,), jnp.float32)
    var = jax.random.uniform(kv, (OC,), jnp.float32, minval=0.5, maxval=1.5)
    bn = (gamma, beta, mean, var, 1e-5)
    out2 = conv_unit_forward(x, weight, bias=bias, bn_params=bn, stride=stride,
                             padding=padding, non_linearity="leaky_relu")
    out2 = jax.block_until_ready(out2)
    ref2 = conv_unit_reference(x, weight, bias=bias, bn_params=bn, stride=stride,
                               padding=padding, non_linearity="leaky_relu")
    assert jnp.allclose(out2, ref2, atol=1e-4, rtol=1e-3), \
        float(jnp.max(jnp.abs(out2 - ref2)))

    print("KERNEL_OK")
</pallas_src>

<mosaic_0001>
module attributes {stable_mosaic.version = 11 : i64} {
  func.func @_fused_conv_kernel(%arg0: i32, %arg1: i32, %arg2: i32, %arg3: memref<1x18x18x4xbf16, #tpu.memory_space<vmem>>, %arg4: memref<9x4x128xbf16, #tpu.memory_space<vmem>>, %arg5: memref<1x128xf32, #tpu.memory_space<vmem>>, %arg6: memref<1x16x16x128xf32, #tpu.memory_space<vmem>>) attributes {dimension_semantics = [#tpu.dimension_semantics<parallel>, #tpu.dimension_semantics<parallel>, #tpu.dimension_semantics<parallel>], iteration_bounds = array<i64: 2, 1, 1>, scalar_prefetch = 0 : i64, scratch_operands = 0 : i64, tpu.core_type = #tpu.core_type<tc>, window_params = [{transform_indices = @transform_0, window_bounds = array<i64: 1, 18, 18, 4>}, {transform_indices = @transform_1, window_bounds = array<i64: 9, 4, 128>}, {transform_indices = @transform_2, window_bounds = array<i64: 1, 128>}, {transform_indices = @transform_3, window_bounds = array<i64: 1, 16, 16, 128>}]} {
    %c16_i32 = arith.constant 16 : i32
    %0 = arith.muli %arg1, %c16_i32 : i32
    %cst = arith.constant 0.000000e+00 : f32
    %1 = vector.broadcast %cst : f32 to vector<256x128xf32>
    %c0_i32 = arith.constant 0 : i32
    %2 = arith.addi %0, %c0_i32 : i32
    %c0 = arith.constant 0 : index
    %3 = arith.index_cast %2 : i32 to index
    %c0_0 = arith.constant 0 : index
    %c0_1 = arith.constant 0 : index
    %4 = vector.load %arg3[%c0, %3, %c0_0, %c0_1] : memref<1x18x18x4xbf16, #tpu.memory_space<vmem>>, vector<1x16x16x4xbf16>
    %5 = vector.shape_cast %4 : vector<1x16x16x4xbf16> to vector<16x16x4xbf16>
    %6 = vector.shape_cast %5 : vector<16x16x4xbf16> to vector<256x4xbf16>
    %c0_2 = arith.constant 0 : index
    %c0_3 = arith.constant 0 : index
    %c0_4 = arith.constant 0 : index
    %7 = vector.load %arg4[%c0_2, %c0_3, %c0_4] : memref<9x4x128xbf16, #tpu.memory_space<vmem>>, vector<1x4x128xbf16>
    %8 = vector.shape_cast %7 : vector<1x4x128xbf16> to vector<4x128xbf16>
    %cst_5 = arith.constant dense<0.000000e+00> : vector<256x128xf32>
    %9 = tpu.matmul %6, %8, %cst_5 {dimension_numbers = #tpu.dot_dimension_numbers<[1], [0], [0], [1], [0, 0, 1, 1], [], []>} : vector<256x4xbf16>, vector<4x128xbf16>, vector<256x128xf32> -> vector<256x128xf32>
    %10 = arith.addf %1, %9 : vector<256x128xf32>
    %c0_i32_6 = arith.constant 0 : i32
    %11 = arith.addi %0, %c0_i32_6 : i32
    %c0_7 = arith.constant 0 : index
    %12 = arith.index_cast %11 : i32 to index
    %c1 = arith.constant 1 : index
    %c0_8 = arith.constant 0 : index
    %13 = vector.load %arg3[%c0_7, %12, %c1, %c0_8] : memref<1x18x18x4xbf16, #tpu.memory_space<vmem>>, vector<1x16x16x4xbf16>
    %14 = vector.shape_cast %13 : vector<1x16x16x4xbf16> to vector<16x16x4xbf16>
    %15 = vector.shape_cast %14 : vector<16x16x4xbf16> to vector<256x4xbf16>
    %c1_9 = arith.constant 1 : index
    %c0_10 = arith.constant 0 : index
    %c0_11 = arith.constant 0 : index
    %16 = vector.load %arg4[%c1_9, %c0_10, %c0_11] : memref<9x4x128xbf16, #tpu.memory_space<vmem>>, vector<1x4x128xbf16>
    %17 = vector.shape_cast %16 : vector<1x4x128xbf16> to vector<4x128xbf16>
    %cst_12 = arith.constant dense<0.000000e+00> : vector<256x128xf32>
    %18 = tpu.matmul %15, %17, %cst_12 {dimension_numbers = #tpu.dot_dimension_numbers<[1], [0], [0], [1], [0, 0, 1, 1], [], []>} : vector<256x4xbf16>, vector<4x128xbf16>, vector<256x128xf32> -> vector<256x128xf32>
    %19 = arith.addf %10, %18 : vector<256x128xf32>
    %c0_i32_13 = arith.constant 0 : i32
    %20 = arith.addi %0, %c0_i32_13 : i32
    %c0_14 = arith.constant 0 : index
    %21 = arith.index_cast %20 : i32 to index
    %c2 = arith.constant 2 : index
    %c0_15 = arith.constant 0 : index
    %22 = vector.load %arg3[%c0_14, %21, %c2, %c0_15] : memref<1x18x18x4xbf16, #tpu.memory_space<vmem>>, vector<1x16x16x4xbf16>
    %23 = vector.shape_cast %22 : vector<1x16x16x4xbf16> to vector<16x16x4xbf16>
    %24 = vector.shape_cast %23 : vector<16x16x4xbf16> to vector<256x4xbf16>
    %c2_16 = arith.constant 2 : index
    %c0_17 = arith.constant 0 : index
    %c0_18 = arith.constant 0 : index
    %25 = vector.load %arg4[%c2_16, %c0_17, %c0_18] : memref<9x4x128xbf16, #tpu.memory_space<vmem>>, vector<1x4x128xbf16>
    %26 = vector.shape_cast %25 : vector<1x4x128xbf16> to vector<4x128xbf16>
    %cst_19 = arith.constant dense<0.000000e+00> : vector<256x128xf32>
    %27 = tpu.matmul %24, %26, %cst_19 {dimension_numbers = #tpu.dot_dimension_numbers<[1], [0], [0], [1], [0, 0, 1, 1], [], []>} : vector<256x4xbf16>, vector<4x128xbf16>, vector<256x128xf32> -> vector<256x128xf32>
    %28 = arith.addf %19, %27 : vector<256x128xf32>
    %c1_i32 = arith.constant 1 : i32
    %29 = arith.addi %0, %c1_i32 : i32
    %c0_20 = arith.constant 0 : index
    %30 = arith.index_cast %29 : i32 to index
    %c0_21 = arith.constant 0 : index
    %c0_22 = arith.constant 0 : index
    %31 = vector.load %arg3[%c0_20, %30, %c0_21, %c0_22] : memref<1x18x18x4xbf16, #tpu.memory_space<vmem>>, vector<1x16x16x4xbf16>
    %32 = vector.shape_cast %31 : vector<1x16x16x4xbf16> to vector<16x16x4xbf16>
    %33 = vector.shape_cast %32 : vector<16x16x4xbf16> to vector<256x4xbf16>
    %c3 = arith.constant 3 : index
    %c0_23 = arith.constant 0 : index
    %c0_24 = arith.constant 0 : index
    %34 = vector.load %arg4[%c3, %c0_23, %c0_24] : memref<9x4x128xbf16, #tpu.memory_space<vmem>>, vector<1x4x128xbf16>
    %35 = vector.shape_cast %34 : vector<1x4x128xbf16> to vector<4x128xbf16>
    %cst_25 = arith.constant dense<0.000000e+00> : vector<256x128xf32>
    %36 = tpu.matmul %33, %35, %cst_25 {dimension_numbers = #tpu.dot_dimension_numbers<[1], [0], [0], [1], [0, 0, 1, 1], [], []>} : vector<256x4xbf16>, vector<4x128xbf16>, vector<256x128xf32> -> vector<256x128xf32>
    %37 = arith.addf %28, %36 : vector<256x128xf32>
    %c1_i32_26 = arith.constant 1 : i32
    %38 = arith.addi %0, %c1_i32_26 : i32
    %c0_27 = arith.constant 0 : index
    %39 = arith.index_cast %38 : i32 to index
    %c1_28 = arith.constant 1 : index
    %c0_29 = arith.constant 0 : index
    %40 = vector.load %arg3[%c0_27, %39, %c1_28, %c0_29] : memref<1x18x18x4xbf16, #tpu.memory_space<vmem>>, vector<1x16x16x4xbf16>
    %41 = vector.shape_cast %40 : vector<1x16x16x4xbf16> to vector<16x16x4xbf16>
    %42 = vector.shape_cast %41 : vector<16x16x4xbf16> to vector<256x4xbf16>
    %c4 = arith.constant 4 : index
    %c0_30 = arith.constant 0 : index
    %c0_31 = arith.constant 0 : index
    %43 = vector.load %arg4[%c4, %c0_30, %c0_31] : memref<9x4x128xbf16, #tpu.memory_space<vmem>>, vector<1x4x128xbf16>
    %44 = vector.shape_cast %43 : vector<1x4x128xbf16> to vector<4x128xbf16>
    %cst_32 = arith.constant dense<0.000000e+00> : vector<256x128xf32>
    %45 = tpu.matmul %42, %44, %cst_32 {dimension_numbers = #tpu.dot_dimension_numbers<[1], [0], [0], [1], [0, 0, 1, 1], [], []>} : vector<256x4xbf16>, vector<4x128xbf16>, vector<256x128xf32> -> vector<256x128xf32>
    %46 = arith.addf %37, %45 : vector<256x128xf32>
    %c1_i32_33 = arith.constant 1 : i32
    %47 = arith.addi %0, %c1_i32_33 : i32
    %c0_34 = arith.constant 0 : index
    %48 = arith.index_cast %47 : i32 to index
    %c2_35 = arith.constant 2 : index
    %c0_36 = arith.constant 0 : index
    %49 = vector.load %arg3[%c0_34, %48, %c2_35, %c0_36] : memref<1x18x18x4xbf16, #tpu.memory_space<vmem>>, vector<1x16x16x4xbf16>
    %50 = vector.shape_cast %49 : vector<1x16x16x4xbf16> to vector<16x16x4xbf16>
    %51 = vector.shape_cast %50 : vector<16x16x4xbf16> to vector<256x4xbf16>
    %c5 = arith.constant 5 : index
    %c0_37 = arith.constant 0 : index
    %c0_38 = arith.constant 0 : index
    %52 = vector.load %arg4[%c5, %c0_37, %c0_38] : memref<9x4x128xbf16, #tpu.memory_space<vmem>>, vector<1x4x128xbf16>
    %53 = vector.shape_cast %52 : vector<1x4x128xbf16> to vector<4x128xbf16>
    %cst_39 = arith.constant dense<0.000000e+00> : vector<256x128xf32>
    %54 = tpu.matmul %51, %53, %cst_39 {dimension_numbers = #tpu.dot_dimension_numbers<[1], [0], [0], [1], [0, 0, 1, 1], [], []>} : vector<256x4xbf16>, vector<4x128xbf16>, vector<256x128xf32> -> vector<256x128xf32>
    %55 = arith.addf %46, %54 : vector<256x128xf32>
    %c2_i32 = arith.constant 2 : i32
    %56 = arith.addi %0, %c2_i32 : i32
    %c0_40 = arith.constant 0 : index
    %57 = arith.index_cast %56 : i32 to index
    %c0_41 = arith.constant 0 : index
    %c0_42 = arith.constant 0 : index
    %58 = vector.load %arg3[%c0_40, %57, %c0_41, %c0_42] : memref<1x18x18x4xbf16, #tpu.memory_space<vmem>>, vector<1x16x16x4xbf16>
    %59 = vector.shape_cast %58 : vector<1x16x16x4xbf16> to vector<16x16x4xbf16>
    %60 = vector.shape_cast %59 : vector<16x16x4xbf16> to vector<256x4xbf16>
    %c6 = arith.constant 6 : index
    %c0_43 = arith.constant 0 : index
    %c0_44 = arith.constant 0 : index
    %61 = vector.load %arg4[%c6, %c0_43, %c0_44] : memref<9x4x128xbf16, #tpu.memory_space<vmem>>, vector<1x4x128xbf16>
    %62 = vector.shape_cast %61 : vector<1x4x128xbf16> to vector<4x128xbf16>
    %cst_45 = arith.constant dense<0.000000e+00> : vector<256x128xf32>
    %63 = tpu.matmul %60, %62, %cst_45 {dimension_numbers = #tpu.dot_dimension_numbers<[1], [0], [0], [1], [0, 0, 1, 1], [], []>} : vector<256x4xbf16>, vector<4x128xbf16>, vector<256x128xf32> -> vector<256x128xf32>
    %64 = arith.addf %55, %63 : vector<256x128xf32>
    %c2_i32_46 = arith.constant 2 : i32
    %65 = arith.addi %0, %c2_i32_46 : i32
    %c0_47 = arith.constant 0 : index
    %66 = arith.index_cast %65 : i32 to index
    %c1_48 = arith.constant 1 : index
    %c0_49 = arith.constant 0 : index
    %67 = vector.load %arg3[%c0_47, %66, %c1_48, %c0_49] : memref<1x18x18x4xbf16, #tpu.memory_space<vmem>>, vector<1x16x16x4xbf16>
    %68 = vector.shape_cast %67 : vector<1x16x16x4xbf16> to vector<16x16x4xbf16>
    %69 = vector.shape_cast %68 : vector<16x16x4xbf16> to vector<256x4xbf16>
    %c7 = arith.constant 7 : index
    %c0_50 = arith.constant 0 : index
    %c0_51 = arith.constant 0 : index
    %70 = vector.load %arg4[%c7, %c0_50, %c0_51] : memref<9x4x128xbf16, #tpu.memory_space<vmem>>, vector<1x4x128xbf16>
    %71 = vector.shape_cast %70 : vector<1x4x128xbf16> to vector<4x128xbf16>
    %cst_52 = arith.constant dense<0.000000e+00> : vector<256x128xf32>
    %72 = tpu.matmul %69, %71, %cst_52 {dimension_numbers = #tpu.dot_dimension_numbers<[1], [0], [0], [1], [0, 0, 1, 1], [], []>} : vector<256x4xbf16>, vector<4x128xbf16>, vector<256x128xf32> -> vector<256x128xf32>
    %73 = arith.addf %64, %72 : vector<256x128xf32>
    %c2_i32_53 = arith.constant 2 : i32
    %74 = arith.addi %0, %c2_i32_53 : i32
    %c0_54 = arith.constant 0 : index
    %75 = arith.index_cast %74 : i32 to index
    %c2_55 = arith.constant 2 : index
    %c0_56 = arith.constant 0 : index
    %76 = vector.load %arg3[%c0_54, %75, %c2_55, %c0_56] : memref<1x18x18x4xbf16, #tpu.memory_space<vmem>>, vector<1x16x16x4xbf16>
    %77 = vector.shape_cast %76 : vector<1x16x16x4xbf16> to vector<16x16x4xbf16>
    %78 = vector.shape_cast %77 : vector<16x16x4xbf16> to vector<256x4xbf16>
    %c8 = arith.constant 8 : index
    %c0_57 = arith.constant 0 : index
    %c0_58 = arith.constant 0 : index
    %79 = vector.load %arg4[%c8, %c0_57, %c0_58] : memref<9x4x128xbf16, #tpu.memory_space<vmem>>, vector<1x4x128xbf16>
    %80 = vector.shape_cast %79 : vector<1x4x128xbf16> to vector<4x128xbf16>
    %cst_59 = arith.constant dense<0.000000e+00> : vector<256x128xf32>
    %81 = tpu.matmul %78, %80, %cst_59 {dimension_numbers = #tpu.dot_dimension_numbers<[1], [0], [0], [1], [0, 0, 1, 1], [], []>} : vector<256x4xbf16>, vector<4x128xbf16>, vector<256x128xf32> -> vector<256x128xf32>
    %82 = arith.addf %73, %81 : vector<256x128xf32>
    %c0_60 = arith.constant 0 : index
    %c0_61 = arith.constant 0 : index
    %83 = vector.load %arg5[%c0_60, %c0_61] : memref<1x128xf32, #tpu.memory_space<vmem>>, vector<1x128xf32>
    %84 = vector.broadcast %83 : vector<1x128xf32> to vector<256x128xf32>
    %85 = arith.addf %82, %84 : vector<256x128xf32>
    %cst_62 = arith.constant 0.000000e+00 : f32
    %86 = vector.broadcast %cst_62 : f32 to vector<256x128xf32>
    %87 = arith.maximumf %85, %86 : vector<256x128xf32>
    %88 = vector.shape_cast %87 : vector<256x128xf32> to vector<1x16x16x128xf32>
    %c0_63 = arith.constant 0 : index
    %c0_64 = arith.constant 0 : index
    %c0_65 = arith.constant 0 : index
    %c0_66 = arith.constant 0 : index
    %89 = vector.load %arg6[%c0_63, %c0_64, %c0_65, %c0_66] : memref<1x16x16x128xf32, #tpu.memory_space<vmem>>, vector<1x16x16x128xf32>
    tpu.vector_store %arg6[%c0_63, %c0_64, %c0_65, %c0_66], %88 {strides = array<i32>} : memref<1x16x16x128xf32, #tpu.memory_space<vmem>>, vector<1x16x16x128xf32>,
    return
  }
  func.func @transform_0(%arg0: i32, %arg1: i32, %arg2: i32) -> (i32, i32, i32, i32) {
    %c0_i32 = arith.constant 0 : i32
    %c0_i32_0 = arith.constant 0 : i32
    %c0_i32_1 = arith.constant 0 : i32
    %c0_i32_2 = arith.constant 0 : i32
    return %arg0, %c0_i32, %c0_i32_0, %c0_i32_1 : i32, i32, i32, i32
  }
  func.func @transform_1(%arg0: i32, %arg1: i32, %arg2: i32) -> (i32, i32, i32) {
    %c0_i32 = arith.constant 0 : i32
    %c0_i32_0 = arith.constant 0 : i32
    %c0_i32_1 = arith.constant 0 : i32
    return %c0_i32, %c0_i32_0, %arg2 : i32, i32, i32
  }
  func.func @transform_2(%arg0: i32, %arg1: i32, %arg2: i32) -> (i32, i32) {
    %c0_i32 = arith.constant 0 : i32
    %c0_i32_0 = arith.constant 0 : i32
    return %c0_i32, %arg2 : i32, i32
  }
  func.func @transform_3(%arg0: i32, %arg1: i32, %arg2: i32) -> (i32, i32, i32, i32) {
    %c0_i32 = arith.constant 0 : i32
    %c0_i32_0 = arith.constant 0 : i32
    return %arg0, %arg1, %c0_i32, %arg2 : i32, i32, i32, i32
  }
}

</mosaic_0001>

<bundles_post_ra>
// kernel: tpu_custom_call.1
= control target key start
LH: loop header
LB: loop body
LE: loop exit
PB: predicated region body
PF: predicated region fallthrough
CT: control target
= control target key end

     0   :  { %8 = vsyncpa [#allocation3], 0  ;;  %s8474_s0 = inlined_call_operand.vmem [shape: bf16[2,18,18,4], index: 0, kind: input, shape index: {}]   ;;  %s8475_s1 = inlined_call_operand.vmem [shape: bf16[9,4,128], index: 1, kind: input, shape index: {}]   ;;  %s8476_s2 = inlined_call_operand.vmem [shape: f32[1,128], index: 2, kind: input, shape index: {}]   ;;  %s8477_s3 = inlined_call_operand.hbm [shape: f32[2,16,16,128], index: 3, kind: output, shape index: {}]  }
   0x1   :  { %10 = vsyncpa [#allocation3 + $0x1], 0  ;;  %s6574_s12 = smov 0   ;;  %s6576_s13 = smov 0  }
   0x2   :  { %s6578_s14 = smov 0   ;;  %s6580_s15 = smov 0  }
   0x3   :  { %s6582_s16 = smov 0   ;;  %s6584_s17 = smov 0  }
   0x4 LB: > { %s5029_s18 = sadd.s32 4294967295, %s6549_s17   ;;  %s5030_s19 = sadd.s32 4294967294, %s6549_s17   ;;  %s6549_s17 = sphi %s6584_s17, %s16_s17   ;;  %s6545_s16 = sphi %s6582_s16, %s8551_s16   ;;  %s6541_s15 = sphi %s6580_s15, %s8550_s15   ;;  %s6537_s14 = sphi %s6578_s14, %s8549_s14   ;;  %s6533_s13 = sphi %s6576_s13, %s8548_s13   ;;  %s6529_s12 = sphi %s6574_s12, %s8547_s12  }
   0x5   : > { %s35_s20 = sadd.s32 1, %s6545_s16  ;;  %s124_s21 = sadd.s32 1, %s6537_s14 }
   0x6   : > { %p37_p0 = scmp.ge.s32.totalorder %s35_s20, 2  ;;  %p134_p1 = scmp.ne.s32.totalorder %s6537_s14, %s6533_s13 }
   0x7   : > { %p135_p2 = scmp.eq.s32.totalorder %s5029_s18, 1  ;;  %p140_p3 = scmp.ne.s32.totalorder %s6533_s13, %s6529_s12 }
   0x8   : > { %s8553_s20 = smov (%p37_p0, %s35_s20), 0  ;;  %p141_p5 = scmp.eq.s32.totalorder %s5030_s19, 1 }
   0x9   : > { %p6614_p4 = por %p135_p2, %p134_p1  ;;  %s117_s23 = ssub.s32 %s6545_s16, %s8553_s20 }
   0xa   : > { %p5035_p6 = scmp.ge.s32.totalorder %s6549_s17, 1  ;;  %p122_p7 = scmp.eq.s32.totalorder %s117_s23, 0 }
   0xb   : > { %p6621_p8 = por %p141_p5, %p140_p3  ;;  %p180_p9 = scmp.lt.s32.totalorder %s6549_s17, 3 }
   0xc   : > { %s6627_s25 = scalar_select %p122_p7, %s6537_s14, %s124_s21  }
   0xd   : > { %p181_p10 = pnand %p5035_p6, %p180_p9 }
   0xf   : > { %184 = sbr.rel (%p181_p10) target bundleno = 611 (0x263), region = 32 }
  0x16   : > { %v5038_v0 = vld [vmem:[%s8475_s1 + $0x2] sm:$0x3]  ;;  %vm764_vm0 = vcmask 1041408   ;;  %v5265_v1 = vld [vmem:[%s8475_s1 + $0x8] sm:$0x3]  ;;  %p211_p11 = scmp.lt.s32.totalorder %s6541_s15, 1 }
  0x17   : > { %6298 = vmatprep.subr.msk.bf16.mxu1 %vm764_vm0, %v5038_v0  ;;  %6302 = vmatprep.subr.msk.bf16.mxu0 %vm764_vm0, %v5265_v1  ;;  %v766_v2 = vsel %vm764_vm0, %v5038_v0, 0  ;;  %v6640_v3 = vsel %vm764_vm0, %v5265_v1, 0  ;;  %v261_v4 = vld [vmem:[%s8475_s1] sm:$0x3]  ;;  %v5330_v5 = vld [vmem:[%s8475_s1 + $0xa] sm:$0x3] }
  0x18   : > { %8493 = vst [vmem:[#allocation5_spill] sm:$0xff] %v6640_v3  ;;  %5735 = vmatpush3.bf16.msra.mxu1 %v766_v2  ;;  %5871 = vmatpush3.bf16.msra.mxu0 %v6640_v3  ;;  %s212_s30 = scalar_select %p211_p11, %s6541_s15, 1  ;;  %vm278_vm1 = vsmask.f32 3328  ;;  %vm279_vm2 = vsmask.f32 7440 }
  0x19   : > { %6299 = vmatprep.subr.msk.bf16.mxu1 %vm764_vm0, %v261_v4  ;;  %6304 = vmatprep.subr.msk.bf16.mxu0 %vm764_vm0, %v5330_v5  ;;  %vm715_vm3 = vcmask 31744   ;;  %v6668_v17 = vsel %vm764_vm0, %v261_v4, 0  ;;  %v6674_v26 = vld [vmem:[%s8475_s1 + $0xc] sm:$0x3]  ;;  %vm6681_vm4 = vmor %vm278_vm1, %vm279_vm2  ;;  %v6687_v37 = vsel %vm764_vm0, %v5330_v5, 0  ;;  %vm1269_vm5 = vcmask 1042432  }
  0x1a   : > { %s6308_s8 = smul.u32 216, %s212_s30  ;;  %v6691_v41 = vsel %vm764_vm0, %v6674_v26, 0  ;;  %vm1270_vm6 = vcmask 1046532   ;;  %s208_s9 = sand.u32 1, %s6533_s13  }
  0x1b   : > { %vm6907_vm7 = vmor %vm1269_vm5, %vm1270_vm6  ;;  %s5036_s18 = sshll.u32 %s208_s9, 8  ;;  %s5580_s21 = sshll.u32 %s6541_s15, 12 }
  0x1c   : > { %s6655_s11 = scalar_lea.vmem %s8474_s0, %s6308_s8  ;;  %s8351_s19 = scalar_lea.vmem [#allocation2], %s5036_s18 }
  0x1d   : > { %v229_v6 = vld [vmem:[%s6655_s11] sm:$0xf]  ;;  %v230_v7 = vld [vmem:[%s6655_s11 + $0x4] sm:$0xf]  ;;  %v262_v8 = vld [vmem:[%s6655_s11 + $0x8] sm:$0x1]  ;;  %s8419_s28 = scalar_lea.hbm %s8477_s3, %s5580_s21 }
  0x1e   : > { %v282_v9 = vshrl.u32 %v229_v6, 16  ;;  %v285_v10 = vshll.u32 %v229_v6, 16  ;;  %v291_v11 = vshll.u32 %v230_v7, 16  ;;  %v295_v12 = vshrl.u32 %v230_v7, 16  ;;  %v5217_v13 = vld [vmem:[%s6655_s11 + $0xc] sm:$0xf] }
  0x1f   : > { %v301_v14 = vshll.u32 %v262_v8, 16  ;;  %v6662_v15 = vld [vmem:[%s6655_s11 + $0x10] sm:$0xf]  ;;  %v6665_v16 = vld [vmem:[%s6655_s11 + $0x14] sm:$0x1]  ;;  %v2089_v23 = vshrl.u32 %v5217_v13, 16 }
  0x20   : > { %v284_v18 = vrot.slane %v282_v9, 4  ;;  %v287_v19 = vrot.slane %v285_v10, 5  ;;  %v293_v20 = vrot.slane %v291_v11, 5  ;;  %v297_v21 = vrot.slane %v295_v12, 4  ;;  %v231_v31 = vld [vmem:[%s6655_s11 + $0xc] sm:$0xf] }
  0x21   : > { %v303_v22 = vrot.slane %v301_v14, 5  ;;  %v2092_v24 = vshll.u32 %v5217_v13, 16  ;;  %v2098_v25 = vshll.u32 %v6662_v15, 16  ;;  %v2102_v29 = vshrl.u32 %v6662_v15, 16  ;;  %v232_v36 = vld [vmem:[%s6655_s11 + $0x10] sm:$0xf] }
  0x22   : > { %v288_v27 = vor.u32 %v287_v19, %v284_v18  ;;  %v298_v28 = vor.u32 %v297_v21, %v293_v20  ;;  %v2108_v30 = vshll.u32 %v6665_v16, 16  ;;  %v2091_v33 = vrot.slane %v2089_v23, 4  ;;  %v263_v44 = vld [vmem:[%s6655_s11 + $0x14] sm:$0x1]  ;;  %v5220_v55 = vld [vmem:[%s6655_s11 + $0x18] sm:$0xf] }
  0x23   : > { %v2094_v34 = vrot.slane %v2092_v24, 5  ;;  %v2100_v35 = vrot.slane %v2098_v25, 5  ;;  %v2104_v40 = vrot.slane %v2102_v29, 4  ;;  %v306_v45 = vshrl.u32 %v231_v31, 16  ;;  %v6700_v60 = vld [vmem:[%s6655_s11 + $0x1c] sm:$0xf] }
  0x24   : > { %v289_v38 = vrot.slane %v288_v27, 4  ;;  %v299_v39 = vrot.slane %v298_v28, 4  ;;  %v2110_v43 = vrot.slane %v2108_v30, 5  ;;  %v309_v46 = vshll.u32 %v231_v31, 16  ;;  %v6708_v1 = vld [vmem:[%s6655_s11 + $0x20] sm:$0x1] }
  0x25   : > { %v2095_v42 = vor.u32 %v2094_v34, %v2091_v33  ;;  %v2105_v49 = vor.u32 %v2104_v40, %v2100_v35  ;;  %v315_v50 = vshll.u32 %v232_v36, 16  ;;  %v308_v53 = vrot.slane %v306_v45, 4  ;;  %v233_v18 = vld [vmem:[%s6655_s11 + $0x18] sm:$0xf]  ;;  %v234_v23 = vld [vmem:[%s6655_s11 + $0x1c] sm:$0xf] }
  0x26   : > { %v294_v47 = vsel %vm6681_vm4, %v289_v38, %v293_v20  ;;  %v304_v48 = vsel %vm6681_vm4, %v299_v39, %v303_v22  ;;  %v311_v54 = vrot.slane %v309_v46, 5  ;;  %v319_v58 = vshrl.u32 %v232_v36, 16  ;;  %v264_v31 = vld [vmem:[%s6655_s11 + $0x20] sm:$0x1]  ;;  %v5223_v40 = vld [vmem:[%s6655_s11 + $0x24] sm:$0xf] }
  0x27   : > { %v5039_v51 = vcombine.low %v294_v47, %v304_v48  ;;  %v2096_v52 = vrot.slane %v2095_v42, 4  ;;  %v2106_v56 = vrot.slane %v2105_v49, 4  ;;  %v317_v57 = vrot.slane %v315_v50, 5  ;;  %v6731_v46 = vld [vmem:[%s6655_s11 + $0x28] sm:$0xf]  ;;  %s4915_s23 = sshll.u32 %s8351_s19, 4  ;;  %s8421_s23 = int_to_ptr.vmem [resolvable:$true] %s4915_s23 }
  0x28   : > { %v325_v59 = vshll.u32 %v263_v44, 16  ;;  %v2832_v62 = vrot.slane %v6662_v15, 5  ;;  %v2835_v63 = vrot.slane %v6665_v16, 5  ;;  %v312_v0 = vor.u32 %v311_v54, %v308_v53  ;;  %v6740_v54 = vld [vmem:[%s6655_s11 + $0x2c] sm:$0x1]  ;;  %s8428_s15 = scalar_lea.sflag [#allocation3], %s208_s9 }
  0x29   : > { %5736 = vmatprep.mubr.msk.bf16.mxu1 %vm715_vm3, %v5039_v51  ;;  %v2101_v61 = vsel %vm6681_vm4, %v2096_v52, %v2100_v35  ;;  %v2111_v2 = vsel %vm6681_vm4, %v2106_v56, %v2110_v43  ;;  %v321_v4 = vrot.slane %v319_v58, 4  ;;  %v2113_v6 = vshrl.u32 %v5220_v55, 16  ;;  %v5119_v51 = vld [vmem:[%s8475_s1 + $0x4] sm:$0x3]  ;;  %v6940_v16 = vld [vmem:[%s6655_s11 + $0x7c] sm:$0xf] }
  0x2a   : > { %v327_v5 = vrot.slane %v325_v59, 5  ;;  %v5266_v7 = vcombine.low %v2101_v61, %v2111_v2  ;;  %v313_v8 = vrot.slane %v312_v0, 4  ;;  %v2116_v9 = vshll.u32 %v5220_v55, 16  ;;  %v235_v0 = vld [vmem:[%s6655_s11 + $0x24] sm:$0xf]  ;;  %s6471_s29 = scalar_lea.vmem %s8421_s23, 4096 }
  0x2b   : > { %v2122_v10 = vshll.u32 %v6700_v60, 16  ;;  %v322_v11 = vor.u32 %v321_v4, %v317_v57  ;;  %v2115_v12 = vrot.slane %v2113_v6, 4  ;;  %v2126_v13 = vshrl.u32 %v6700_v60, 16  ;;  %p6472_p12 = scmp.ne.s32.totalorder %s8421_s23, %s6471_s29  ;;  %s6551_s30 = smov [#allocation2]  }
  0x2c   : > { %v2132_v14 = vshll.u32 %v6708_v1, 16  ;;  %5872 = vmatprep.mubr.msk.bf16.mxu0 %vm715_vm3, %v5266_v7  ;;  %v318_v19 = vsel %vm6681_vm4, %v313_v8, %v317_v57  ;;  %v2118_v20 = vrot.slane %v2116_v9, 5  ;;  %v2839_v22 = vrot.slane %v6700_v60, 5  ;;  %v236_v7 = vld [vmem:[%s6655_s11 + $0x28] sm:$0xf]  ;;  %s6475_s4 = sshll.u32 %s6551_s30, 4  ;;  %s6476_s4 = int_to_ptr.vmem [resolvable:$false] %s6475_s4 }
  0x2d   : > { %v2124_v21 = vrot.slane %v2122_v10, 5  ;;  %v323_v24 = vrot.slane %v322_v11, 4  ;;  %v2128_v25 = vrot.slane %v2126_v13, 4  ;;  %v2842_v28 = vrot.slane %v6708_v1, 5  ;;  %v265_v13 = vld [vmem:[%s6655_s11 + $0x2c] sm:$0x1]  ;;  %p6473_p13 = pnand %p6472_p12, %p6614_p4  ;;  %p6478_p1 = scmp.lt.s32.totalorder %s8421_s23, %s6476_s4 }
  0x2e   : > { %v2134_v27 = vrot.slane %v2132_v14, 5  ;;  %v2119_v29 = vor.u32 %v2118_v20, %v2115_v12  ;;  %v6724_v30 = vrot.slane %v2839_v22, 4  ;;  %v330_v33 = vshrl.u32 %v233_v18, 16  ;;  %s6477_s5 = scalar_lea.vmem %s6476_s4, 8192 }
  0x2f   : > { %v333_v34 = vshll.u32 %v233_v18, 16  ;;  %v328_v35 = vsel %vm6681_vm4, %v323_v24, %v327_v5  ;;  %v2129_v36 = vor.u32 %v2128_v25, %v2124_v21  ;;  %v339_v38 = vshll.u32 %v234_v23, 16  ;;  %v5226_v24 = vld [vmem:[%s6655_s11 + $0x30] sm:$0xf]  ;;  %p6474_p0 = pneg %p6473_p13  ;;  %p6479_p2 = scmp.lt.s32.totalorder %s6477_s5, %s6471_s29 }
  0x30   : > { %v343_v39 = vshrl.u32 %v234_v23, 16  ;;  %v5040_v42 = vcombine.low %v318_v19, %v328_v35  ;;  %v2120_v43 = vrot.slane %v2119_v29, 4  ;;  %v332_v44 = vrot.slane %v330_v33, 4  ;;  %v6760_v33 = vld [vmem:[%s6655_s11 + $0x34] sm:$0xf] }
  0x31   : > { %v335_v45 = vrot.slane %v333_v34, 5  ;;  %v2130_v47 = vrot.slane %v2129_v36, 4  ;;  %v341_v48 = vrot.slane %v339_v38, 5  ;;  %v349_v50 = vshll.u32 %v264_v31, 16  ;;  %p6480_p3 = por %p6479_p2, %p6478_p1 }
  0x32   : > { %v345_v49 = vrot.slane %v343_v39, 4  ;;  %5737 = vmatmul.mubr.msk.bf16.vlgmr.msra.gmra.mrb[0].mxu1 %vm715_vm3, %v5040_v42  ;;  %v2125_v52 = vsel %vm6681_vm4, %v2120_v43, %v2124_v21  ;;  %v2137_v55 = vshrl.u32 %v5223_v40, 16  ;;  %v2140_v56 = vshll.u32 %v5223_v40, 16  ;;  %v6768_v40 = vld [vmem:[%s6655_s11 + $0x38] sm:$0x1] }
  0x33   : > { %v336_v53 = vor.u32 %v335_v45, %v332_v44  ;;  %5769 = vmatpush3.bf16.msra.mxu1 %v6668_v17  ;;  %v2135_v57 = vsel %vm6681_vm4, %v2130_v47, %v2134_v27  ;;  %v351_v59 = vrot.slane %v349_v50, 5  ;;  %v2146_v61 = vshll.u32 %v6731_v46, 16  ;;  %p6481_p5 = pnand %p6480_p3, %p6474_p0 }
  0x34   : > { %v346_v58 = vor.u32 %v345_v49, %v341_v48  ;;  %v5267_v2 = vcombine.low %v2125_v52, %v2135_v57  ;;  %v2139_v5 = vrot.slane %v2137_v55, 4  ;;  %v2142_v6 = vrot.slane %v2140_v56, 5  ;;  %6300 = vmatprep.subr.msk.bf16.mxu1 %vm764_vm0, %v5119_v51  ;;  %v237_v52 = vld [vmem:[%s6655_s11 + $0x30] sm:$0xf] }
  0x35   : > { %v337_v4 = vrot.slane %v336_v53, 4  ;;  %v2148_v9 = vrot.slane %v2146_v61, 5  ;;  %v2150_v17 = vshrl.u32 %v6731_v46, 16  ;;  %v2156_v10 = vshll.u32 %v6740_v54, 16 }
  0x36   : > { %v347_v8 = vrot.slane %v346_v58, 4  ;;  %5873 = vmatmul.mubr.msk.bf16.vlgmr.msra.gmra.mrb[0].mxu0 %vm715_vm3, %v5267_v2  ;;  %v2143_v12 = vor.u32 %v2142_v6, %v2139_v5  ;;  %v354_v14 = vshrl.u32 %v235_v0, 16  ;;  %v357_v18 = vshll.u32 %v235_v0, 16  ;;  %v238_v58 = vld [vmem:[%s6655_s11 + $0x34] sm:$0xf] }
  0x37   : > { %v342_v11 = vsel %vm6681_vm4, %v337_v4, %v341_v48  ;;  %5905 = vmatpush3.bf16.msra.mxu0 %v6687_v37  ;;  %v2152_v20 = vrot.slane %v2150_v17, 4  ;;  %v2158_v21 = vrot.slane %v2156_v10, 5  ;;  %v363_v23 = vshll.u32 %v236_v7, 16  ;;  %v266_v4 = vld [vmem:[%s6655_s11 + $0x38] sm:$0x1] }
  0x38   : > { %v352_v19 = vsel %vm6681_vm4, %v347_v8, %v351_v59  ;;  %v2144_v27 = vrot.slane %v2143_v12, 4  ;;  %v356_v29 = vrot.slane %v354_v14, 4  ;;  %v359_v31 = vrot.slane %v357_v18, 5  ;;  %6305 = vmatprep.subr.msk.bf16.mxu0 %vm764_vm0, %v6674_v26  ;;  %v5229_v12 = vld [vmem:[%s6655_s11 + $0x3c] sm:$0xf] }
  0x39   : > { %v5041_v25 = vcombine.low %v342_v11, %v352_v19  ;;  %v2153_v34 = vor.u32 %v2152_v20, %v2148_v9  ;;  %v365_v35 = vrot.slane %v363_v23, 5  ;;  %v367_v37 = vshrl.u32 %v236_v7, 16  ;;  %v6785_v20 = vld [vmem:[%s6655_s11 + $0x40] sm:$0xf] }
  0x3a   : > { %v373_v36 = vshll.u32 %v265_v13, 16  ;;  %v2149_v38 = vsel %vm6681_vm4, %v2144_v27, %v2148_v9  ;;  %v360_v39 = vor.u32 %v359_v31, %v356_v29  ;;  %v2161_v42 = vshrl.u32 %v5226_v24, 16 }
  0x3b   : > { %5740 = vmatprep.mubr.msk.bf16.mxu1 %vm715_vm3, %v5041_v25  ;;  %v2164_v43 = vshll.u32 %v5226_v24, 16  ;;  %v2154_v44 = vrot.slane %v2153_v34, 4  ;;  %v369_v45 = vrot.slane %v367_v37, 4  ;;  %v2170_v26 = vshll.u32 %v6760_v33, 16  ;;  %v6790_v34 = vld [vmem:[%s6655_s11 + $0x44] sm:$0x1] }
  0x3c   : > { %v375_v47 = vrot.slane %v373_v36, 5  ;;  %v361_v48 = vrot.slane %v360_v39, 4  ;;  %v2163_v49 = vrot.slane %v2161_v42, 4  ;;  %v2174_v51 = vshrl.u32 %v6760_v33, 16  ;;  %v239_v42 = vld [vmem:[%s6655_s11 + $0x3c] sm:$0xf] }
  0x3d   : > { %v2166_v50 = vrot.slane %v2164_v43, 5  ;;  %v2159_v53 = vsel %vm6681_vm4, %v2154_v44, %v2158_v21  ;;  %v370_v55 = vor.u32 %v369_v45, %v365_v35  ;;  %v2172_v56 = vrot.slane %v2170_v26, 5  ;;  %v240_v26 = vld [vmem:[%s6655_s11 + $0x40] sm:$0xf] }
  0x3e   : > { %v2180_v57 = vshll.u32 %v6768_v40, 16  ;;  %v5268_v59 = vcombine.low %v2149_v38, %v2159_v53  ;;  %v366_v61 = vsel %vm6681_vm4, %v361_v48, %v365_v35  ;;  %v2176_v2 = vrot.slane %v2174_v51, 4 }
  0x3f   : > { %v2167_v0 = vor.u32 %v2166_v50, %v2163_v49  ;;  %v371_v5 = vrot.slane %v370_v55, 4  ;;  %v378_v7 = vshrl.u32 %v237_v52, 16  ;;  %v381_v8 = vshll.u32 %v237_v52, 16 }
  0x40   : > { %v2182_v6 = vrot.slane %v2180_v57, 5  ;;  %5876 = vmatprep.mubr.msk.bf16.mxu0 %vm715_vm3, %v5268_v59  ;;  %v2177_v17 = vor.u32 %v2176_v2, %v2172_v56  ;;  %v387_v10 = vshll.u32 %v238_v58, 16  ;;  %v391_v11 = vshrl.u32 %v238_v58, 16  ;;  %v5232_v2 = vld [vmem:[%s6655_s11 + $0x48] sm:$0xf] }
  0x41   : > { %v2168_v9 = vrot.slane %v2167_v0, 4  ;;  %v376_v13 = vsel %vm6681_vm4, %v371_v5, %v375_v47  ;;  %v380_v14 = vrot.slane %v378_v7, 4  ;;  %v383_v18 = vrot.slane %v381_v8, 5  ;;  %v6808_v8 = vld [vmem:[%s6655_s11 + $0x4c] sm:$0xf] }
  0x42   : > { %v397_v19 = vshll.u32 %v266_v4, 16  ;;  %v5042_v21 = vcombine.low %v366_v61, %v376_v13  ;;  %v2178_v24 = vrot.slane %v2177_v17, 4  ;;  %v389_v25 = vrot.slane %v387_v10, 5  ;;  %v267_v61 = vld [vmem:[%s6655_s11 + $0x44] sm:$0x1] }
  0x43   : > { %v2173_v23 = vsel %vm6681_vm4, %v2168_v9, %v2172_v56  ;;  %v384_v27 = vor.u32 %v383_v18, %v380_v14  ;;  %v393_v29 = vrot.slane %v391_v11, 4  ;;  %v2185_v35 = vshrl.u32 %v5229_v12, 16 }
  0x44   : > { %v399_v31 = vrot.slane %v397_v19, 5  ;;  %5741 = vmatmul.mubr.msk.bf16.gmra.mrb[4].mxu1 %vm715_vm3, %v5042_v21  ;;  %v2183_v37 = vsel %vm6681_vm4, %v2178_v24, %v2182_v6  ;;  %v2188_v36 = vshll.u32 %v5229_v12, 16  ;;  %v2194_v38 = vshll.u32 %v6785_v20, 16 }
  0x45   : > { %v2198_v39 = vshrl.u32 %v6785_v20, 16  ;;  %v5269_v43 = vcombine.low %v2173_v23, %v2183_v37  ;;  %v385_v44 = vrot.slane %v384_v27, 4  ;;  %v394_v45 = vor.u32 %v393_v29, %v389_v25  ;;  %v6816_v23 = vld [vmem:[%s6655_s11 + $0x50] sm:$0x1]  ;;  %v6820_v27 = vld [vmem:[%s6655_s11 + $0x48] sm:$0xf] }
  0x46   : > { %v2187_v47 = vrot.slane %v2185_v35, 4  ;;  %v2190_v48 = vrot.slane %v2188_v36, 5  ;;  %v2196_v49 = vrot.slane %v2194_v38, 5  ;;  %v2204_v51 = vshll.u32 %v6790_v34, 16  ;;  %v6823_v36 = vld [vmem:[%s6655_s11 + $0x4c] sm:$0xf] }
  0x47   : > { %v2200_v50 = vrot.slane %v2198_v39, 4  ;;  %5877 = vmatmul.mubr.msk.bf16.gmra.mrb[4].mxu0 %vm715_vm3, %v5269_v43  ;;  %v390_v52 = vsel %vm6681_vm4, %v385_v44, %v389_v25  ;;  %v395_v53 = vrot.slane %v394_v45, 4  ;;  %v402_v55 = vshrl.u32 %v239_v42, 16 }
  0x48   : > { %v405_v56 = vshll.u32 %v239_v42, 16  ;;  %v2191_v57 = vor.u32 %v2190_v48, %v2187_v47  ;;  %v2206_v59 = vrot.slane %v2204_v51, 5  ;;  %v411_v0 = vshll.u32 %v240_v26, 16 }
  0x49   : > { %v2201_v58 = vor.u32 %v2200_v50, %v2196_v49  ;;  %v400_v4 = vsel %vm6681_vm4, %v395_v53, %v399_v31  ;;  %v404_v5 = vrot.slane %v402_v55, 4  ;;  %v415_v7 = vshrl.u32 %v240_v26, 16  ;;  %v268_v26 = vld [vmem:[%s6655_s11 + $0x50] sm:$0x1]  ;;  %v5235_v53 = vld [vmem:[%s6655_s11 + $0x54] sm:$0xf] }
  0x4a   : > { %v407_v6 = vrot.slane %v405_v56, 5  ;;  %v5043_v9 = vcombine.low %v390_v52, %v400_v4  ;;  %v2192_v17 = vrot.slane %v2191_v57, 4  ;;  %v413_v11 = vrot.slane %v411_v0, 5  ;;  %v6839_v4 = vld [vmem:[%s6655_s11 + $0x58] sm:$0xf] }
  0x4b   : > { %v2202_v10 = vrot.slane %v2201_v58, 4  ;;  %v417_v13 = vrot.slane %v415_v7, 4  ;;  %v421_v14 = vshll.u32 %v267_v61, 16  ;;  %v2209_v18 = vshrl.u32 %v5232_v2, 16 }
  0x4c   : > { %v408_v12 = vor.u32 %v407_v6, %v404_v5  ;;  %5744 = vmatprep.mubr.msk.bf16.mxu1 %vm715_vm3, %v5043_v9  ;;  %v2197_v19 = vsel %vm6681_vm4, %v2192_v17, %v2196_v49  ;;  %v2212_v24 = vshll.u32 %v5232_v2, 16  ;;  %v2218_v25 = vshll.u32 %v6808_v8, 16 }
  0x4d   : > { %v2207_v21 = vsel %vm6681_vm4, %v2202_v10, %v2206_v59  ;;  %v418_v35 = vor.u32 %v417_v13, %v413_v11  ;;  %v423_v37 = vrot.slane %v421_v14, 5  ;;  %v2211_v38 = vrot.slane %v2209_v18, 4 }
  0x4e   : > { %v5270_v29 = vcombine.low %v2197_v19, %v2207_v21  ;;  %v409_v31 = vrot.slane %v408_v12, 4  ;;  %v2214_v39 = vrot.slane %v2212_v24, 5  ;;  %v2220_v42 = vrot.slane %v2218_v25, 5  ;;  %v6845_v12 = vld [vmem:[%s6655_s11 + $0x5c] sm:$0x1] }
  0x4f   : > { %v2222_v43 = vshrl.u32 %v6808_v8, 16  ;;  %v419_v45 = vrot.slane %v418_v35, 4  ;;  %v2228_v47 = vshll.u32 %v6816_v23, 16  ;;  %v426_v48 = vshrl.u32 %v6820_v27, 16  ;;  %v6849_v24 = vld [vmem:[%s6655_s11 + $0x54] sm:$0xf] }
  0x50   : > { %5880 = vmatprep.mubr.msk.bf16.mxu0 %vm715_vm3, %v5270_v29  ;;  %v414_v44 = vsel %vm6681_vm4, %v409_v31, %v413_v11  ;;  %v2215_v49 = vor.u32 %v2214_v39, %v2211_v38  ;;  %v429_v51 = vshll.u32 %v6820_v27, 16  ;;  %v435_v52 = vshll.u32 %v6823_v36, 16 }
  0x51   : > { %v2224_v50 = vrot.slane %v2222_v43, 4  ;;  %v424_v55 = vsel %vm6681_vm4, %v419_v45, %v423_v37  ;;  %v2230_v56 = vrot.slane %v2228_v47, 5  ;;  %v428_v57 = vrot.slane %v426_v48, 4  ;;  %v6855_v37 = vld [vmem:[%s6655_s11 + $0x58] sm:$0xf] }
  0x52   : > { %v439_v58 = vshrl.u32 %v6823_v36, 16  ;;  %v5044_v59 = vcombine.low %v414_v44, %v424_v55  ;;  %v2216_v61 = vrot.slane %v2215_v49, 4  ;;  %v431_v2 = vrot.slane %v429_v51, 5 }
  0x53   : > { %v2225_v0 = vor.u32 %v2224_v50, %v2220_v42  ;;  %v437_v5 = vrot.slane %v435_v52, 5  ;;  %v445_v7 = vshll.u32 %v268_v26, 16  ;;  %v2233_v9 = vshrl.u32 %v5235_v53, 16  ;;  %v269_v26 = vld [vmem:[%s6655_s11 + $0x5c] sm:$0x1] }
  0x54   : > { %v441_v6 = vrot.slane %v439_v58, 4  ;;  %5745 = vmatmul.mubr.msk.bf16.gmra.mrb[8].mxu1 %vm715_vm3, %v5044_v59  ;;  %v2221_v17 = vsel %vm6681_vm4, %v2216_v61, %v2220_v42  ;;  %v432_v11 = vor.u32 %v431_v2, %v428_v57  ;;  %v2236_v13 = vshll.u32 %v5235_v53, 16  ;;  %v5238_v53 = vld [vmem:[%s6655_s11 + $0x60] sm:$0xf]  ;;  %v6869_v59 = vld [vmem:[%s6655_s11 + $0x64] sm:$0xf] }
  0x55   : > { %v2226_v10 = vrot.slane %v2225_v0, 4  ;;  %v447_v18 = vrot.slane %v445_v7, 5  ;;  %v2235_v19 = vrot.slane %v2233_v9, 4  ;;  %v2242_v21 = vshll.u32 %v6839_v4, 16  ;;  %v6876_v9 = vld [vmem:[%s6655_s11 + $0x68] sm:$0x1] }
  0x56   : > { %v442_v14 = vor.u32 %v441_v6, %v437_v5  ;;  %v433_v29 = vrot.slane %v432_v11, 4  ;;  %v2238_v31 = vrot.slane %v2236_v13, 5  ;;  %v2246_v35 = vshrl.u32 %v6839_v4, 16 }
  0x57   : > { %v2231_v25 = vsel %vm6681_vm4, %v2226_v10, %v2230_v56  ;;  %v2244_v42 = vrot.slane %v2242_v21, 5  ;;  %v2252_v43 = vshll.u32 %v6845_v12, 16  ;;  %v450_v48 = vshrl.u32 %v6849_v24, 16 }
  0x58   : > { %v5271_v38 = vcombine.low %v2221_v17, %v2231_v25  ;;  %v443_v39 = vrot.slane %v442_v14, 4  ;;  %v438_v44 = vsel %vm6681_vm4, %v433_v29, %v437_v5  ;;  %v2239_v45 = vor.u32 %v2238_v31, %v2235_v19  ;;  %v6880_v19 = vld [vmem:[%s6655_s11 + $0x60] sm:$0xf] }
  0x59   : > { %v2248_v47 = vrot.slane %v2246_v35, 4  ;;  %v2254_v50 = vrot.slane %v2252_v43, 5  ;;  %v453_v51 = vshll.u32 %v6849_v24, 16  ;;  %v459_v52 = vshll.u32 %v6855_v37, 16  ;;  %v6886_v35 = vld [vmem:[%s6655_s11 + $0x64] sm:$0xf] }
  0x5a   : > { %5881 = vmatmul.mubr.msk.bf16.gmra.mrb[8].mxu0 %vm715_vm3, %v5271_v38  ;;  %v448_v49 = vsel %vm6681_vm4, %v443_v39, %v447_v18  ;;  %v2240_v56 = vrot.slane %v2239_v45, 4  ;;  %v452_v58 = vrot.slane %v450_v48, 4  ;;  %v463_v2 = vshrl.u32 %v6855_v37, 16 }
  0x5b   : > { %v5045_v55 = vcombine.low %v438_v44, %v448_v49  ;;  %v2249_v57 = vor.u32 %v2248_v47, %v2244_v42  ;;  %v455_v61 = vrot.slane %v453_v51, 5  ;;  %v461_v0 = vrot.slane %v459_v52, 5 }
  0x5c   : > { %v469_v5 = vshll.u32 %v269_v26, 16  ;;  %v2245_v6 = vsel %vm6681_vm4, %v2240_v56, %v2244_v42  ;;  %v2257_v17 = vshrl.u32 %v5238_v53, 16  ;;  %v2260_v10 = vshll.u32 %v5238_v53, 16 }
  0x5d   : > { %5748 = vmatprep.mubr.msk.bf16.mxu1 %vm715_vm3, %v5045_v55  ;;  %v2250_v7 = vrot.slane %v2249_v57, 4  ;;  %v456_v11 = vor.u32 %v455_v61, %v452_v58  ;;  %v465_v13 = vrot.slane %v463_v2, 4  ;;  %v2266_v18 = vshll.u32 %v6869_v59, 16  ;;  %v5298_v58 = vld [vmem:[%s6655_s11 + $0xc] sm:$0xe] }
  0x5e   : > { %v471_v14 = vrot.slane %v469_v5, 5  ;;  %v2259_v25 = vrot.slane %v2257_v17, 4  ;;  %v2262_v29 = vrot.slane %v2260_v10, 5  ;;  %v2270_v31 = vshrl.u32 %v6869_v59, 16 }
  0x5f   : > { %v2255_v21 = vsel %vm6681_vm4, %v2250_v7, %v2254_v50  ;;  %v457_v39 = vrot.slane %v456_v11, 4  ;;  %v466_v42 = vor.u32 %v465_v13, %v461_v0  ;;  %v2268_v43 = vrot.slane %v2266_v18, 5  ;;  %v270_v50 = vld [vmem:[%s6655_s11 + $0x68] sm:$0x1] }
  0x60   : > { %v5272_v38 = vcombine.low %v2245_v6, %v2255_v21  ;;  %v2263_v44 = vor.u32 %v2262_v29, %v2259_v25  ;;  %v2272_v45 = vrot.slane %v2270_v31, 4  ;;  %v2276_v47 = vshll.u32 %v6876_v9, 16  ;;  %v6914_v29 = vld [vmem:[%s6655_s11 + $0x70] sm:$0xf] }
  0x61   : > { %v474_v26 = vshrl.u32 %v6880_v19, 16  ;;  %v462_v48 = vsel %vm6681_vm4, %v457_v39, %v461_v0  ;;  %v467_v49 = vrot.slane %v466_v42, 4  ;;  %v477_v51 = vshll.u32 %v6880_v19, 16  ;;  %v6901_v0 = vld [vmem:[%s6655_s11 + $0x6c] sm:$0xf] }
  0x62   : > { %5884 = vmatprep.mubr.msk.bf16.mxu0 %vm715_vm3, %v5272_v38  ;;  %v483_v52 = vshll.u32 %v6886_v35, 16  ;;  %v2264_v53 = vrot.slane %v2263_v44, 4  ;;  %v2273_v55 = vor.u32 %v2272_v45, %v2268_v43  ;;  %v2278_v56 = vrot.slane %v2276_v47, 5 }
  0x63   : > { %v476_v57 = vrot.slane %v474_v26, 4  ;;  %v472_v61 = vsel %vm6681_vm4, %v467_v49, %v471_v14  ;;  %v479_v2 = vrot.slane %v477_v51, 5  ;;  %v487_v6 = vshrl.u32 %v6886_v35, 16  ;;  %v271_v26 = vld [vmem:[%s6655_s11 + $0x74] sm:$0x1] }
  0x64   : > { %v485_v5 = vrot.slane %v483_v52, 5  ;;  %v5046_v7 = vcombine.low %v462_v48, %v472_v61  ;;  %v2269_v17 = vsel %vm6681_vm4, %v2264_v53, %v2268_v43  ;;  %v2274_v10 = vrot.slane %v2273_v55, 4  ;;  %v5299_v48 = vld [vmem:[%s6655_s11 + $0x18] sm:$0xe] }
  0x65   : > { %v493_v11 = vshll.u32 %v270_v50, 16  ;;  %v480_v14 = vor.u32 %v479_v2, %v476_v57  ;;  %v489_v18 = vrot.slane %v487_v6, 4  ;;  %v5314_v21 = vrot.slane %v5298_v58, 9  ;;  %v6933_v53 = vld [vmem:[%s6655_s11 + $0x78] sm:$0xf] }
  0x66   : > { %v2834_v25 = vrot.slane %v2832_v62, 4  ;;  %5749 = vmatmul.mubr.msk.bf16.gmra.mrb[12].mxu1 %vm715_vm3, %v5046_v7  ;;  %v2279_v31 = vsel %vm6681_vm4, %v2274_v10, %v2278_v56  ;;  %v498_v39 = vshrl.u32 %v6901_v0, 16  ;;  %v501_v42 = vshll.u32 %v6901_v0, 16  ;;  %v272_v57 = vld [vmem:[%s6655_s11 + $0x80] sm:$0x1] }
  0x67   : > { %v495_v38 = vrot.slane %v493_v11, 5  ;;  %v5273_v43 = vcombine.low %v2269_v17, %v2279_v31  ;;  %v481_v44 = vrot.slane %v480_v14, 4  ;;  %v490_v45 = vor.u32 %v489_v18, %v485_v5  ;;  %v5300_v10 = vld [vmem:[%s6655_s11 + $0x24] sm:$0xe] }
  0x68   : > { %v2833_v47 = vsel %vm6907_vm7, %v5314_v21, %v2832_v62  ;;  %v2836_v49 = vsel %vm6907_vm7, %v2834_v25, %v2835_v63  ;;  %v500_v50 = vrot.slane %v498_v39, 4  ;;  %v503_v51 = vrot.slane %v501_v42, 5  ;;  %v6959_v39 = vld [vmem:[%s6655_s11 + $0x84] sm:$0xf] }
  0x69   : > { %v507_v52 = vshll.u32 %v6914_v29, 16  ;;  %5885 = vmatmul.mubr.msk.bf16.gmra.mrb[12].mxu0 %vm715_vm3, %v5273_v43  ;;  %v486_v15 = vsel %vm6681_vm4, %v481_v44, %v485_v5  ;;  %v491_v62 = vrot.slane %v490_v45, 4  ;;  %v5331_v55 = vcombine.low %v2833_v47, %v2836_v49  ;;  %v6967_v43 = vld [vmem:[%s6655_s11 + $0x88] sm:$0xf] }
  0x6a   : > { %v511_v56 = vshrl.u32 %v6914_v29, 16  ;;  %v504_v63 = vor.u32 %v503_v51, %v500_v50  ;;  %v517_v61 = vshll.u32 %v271_v26, 16  ;;  %v5315_v2 = vrot.slane %v5299_v48, 9 }
  0x6b   : > { %v509_v58 = vrot.slane %v507_v52, 5  ;;  %v496_v6 = vsel %vm6681_vm4, %v491_v62, %v495_v38  ;;  %5906 = vmatprep.mubr.msk.bf16.mxu0 %vm715_vm3, %v5331_v55  ;;  %v2843_v5 = vsel %vm6907_vm7, %v6724_v30, %v2842_v28  ;;  %v522_v17 = vshrl.u32 %v6933_v53, 16  ;;  %v273_v52 = vld [vmem:[%s6655_s11 + $0x8c] sm:$0x1] }
  0x6c   : > { %v513_v7 = vrot.slane %v511_v56, 4  ;;  %v5047_v11 = vcombine.low %v486_v15, %v496_v6  ;;  %v505_v14 = vrot.slane %v504_v63, 4  ;;  %v519_v18 = vrot.slane %v517_v61, 5 }
  0x6d   : > { %v2840_v21 = vsel %vm6907_vm7, %v5315_v2, %v2839_v22  ;;  %v524_v38 = vrot.slane %v522_v17, 4  ;;  %v525_v1 = vshll.u32 %v6933_v53, 16  ;;  %v531_v30 = vshll.u32 %v6940_v16, 16  ;;  %v6972_v22 = vld [vmem:[%s8475_s1 + $0xe] sm:$0x3] }
  0x6e   : > { %v514_v25 = vor.u32 %v513_v7, %v509_v58  ;;  %v5332_v31 = vcombine.low %v2840_v21, %v2843_v5  ;;  %5752 = vmatprep.mubr.msk.bf16.mxu1 %vm715_vm3, %v5047_v11  ;;  %v510_v28 = vsel %vm6681_vm4, %v505_v14, %v509_v58  ;;  %v535_v60 = vshrl.u32 %v6940_v16, 16  ;;  %v6991_v5 = vld [vmem:[%s6655_s11 + $0x90] sm:$0xf] }
  0x6f   : > { %v541_v42 = vshll.u32 %v272_v57, 16  ;;  %v527_v45 = vrot.slane %v525_v1, 5  ;;  %v5316_v47 = vrot.slane %v5300_v10, 9  ;;  %v2846_v26 = vrot.slane %v6731_v46, 5  ;;  %v5301_v57 = vld [vmem:[%s6655_s11 + $0x30] sm:$0xe] }
  0x70   : > { %v515_v44 = vrot.slane %v514_v25, 4  ;;  %v533_v48 = vrot.slane %v531_v30, 5  ;;  %v537_v49 = vrot.slane %v535_v60, 4  ;;  %v2849_v51 = vrot.slane %v6740_v54, 5  ;;  %v7003_v30 = vld [vmem:[%s6655_s11 + $0x94] sm:$0xf] }
  0x71   : > { %v543_v50 = vrot.slane %v541_v42, 5  ;;  %5907 = vmatmul.mubr.msk.bf16.vlgmr.msra.gmra.mrb[0].mxu0 %vm715_vm3, %v5332_v31  ;;  %v528_v62 = vor.u32 %v527_v45, %v524_v38  ;;  %v2847_v55 = vsel %vm6907_vm7, %v5316_v47, %v2846_v26  ;;  %v2848_v56 = vrot.slane %v2846_v26, 4  ;;  %v274_v60 = vld [vmem:[%s6655_s11 + $0x98] sm:$0x1]  ;;  %v5302_v26 = vld [vmem:[%s6655_s11 + $0x3c] sm:$0xe] }
  0x72   : > { %v520_v15 = vsel %vm6681_vm4, %v515_v44, %v519_v18  ;;  %5939 = vmatpush3.bf16.msra.mxu0 %v6691_v41  ;;  %v538_v46 = vor.u32 %v537_v49, %v533_v48  ;;  %v546_v58 = vshrl.u32 %v6959_v39, 16  ;;  %v549_v54 = vshll.u32 %v6959_v39, 16 }
  0x73   : > { %v5048_v63 = vcombine.low %v510_v28, %v520_v15  ;;  %v529_v61 = vrot.slane %v528_v62, 4  ;;  %v2850_v2 = vsel %vm6907_vm7, %v2848_v56, %v2849_v51  ;;  %v555_v6 = vshll.u32 %v6967_v43, 16  ;;  %6306 = vmatprep.subr.msk.bf16.mxu0 %vm764_vm0, %v6972_v22 }
  0x74   : > { %v559_v7 = vshrl.u32 %v6967_v43, 16  ;;  %v539_v41 = vrot.slane %v538_v46, 4  ;;  %v5333_v17 = vcombine.low %v2847_v55, %v2850_v2  ;;  %v548_v10 = vrot.slane %v546_v58, 4  ;;  %v7023_v46 = vld [vmem:[%s6655_s11 + $0xa0] sm:$0xf] }
  0x75   : > { %5753 = vmatmul.mubr.msk.bf16.gmra.mrb[16].mxu1 %vm715_vm3, %v5048_v63  ;;  %v551_v11 = vrot.slane %v549_v54, 5  ;;  %v534_v14 = vsel %vm6681_vm4, %v529_v61, %v533_v48  ;;  %v557_v18 = vrot.slane %v555_v6, 5  ;;  %v565_v25 = vshll.u32 %v273_v52, 16  ;;  %v7012_v52 = vld [vmem:[%s6655_s11 + $0x9c] sm:$0xf] }
  0x76   : > { %v561_v21 = vrot.slane %v559_v7, 4  ;;  %v544_v31 = vsel %vm6681_vm4, %v539_v41, %v543_v50  ;;  %5910 = vmatprep.mubr.msk.bf16.mxu0 %vm715_vm3, %v5333_v17  ;;  %v5317_v1 = vrot.slane %v5301_v57, 9  ;;  %v2853_v28 = vrot.slane %v6760_v33, 5 }
  0x77   : > { %v552_v38 = vor.u32 %v551_v11, %v548_v10  ;;  %v5049_v42 = vcombine.low %v534_v14, %v544_v31  ;;  %v567_v45 = vrot.slane %v565_v25, 5  ;;  %v2856_v47 = vrot.slane %v6768_v40, 5  ;;  %v275_v10 = vld [vmem:[%s6655_s11 + $0xa4] sm:$0x1]  ;;  %v5303_v11 = vld [vmem:[%s6655_s11 + $0x48] sm:$0xe] }
  0x78   : > { %v562_v44 = vor.u32 %v561_v21, %v557_v18  ;;  %v2854_v49 = vsel %vm6907_vm7, %v5317_v1, %v2853_v28  ;;  %v2855_v50 = vrot.slane %v2853_v28, 4  ;;  %v570_v51 = vshrl.u32 %v6991_v5, 16 }
  0x79   : > { %v553_v48 = vrot.slane %v552_v38, 4  ;;  %5756 = vmatprep.mubr.msk.bf16.mxu1 %vm715_vm3, %v5049_v42  ;;  %v573_v15 = vshll.u32 %v6991_v5, 16  ;;  %v579_v62 = vshll.u32 %v7003_v30, 16  ;;  %v583_v40 = vshrl.u32 %v7003_v30, 16 }
  0x7a   : > { %v563_v33 = vrot.slane %v562_v44, 4  ;;  %v2857_v56 = vsel %vm6907_vm7, %v2855_v50, %v2856_v47  ;;  %v572_v57 = vrot.slane %v570_v51, 4  ;;  %v589_v63 = vshll.u32 %v274_v60, 16 }
  0x7b   : > { %v558_v55 = vsel %vm6681_vm4, %v553_v48, %v557_v18  ;;  %v5334_v54 = vcombine.low %v2854_v49, %v2857_v56  ;;  %v575_v61 = vrot.slane %v573_v15, 5  ;;  %v581_v2 = vrot.slane %v579_v62, 5  ;;  %v7049_v56 = vld [vmem:[%s6655_s11 + $0xac] sm:$0xf] }
  0x7c   : > { %v568_v58 = vsel %vm6681_vm4, %v563_v33, %v567_v45  ;;  %v585_v7 = vrot.slane %v583_v40, 4  ;;  %v591_v41 = vrot.slane %v589_v63, 5  ;;  %v5318_v17 = vrot.slane %v5302_v26, 9  ;;  %v7044_v33 = vld [vmem:[%s6655_s11 + $0xa8] sm:$0xf] }
  0x7d   : > { %v5050_v6 = vcombine.low %v558_v55, %v568_v58  ;;  %5911 = vmatmul.mubr.msk.bf16.gmra.mrb[4].mxu0 %vm715_vm3, %v5334_v54  ;;  %v576_v14 = vor.u32 %v575_v61, %v572_v57  ;;  %v2860_v18 = vrot.slane %v6785_v20, 5  ;;  %v2863_v21 = vrot.slane %v6790_v34, 5  ;;  %v276_v61 = vld [vmem:[%s6655_s11 + $0xb0] sm:$0x1] }
  0x7e   : > { %v594_v25 = vshrl.u32 %v7012_v52, 16  ;;  %v586_v31 = vor.u32 %v585_v7, %v581_v2  ;;  %v597_v38 = vshll.u32 %v7012_v52, 16  ;;  %v603_v1 = vshll.u32 %v7023_v46, 16 }
  0x7f   : > { %5757 = vmatmul.mubr.msk.bf16.gmra.mrb[20].mxu1 %vm715_vm3, %v5050_v6  ;;  %v607_v28 = vshrl.u32 %v7023_v46, 16  ;;  %v577_v60 = vrot.slane %v576_v14, 4  ;;  %v2861_v42 = vsel %vm6907_vm7, %v5318_v17, %v2860_v18  ;;  %v2862_v20 = vrot.slane %v2860_v18, 4  ;;  %v7064_v14 = vld [vmem:[%s6655_s11 + $0xb4] sm:$0xf] }
  0x80   : > { %v596_v44 = vrot.slane %v594_v25, 4  ;;  %v587_v34 = vrot.slane %v586_v31, 4  ;;  %v599_v45 = vrot.slane %v597_v38, 5  ;;  %v605_v47 = vrot.slane %v603_v1, 5 }
  0x81   : > { %v609_v26 = vrot.slane %v607_v28, 4  ;;  %v582_v48 = vsel %vm6681_vm4, %v577_v60, %v581_v2  ;;  %v2864_v49 = vsel %vm6907_vm7, %v2862_v20, %v2863_v21  ;;  %v613_v50 = vshll.u32 %v275_v10, 16  ;;  %v5304_v2 = vld [vmem:[%s6655_s11 + $0x54] sm:$0xe] }
  0x82   : > { %v5319_v51 = vrot.slane %v5303_v11, 9  ;;  %v592_v15 = vsel %vm6681_vm4, %v587_v34, %v591_v41  ;;  %v5335_v62 = vcombine.low %v2861_v42, %v2864_v49  ;;  %v600_v40 = vor.u32 %v599_v45, %v596_v44  ;;  %v7073_v42 = vld [vmem:[%s6655_s11 + $0xb8] sm:$0xf]  ;;  %v277_v49 = vld [vmem:[%s6655_s11 + $0xbc] sm:$0x1] }
  0x83   : > { %v610_v55 = vor.u32 %v609_v26, %v605_v47  ;;  %v5051_v57 = vcombine.low %v582_v48, %v592_v15  ;;  %v615_v63 = vrot.slane %v613_v50, 5  ;;  %v2867_v58 = vrot.slane %v6808_v8, 5 }
  0x84   : > { %v2870_v54 = vrot.slane %v6816_v23, 5  ;;  %5914 = vmatprep.mubr.msk.bf16.mxu0 %vm715_vm3, %v5335_v62  ;;  %v601_v6 = vrot.slane %v600_v40, 4  ;;  %v618_v41 = vshrl.u32 %v7044_v33, 16  ;;  %v621_v17 = vshll.u32 %v7044_v33, 16 }
  0x85   : > { %v611_v7 = vrot.slane %v610_v55, 4  ;;  %5760 = vmatprep.mubr.msk.bf16.mxu1 %vm715_vm3, %v5051_v57  ;;  %v2868_v10 = vsel %vm6907_vm7, %v5319_v51, %v2867_v58  ;;  %v2869_v11 = vrot.slane %v2867_v58, 4  ;;  %v627_v8 = vshll.u32 %v7049_v56, 16  ;;  %v5305_v55 = vld [vmem:[%s6655_s11 + $0x60] sm:$0xe] }
  0x86   : > { %v631_v23 = vshrl.u32 %v7049_v56, 16  ;;  %v606_v18 = vsel %vm6681_vm4, %v601_v6, %v605_v47  ;;  %v620_v25 = vrot.slane %v618_v41, 4  ;;  %v623_v31 = vrot.slane %v621_v17, 5  ;;  %v5306_v6 = vld [vmem:[%s6655_s11 + $0x6c] sm:$0xe] }
  0x87   : > { %v616_v21 = vsel %vm6681_vm4, %v611_v7, %v615_v63  ;;  %v2871_v1 = vsel %vm6907_vm7, %v2869_v11, %v2870_v54  ;;  %v629_v28 = vrot.slane %v627_v8, 5  ;;  %v637_v34 = vshll.u32 %v276_v61, 16  ;;  %v5242_v11 = vld [vmem:[%s6655_s11 + $0x70] sm:$0xf]  ;;  %v5243_v8 = vld [vmem:[%s6655_s11 + $0x74] sm:$0x1] }
  0x88   : > { %v5052_v38 = vcombine.low %v606_v18, %v616_v21  ;;  %v633_v60 = vrot.slane %v631_v23, 4  ;;  %v5336_v20 = vcombine.low %v2868_v10, %v2871_v1  ;;  %v624_v44 = vor.u32 %v623_v31, %v620_v25 }
  0x89   : > { %v5320_v45 = vrot.slane %v5304_v2, 9  ;;  %v2874_v26 = vrot.slane %v6839_v4, 5  ;;  %v2877_v48 = vrot.slane %v6845_v12, 5  ;;  %v642_v50 = vshrl.u32 %v7064_v14, 16 }
  0x8a   : > { %5761 = vmatmul.mubr.msk.bf16.gmra.mrb[24].mxu1 %vm715_vm3, %v5052_v38  ;;  %v634_v47 = vor.u32 %v633_v60, %v629_v28  ;;  %5915 = vmatmul.mubr.msk.bf16.gmra.mrb[8].mxu0 %vm715_vm3, %v5336_v20  ;;  %v625_v51 = vrot.slane %v624_v44, 4  ;;  %v639_v15 = vrot.slane %v637_v34, 5  ;;  %v645_v62 = vshll.u32 %v7064_v14, 16 }
  0x8b   : > { %v651_v40 = vshll.u32 %v7073_v42, 16  ;;  %v2875_v4 = vsel %vm6907_vm7, %v5320_v45, %v2874_v26  ;;  %v2876_v12 = vrot.slane %v2874_v26, 4  ;;  %v644_v63 = vrot.slane %v642_v50, 4 }
  0x8c   : > { %v635_v57 = vrot.slane %v634_v47, 4  ;;  %v630_v58 = vsel %vm6681_vm4, %v625_v51, %v629_v28  ;;  %v647_v54 = vrot.slane %v645_v62, 5  ;;  %v655_v2 = vshrl.u32 %v7073_v42, 16  ;;  %v5307_v47 = vld [vmem:[%s6655_s11 + $0x78] sm:$0xe] }
  0x8d   : > { %v653_v61 = vrot.slane %v651_v40, 5  ;;  %v2878_v41 = vsel %vm6907_vm7, %v2876_v12, %v2877_v48  ;;  %v661_v17 = vshll.u32 %v277_v49, 16  ;;  %v5321_v10 = vrot.slane %v5305_v55, 9  ;;  %v6414_v51 = vld [vmem:[%s6655_s11] sm:$0xf] }
  0x8e   : > { %v640_v7 = vsel %vm6681_vm4, %v635_v57, %v639_v15  ;;  %v5337_v18 = vcombine.low %v2875_v4, %v2878_v41  ;;  %v648_v21 = vor.u32 %v647_v54, %v644_v63  ;;  %v657_v25 = vrot.slane %v655_v2, 4  ;;  %v7111_v15 = vld [vmem:[%s6655_s11 + $0x4] sm:$0xf]  ;;  %v7115_v40 = vld [vmem:[%s6655_s11 + $0x7c] sm:$0xf] }
  0x8f   : > { %v5053_v23 = vcombine.low %v630_v58, %v640_v7  ;;  %v663_v31 = vrot.slane %v661_v17, 5  ;;  %v2881_v38 = vrot.slane %v6869_v59, 5  ;;  %v2884_v1 = vrot.slane %v6876_v9, 5  ;;  %v7118_v55 = vld [vmem:[%s6655_s11 + $0x80] sm:$0x1] }
  0x90   : > { %v5322_v28 = vrot.slane %v5306_v6, 9  ;;  %5918 = vmatprep.mubr.msk.bf16.mxu0 %vm715_vm3, %v5337_v18  ;;  %v649_v60 = vrot.slane %v648_v21, 4  ;;  %v658_v20 = vor.u32 %v657_v25, %v653_v61  ;;  %v2888_v44 = vrot.slane %v5242_v11, 5  ;;  %v5248_v57 = vld [vmem:[%s6655_s11 + $0x88] sm:$0xf] }
  0x91   : > { %5764 = vmatprep.mubr.msk.bf16.mxu1 %vm715_vm3, %v5053_v23  ;;  %v2891_v34 = vrot.slane %v5243_v8, 5  ;;  %v2882_v45 = vsel %vm6907_vm7, %v5321_v10, %v2881_v38  ;;  %v2883_v59 = vrot.slane %v2881_v38, 4  ;;  %v5071_v62 = vcombine.low %v6414_v51, %v7111_v15  ;;  %v5249_v54 = vld [vmem:[%s6655_s11 + $0x8c] sm:$0x1]  ;;  %v5251_v17 = vld [vmem:[%s6655_s11 + $0x94] sm:$0xf] }
  0x92   : > { %v654_v9 = vsel %vm6681_vm4, %v649_v60, %v653_v61  ;;  %v659_v26 = vrot.slane %v658_v20, 4  ;;  %v2889_v48 = vsel %vm6907_vm7, %v5322_v28, %v2888_v44  ;;  %v2890_v49 = vrot.slane %v2888_v44, 4  ;;  %v5308_v61 = vld [vmem:[%s6655_s11 + $0x84] sm:$0xe]  ;;  %v5309_v23 = vld [vmem:[%s6655_s11 + $0x90] sm:$0xe] }
  0x93   : > { %v2885_v50 = vsel %vm6907_vm7, %v2883_v59, %v2884_v1  ;;  %v5323_v58 = vrot.slane %v5307_v47, 9  ;;  %v2895_v7 = vrot.slane %v7115_v40, 5  ;;  %v2898_v41 = vrot.slane %v7118_v55, 5  ;;  %v5252_v25 = vld [vmem:[%s6655_s11 + $0x98] sm:$0x1] }
  0x94   : > { %v664_v4 = vsel %vm6681_vm4, %v659_v26, %v663_v31  ;;  %v5338_v12 = vcombine.low %v2882_v45, %v2885_v50  ;;  %v2892_v63 = vsel %vm6907_vm7, %v2890_v49, %v2891_v34  ;;  %v5324_v10 = vrot.slane %v5308_v61, 9  ;;  %v5254_v31 = vld [vmem:[%s6655_s11 + $0xa0] sm:$0xf]  ;;  %v5255_v60 = vld [vmem:[%s6655_s11 + $0xa4] sm:$0x1] }
  0x95   : > { %v5054_v2 = vcombine.low %v654_v9, %v664_v4  ;;  %v5339_v6 = vcombine.low %v2889_v48, %v2892_v63  ;;  %v2902_v11 = vrot.slane %v5248_v57, 5  ;;  %v2905_v8 = vrot.slane %v5249_v54, 5  ;;  %v5310_v20 = vld [vmem:[%s6655_s11 + $0x9c] sm:$0xe]  ;;  %v6416_v44 = vld [vmem:[%s6655_s11 + $0xc] sm:$0xf] }
  0x96   : > { %5919 = vmatmul.mubr.msk.bf16.gmra.mrb[12].mxu0 %vm715_vm3, %v5338_v12  ;;  %v2896_v18 = vsel %vm6907_vm7, %v5323_v58, %v2895_v7  ;;  %v2897_v21 = vrot.slane %v2895_v7, 4  ;;  %v2909_v28 = vrot.slane %v5251_v17, 5  ;;  %v7145_v34 = vld [vmem:[%s6655_s11 + $0x10] sm:$0xf]  ;;  %v6418_v47 = vld [vmem:[%s6655_s11 + $0x18] sm:$0xf] }
  0x97   : > { %5765 = vmatmul.mubr.msk.bf16.gmra.mrb[28].mxu1 %vm715_vm3, %v5054_v2  ;;  %5922 = vmatprep.mubr.msk.bf16.mxu0 %vm715_vm3, %v5339_v6  ;;  %v2903_v38 = vsel %vm6907_vm7, %v5324_v10, %v2902_v11  ;;  %v2904_v1 = vrot.slane %v2902_v11, 4  ;;  %v5072_v45 = vcombine.low %v6416_v44, %v7145_v34  ;;  %v7152_v9 = vld [vmem:[%s6655_s11 + $0x1c] sm:$0xf]  ;;  %v5325_v48 = vrot.slane %v5309_v23, 9  ;;  %v5257_v57 = vld [vmem:[%s6655_s11 + $0xac] sm:$0xf] }
  0x98   : > { %5770 = vmatprep.mubr.msk.bf16.mxu1 %vm715_vm3, %v5071_v62  ;;  %v2899_v59 = vsel %vm6907_vm7, %v2897_v21, %v2898_v41  ;;  %v5073_v26 = vcombine.low %v6418_v47, %v7152_v9  ;;  %v2911_v51 = vrot.slane %v2909_v28, 4  ;;  %v2912_v62 = vrot.slane %v5252_v25, 5  ;;  %v6420_v54 = vld [vmem:[%s8475_s1 + $0x4] sm:$0x3]  ;;  %v5260_v2 = vld [vmem:[%s6655_s11 + $0xb8] sm:$0xf] }
  0x99   : > { %v5340_v49 = vcombine.low %v2896_v18, %v2899_v59  ;;  %v2906_v50 = vsel %vm6907_vm7, %v2904_v1, %v2905_v8  ;;  %v5326_v12 = vrot.slane %v5310_v20, 9  ;;  %v2916_v63 = vrot.slane %v5254_v31, 5  ;;  %v7167_v7 = vld [vmem:[%s8475_s1 + $0x6] sm:$0x3]  ;;  %v5258_v10 = vld [vmem:[%s6655_s11 + $0xb0] sm:$0x1] }
  0x9a   : > { %v5341_v4 = vcombine.low %v2903_v38, %v2906_v50  ;;  %v2919_v58 = vrot.slane %v5255_v60, 5  ;;  %v1483_v61 = vsel %vm764_vm0, %v6420_v54, 0  ;;  %v2910_v41 = vsel %vm6907_vm7, %v5325_v48, %v2909_v28  ;;  %v5311_v11 = vld [vmem:[%s6655_s11 + $0xa8] sm:$0xe]  ;;  %v5261_v25 = vld [vmem:[%s6655_s11 + $0xbc] sm:$0x1] }
  0x9b   : > { %v2918_v6 = vrot.slane %v2916_v63, 4  ;;  %v2913_v17 = vsel %vm6907_vm7, %v2911_v51, %v2912_v62  ;;  %v2923_v8 = vrot.slane %v5257_v57, 5  ;;  %v2917_v23 = vsel %vm6907_vm7, %v5326_v12, %v2916_v63  ;;  %v5312_v31 = vld [vmem:[%s6655_s11 + $0xb4] sm:$0xe]  ;;  %v6421_v38 = vld [vmem:[%s6655_s11 + $0x24] sm:$0xf] }
  0x9c   : > { %v2930_v21 = vrot.slane %v5260_v2, 5  ;;  %v7188_v1 = vld [vmem:[%s6655_s11 + $0x28] sm:$0xf]  ;;  %v5342_v60 = vcombine.low %v2910_v41, %v2913_v17  ;;  %v5327_v44 = vrot.slane %v5311_v11, 9  ;;  %v2926_v59 = vrot.slane %v5258_v10, 5 }
  0x9d   : > { %v2920_v18 = vsel %vm6907_vm7, %v2918_v6, %v2919_v58  ;;  %v5074_v28 = vcombine.low %v6421_v38, %v7188_v1  ;;  %v6423_v47 = vld [vmem:[%s6655_s11 + $0x30] sm:$0xf]  ;;  %v2933_v51 = vrot.slane %v5261_v25, 5  ;;  %v5263_v62 = vld [vmem:[%s6655_s11 + $0xc4] sm:$0xf]  ;;  %v2318_v25 = vshrl.u32 %v7115_v40, 16 }
  0x9e   : > { %5923 = vmatmul.mubr.msk.bf16.gmra.mrb[16].mxu0 %vm715_vm3, %v5340_v49  ;;  %v5343_v20 = vcombine.low %v2917_v23, %v2920_v18  ;;  %v5328_v49 = vrot.slane %v5312_v31, 9  ;;  %v2932_v50 = vrot.slane %v2930_v21, 4  ;;  %v2924_v57 = vsel %vm6907_vm7, %v5327_v44, %v2923_v8  ;;  %v5313_v12 = vld [vmem:[%s6655_s11 + $0xc0] sm:$0xe]  ;;  %v6425_v41 = vld [vmem:[%s6655_s11 + $0x3c] sm:$0xf] }
  0x9f   : > { %5771 = vmatmul.mubr.msk.bf16.vlgmr.msra.gmra.mrb[0].mxu1 %vm715_vm3, %v5072_v45  ;;  %5926 = vmatprep.mubr.msk.bf16.mxu0 %vm715_vm3, %v5341_v4  ;;  %v2925_v45 = vrot.slane %v2923_v8, 4  ;;  %v2937_v63 = vrot.slane %v5263_v62, 5  ;;  %v5329_v6 = vrot.slane %v5313_v12, 9  ;;  %v7213_v17 = vld [vmem:[%s6655_s11 + $0x40] sm:$0xf]  ;;  %v5077_v18 = vcombine.low %v6820_v27, %v6823_v36  ;;  %v6377_v62 = vld [vmem:[%s6655_s11 + $0x24] sm:$0xff]  }
  0xa0   : > { %5803 = vmatpush3.bf16.msra.mxu1 %v1483_v61  ;;  %5774 = vmatprep.mubr.msk.bf16.mxu1 %vm715_vm3, %v5073_v26  ;;  %v7193_v26 = vld [vmem:[%s6655_s11 + $0x34] sm:$0xf]  ;;  %v2931_v58 = vsel %vm6907_vm7, %v5328_v49, %v2930_v21  ;;  %v2934_v54 = vsel %vm6907_vm7, %v2932_v50, %v2933_v51  ;;  %v5264_v61 = vld [vmem:[%s6655_s11 + $0xc8] sm:$0x1]  ;;  %v5076_v10 = vcombine.low %v6425_v41, %v7213_v17  ;;  %v2314_v21 = vshll.u32 %v7115_v40, 16 }
  0xa1   : > { %6301 = vmatprep.subr.msk.bf16.mxu1 %vm764_vm0, %v7167_v7  ;;  %v5075_v48 = vcombine.low %v6423_v47, %v7193_v26  ;;  %v2927_v4 = vsel %vm6907_vm7, %v2925_v45, %v2926_v59  ;;  %v5345_v11 = vcombine.low %v2931_v58, %v2934_v54  ;;  %v2939_v8 = vrot.slane %v2937_v63, 4  ;;  %v1221_v45 = vld [vmem:[%s6655_s11] sm:$0xe]  ;;  %v1222_v59 = vld [vmem:[%s6655_s11 + $0xc] sm:$0xe] }
  0xa2   : > { %v5344_v2 = vcombine.low %v2924_v57, %v2927_v4  ;;  %v2940_v23 = vrot.slane %v5264_v61, 5  ;;  %v2938_v31 = vsel %vm6907_vm7, %v5329_v6, %v2937_v63  ;;  %v7228_v27 = vrot.slane %v2314_v21, 5  ;;  %v1225_v41 = vld [vmem:[%s6655_s11 + $0x30] sm:$0xe] }
  0xa3   : > { %v2320_v36 = vrot.slane %v2318_v25, 4  ;;  %v5079_v44 = vcombine.low %v6880_v19, %v6886_v35  ;;  %v2324_v47 = vshll.u32 %v7118_v55, 16  ;;  %v5103_v19 = vrot.slane %v1221_v45, 9 }
  0xa4   : > { %v2941_v38 = vsel %vm6907_vm7, %v2939_v8, %v2940_v23  ;;  %8498 = vst [vmem:[#allocation6_spill] sm:$0xff] %v7228_v27  ;;  %v5104_v35 = vrot.slane %v1222_v59, 9  ;;  %v1288_v4 = vrot.slane %v7152_v9, 5  ;;  %v1295_v12 = vrot.slane %v7188_v1, 5  ;;  %v1226_v8 = vld [vmem:[%s6655_s11 + $0x3c] sm:$0xe] }
  0xa5   : > { %v5346_v40 = vcombine.low %v2938_v31, %v2941_v38  ;;  %v2321_v49 = vor.u32 %v2320_v36, %v7228_v27  ;;  %v7248_v51 = vrot.slane %v2324_v47, 5  ;;  %v5080_v58 = vcombine.low %v6901_v0, %v6914_v29  ;;  %v1227_v31 = vld [vmem:[%s6655_s11 + $0x48] sm:$0xe]  ;;  %v6431_v59 = vld [vmem:[%s6655_s11 + $0x38] sm:$0x1] }
  0xa6   : > { %5927 = vmatmul.mubr.msk.bf16.gmra.mrb[20].mxu0 %vm715_vm3, %v5342_v60  ;;  %v5078_v60 = vcombine.low %v6849_v24, %v6855_v37  ;;  %v6428_v24 = vld [vmem:[%s6655_s11 + $0x14] sm:$0x1]  ;;  %v4129_v54 = vsel %vm764_vm0, %v6972_v22, 0  ;;  %v5081_v61 = vcombine.low %v6933_v53, %v6940_v16  ;;  %v5082_v6 = vcombine.low %v6959_v39, %v6967_v43  ;;  %v6429_v16 = vld [vmem:[%s6655_s11 + $0x20] sm:$0x1] }
  0xa7   : > { %5775 = vmatmul.mubr.msk.bf16.gmra.mrb[4].mxu1 %vm715_vm3, %v5074_v28  ;;  %5930 = vmatprep.mubr.msk.bf16.mxu0 %vm715_vm3, %v5343_v20  ;;  %v1281_v28 = vrot.slane %v7145_v34, 5  ;;  %v6375_v20 = vld [vmem:[%s6655_s11 + $0x18] sm:$0xff]   ;;  %v6427_v34 = vld [vmem:[%s6655_s11 + $0x8] sm:$0x1]  ;;  %v1284_v37 = vrot.slane %v6428_v24, 5  ;;  %8499 = vst [vmem:[#allocation7_spill] sm:$0xff] %v7248_v51  ;;  %v5083_v9 = vcombine.low %v6991_v5, %v7003_v30 }
  0xa8   : > { %5778 = vmatprep.mubr.msk.bf16.mxu1 %vm715_vm3, %v5075_v48  ;;  %v1274_v48 = vrot.slane %v7111_v15, 5  ;;  %v1277_v50 = vrot.slane %v6427_v34, 5  ;;  %v1223_v15 = vld [vmem:[%s6655_s11 + $0x18] sm:$0xe]  ;;  %v7253_v63 = vrot.slane %v2321_v49, 4  ;;  %v1291_v22 = vrot.slane %v6429_v16, 5 }
  0xa9   : > { %v1283_v55 = vrot.slane %v1281_v28, 4  ;;  %v5105_v1 = vrot.slane %v1223_v15, 9  ;;  %v7275_v29 = vsel %vm6907_vm7, %v5104_v35, %v1281_v28  ;;  %v1297_v25 = vrot.slane %v1295_v12, 4  ;;  %v5428_v24 = vld [vmem:[%s6655_s11 + $0x18] sm:$0xf] }
  0xaa   : > { %v1276_v57 = vrot.slane %v1274_v48, 4  ;;  %8500 = vst [vmem:[#allocation8_spill] sm:$0xff] %v7253_v63  ;;  %v7271_v0 = vsel %vm6907_vm7, %v5103_v19, %v1274_v48  ;;  %v1305_v47 = vrot.slane %v6431_v59, 5  ;;  %v7312_v49 = vsel %vm764_vm0, %v7167_v7, 0  ;;  %v5429_v7 = vld [vmem:[%s6655_s11 + $0x1c] sm:$0xf] }
  0xab   : > { %v7279_v53 = vsel %vm6907_vm7, %v1283_v55, %v1284_v37  ;;  %v7316_v34 = vsel %vm6907_vm7, %v5105_v1, %v1288_v4  ;;  %v6381_v37 = vld [vmem:[%s6655_s11 + $0x3c] sm:$0xff]   ;;  %v5108_v35 = vrot.slane %v1226_v8, 9  ;;  %v6432_v55 = vld [vmem:[%s6655_s11 + $0x44] sm:$0x1]  ;;  %v3650_v8 = vshll.u32 %v5428_v24, 16 }
  0xac   : > { %v7290_v23 = vsel %vm6907_vm7, %v1276_v57, %v1277_v50  ;;  %v1228_v50 = vld [vmem:[%s6655_s11 + $0x54] sm:$0xe]  ;;  %v1312_v15 = vrot.slane %v6432_v55, 5  ;;  %v5432_v39 = vld [vmem:[%s6655_s11 + $0x28] sm:$0xf] }
  0xad   : > { %v6439_v5 = vld [vmem:[%s6655_s11 + $0x70] sm:$0xf] }
  0xae   : > { %5931 = vmatmul.mubr.msk.bf16.gmra.mrb[24].mxu0 %vm715_vm3, %v5344_v2  ;;  %v1224_v2 = vld [vmem:[%s6655_s11 + $0x24] sm:$0xe]  ;;  %v1337_v30 = vrot.slane %v6439_v5, 5 }
  0xaf   : > { %5779 = vmatmul.mubr.msk.bf16.gmra.mrb[8].mxu1 %vm715_vm3, %v5076_v10  ;;  %5934 = vmatprep.mubr.msk.bf16.mxu0 %vm715_vm3, %v5345_v11  ;;  %v1302_v10 = vrot.slane %v7193_v26, 5  ;;  %v6379_v11 = vld [vmem:[%s6655_s11 + $0x30] sm:$0xff]   ;;  %v5106_v21 = vrot.slane %v1224_v2, 9 }
  0xb0   : > { %5782 = vmatprep.mubr.msk.bf16.mxu1 %vm715_vm3, %v5077_v18  ;;  %v7286_v26 = vld [vmem:[%s8475_s1 + $0x10] sm:$0x3]  ;;  %v1290_v18 = vrot.slane %v1288_v4, 4  ;;  %v1339_v48 = vrot.slane %v1337_v30, 4 }
  0xb1   : > { %v1304_v45 = vrot.slane %v1302_v10, 4  ;;  %v7323_v19 = vsel %vm6907_vm7, %v5106_v21, %v1295_v12  ;;  %v3660_v21 = vshrl.u32 %v5429_v7, 16 }
  0xb2   : > { %v7332_v4 = vsel %vm6907_vm7, %v1290_v18, %v1291_v22  ;;  %v3647_v22 = vshrl.u32 %v5428_v24, 16  ;;  %v3656_v18 = vshll.u32 %v5429_v7, 16  ;;  %v5431_v24 = vld [vmem:[%s6655_s11 + $0x24] sm:$0xf] }
  0xb3   : > { %v7345_v1 = vsel %vm6907_vm7, %v1304_v45, %v1305_v47 }
  0xb4   : > { %v3649_v43 = vrot.slane %v3647_v22, 4  ;;  %v7387_v7 = vrot.slane %v3656_v18, 5  ;;  %v3674_v22 = vshll.u32 %v5431_v24, 16  ;;  %v3684_v18 = vshrl.u32 %v5432_v39, 16 }
  0xb6   : > { %5935 = vmatmul.mubr.msk.bf16.gmra.mrb[28].mxu0 %vm715_vm3, %v5346_v40  ;;  %v6430_v40 = vld [vmem:[%s6655_s11 + $0x2c] sm:$0x1]  ;;  %v3676_v27 = vrot.slane %v3674_v22, 5 }
  0xb7   : > { %5783 = vmatmul.mubr.msk.bf16.gmra.mrb[12].mxu1 %vm715_vm3, %v5078_v60  ;;  %5940 = vmatprep.mubr.msk.bf16.mxu0 %vm715_vm3, %v6375_v20  ;;  %v1298_v28 = vrot.slane %v6430_v40, 5  ;;  %v1309_v60 = vrot.slane %v7213_v17, 5  ;;  %v6435_v40 = vld [vmem:[%s6655_s11 + $0x50] sm:$0x1]  ;;  %v6440_v17 = vld [vmem:[%s6655_s11 + $0x74] sm:$0x1] }
  0xb8   : > { %5786 = vmatprep.mubr.msk.bf16.mxu1 %vm715_vm3, %v5079_v44  ;;  %v5107_v44 = vrot.slane %v1225_v41, 9  ;;  %v5110_v41 = vrot.slane %v1228_v50, 9  ;;  %v1229_v50 = vld [vmem:[%s6655_s11 + $0x60] sm:$0xe]  ;;  %v5433_v20 = vld [vmem:[%s6655_s11 + $0x2c] sm:$0x1] }
  0xb9   : > { %v1311_v12 = vrot.slane %v1309_v60, 4  ;;  %v7358_v45 = vsel %vm6907_vm7, %v5108_v35, %v1309_v60  ;;  %v6436_v35 = vld [vmem:[%s6655_s11 + $0x5c] sm:$0x1] }
  0xba   : > { %v7341_v2 = vsel %vm6907_vm7, %v5107_v44, %v1302_v10  ;;  %v1326_v55 = vrot.slane %v6436_v35, 5  ;;  %v1230_v35 = vld [vmem:[%s6655_s11 + $0x6c] sm:$0xe] }
  0xbb   : > { %v7362_v59 = vsel %vm6907_vm7, %v1311_v12, %v1312_v15  ;;  %v6437_v15 = vld [vmem:[%s6655_s11 + $0x64] sm:$0xf]  ;;  %v3662_v12 = vrot.slane %v3660_v21, 4  ;;  %v5112_v5 = vrot.slane %v1230_v35, 9 }
  0xbc   : > { %v6387_v21 = vld [vmem:[%s6655_s11 + $0x60] sm:$0xff]  }
  0xbe   : > { %5941 = vmatmul.mubr.msk.bf16.vlgmr.msra.gmra.mrb[0].mxu0 %vm715_vm3, %v6377_v62  ;;  %v6433_v62 = vld [vmem:[%s6655_s11 + $0x4c] sm:$0xf] }
  0xbf   : > { %5787 = vmatmul.mubr.msk.bf16.gmra.mrb[16].mxu1 %vm715_vm3, %v5080_v58  ;;  %5973 = vmatpush3.bf16.msra.mxu0 %v4129_v54  ;;  %v1316_v57 = vrot.slane %v6433_v62, 5  ;;  %v7336_v58 = vsel %vm6907_vm7, %v1297_v25, %v1298_v28  ;;  %v5109_v54 = vrot.slane %v1227_v31, 9  ;;  %v1319_v28 = vrot.slane %v6435_v40, 5 }
  0xc0   : > { %5790 = vmatprep.mubr.msk.bf16.mxu1 %vm715_vm3, %v5081_v61  ;;  %5944 = vmatprep.mubr.msk.bf16.mxu0 %vm715_vm3, %v6379_v11  ;;  %v6383_v61 = vld [vmem:[%s6655_s11 + $0x48] sm:$0xff]   ;;  %v6434_v11 = vld [vmem:[%s6655_s11 + $0x58] sm:$0xf]  ;;  %v1330_v62 = vrot.slane %v6437_v15, 5  ;;  %v5435_v15 = vld [vmem:[%s6655_s11 + $0x34] sm:$0xf] }
  0xc1   : > { %6307 = vmatprep.subr.msk.bf16.mxu0 %vm764_vm0, %v7286_v26  ;;  %v1323_v16 = vrot.slane %v6434_v11, 5  ;;  %v1318_v31 = vrot.slane %v1316_v57, 4  ;;  %v7366_v47 = vsel %vm6907_vm7, %v5109_v54, %v1316_v57  ;;  %v5430_v57 = vld [vmem:[%s6655_s11 + $0x20] sm:$0x1]  ;;  %v5434_v54 = vld [vmem:[%s6655_s11 + $0x30] sm:$0xf] }
  0xc2   : > { %v5111_v11 = vrot.slane %v1229_v50, 9  ;;  %v3698_v50 = vshll.u32 %v5434_v54, 16  ;;  %v3666_v25 = vshll.u32 %v5430_v57, 16  ;;  %v3704_v36 = vshll.u32 %v5435_v15, 16 }
  0xc3   : > { %v7377_v60 = vsel %vm6907_vm7, %v5110_v41, %v1323_v16  ;;  %v7393_v41 = vsel %vm6907_vm7, %v1318_v31, %v1319_v28  ;;  %v1332_v31 = vrot.slane %v1330_v62, 4  ;;  %v3695_v28 = vshrl.u32 %v5434_v54, 16 }
  0xc4   : > { %v7435_v35 = vrot.slane %v3704_v36, 5 }
  0xc6   : > { %5945 = vmatmul.mubr.msk.bf16.gmra.mrb[4].mxu0 %vm715_vm3, %v6381_v37  ;;  %v1325_v37 = vrot.slane %v1323_v16, 4  ;;  %v6438_v16 = vld [vmem:[%s6655_s11 + $0x68] sm:$0x1] }
  0xc7   : > { %5791 = vmatmul.mubr.msk.bf16.gmra.mrb[20].mxu1 %vm715_vm3, %v5082_v6  ;;  %5948 = vmatprep.mubr.msk.bf16.mxu0 %vm715_vm3, %v6383_v61  ;;  %v3652_v6 = vrot.slane %v3650_v8, 5  ;;  %v6385_v61 = vld [vmem:[%s6655_s11 + $0x54] sm:$0xff]   ;;  %v1333_v40 = vrot.slane %v6438_v16, 5  ;;  %v3680_v8 = vshll.u32 %v5432_v39, 16  ;;  %v3663_v16 = vor.u32 %v3662_v12, %v7387_v7 }
  0xc8   : > { %5794 = vmatprep.mubr.msk.bf16.mxu1 %vm715_vm3, %v5083_v9  ;;  %v3671_v9 = vshrl.u32 %v5431_v24, 16  ;;  %v7402_v44 = vsel %vm6907_vm7, %v1325_v37, %v1326_v55  ;;  %v1340_v24 = vrot.slane %v6440_v17, 5  ;;  %v3708_v39 = vshrl.u32 %v5435_v15, 16 }
  0xc9   : > { %v3653_v10 = vor.u32 %v3652_v6, %v3649_v43  ;;  %v7408_v37 = vrot.slane %v3680_v8, 5  ;;  %v3686_v55 = vrot.slane %v3684_v18, 4  ;;  %v8501_v43 = vcombine.low %v7012_v52, %v7023_v46  ;;  %v6441_v8 = vld [vmem:[%s6655_s11 + $0x7c] sm:$0xf]  ;;  %v7444_v18 = vld [vmem:[%s6655_s11 + $0x38] sm:$0x1] }
  0xca   : > { %v3673_v38 = vrot.slane %v3671_v9, 4  ;;  %v7417_v17 = vsel %vm6907_vm7, %v5111_v11, %v1330_v62  ;;  %v7421_v57 = vsel %vm6907_vm7, %v1332_v31, %v1333_v40  ;;  %v3697_v6 = vrot.slane %v3695_v28, 4  ;;  %8503 = vst [vmem:[#allocation9_spill] sm:$0xff] %v7444_v18 }
  0xcb   : > { %v3700_v12 = vrot.slane %v3698_v50, 5  ;;  %v8502_v52 = vcombine.low %v7044_v33, %v7049_v56  ;;  %v3654_v46 = vrot.slane %v3653_v10, 4  ;;  %v3664_v54 = vrot.slane %v3663_v16, 4  ;;  %v6389_v33 = vld [vmem:[%s6655_s11 + $0x6c] sm:$0xff]   ;;  %v1232_v16 = vld [vmem:[%s6655_s11 + $0x84] sm:$0xe] }
  0xcc   : > { %v3690_v62 = vshll.u32 %v5433_v20, 16  ;;  %v7429_v11 = vsel %vm6907_vm7, %v5112_v5, %v1337_v30  ;;  %v7433_v40 = vsel %vm6907_vm7, %v1339_v48, %v1340_v24  ;;  %v3710_v9 = vrot.slane %v3708_v39, 4  ;;  %v6390_v48 = vld [vmem:[%s6655_s11 + $0x78] sm:$0xff]  }
  0xcd   : > { %v3677_v10 = vor.u32 %v3676_v27, %v3673_v38  ;;  %v3687_v20 = vor.u32 %v3686_v55, %v7408_v37  ;;  %v1344_v30 = vrot.slane %v6441_v8, 5  ;;  %v3701_v38 = vor.u32 %v3700_v12, %v3697_v6  ;;  %v5437_v5 = vld [vmem:[%s6655_s11 + $0x3c] sm:$0xf] }
  0xce   : > { %5949 = vmatmul.mubr.msk.bf16.gmra.mrb[8].mxu0 %vm715_vm3, %v6385_v61  ;;  %v3668_v61 = vrot.slane %v3666_v25, 5  ;;  %v1231_v25 = vld [vmem:[%s6655_s11 + $0x78] sm:$0xe]  ;;  %v7460_v50 = vrot.slane %v3690_v62, 5  ;;  %v3711_v39 = vor.u32 %v3710_v9, %v7435_v35  ;;  %v3714_v55 = vshll.u32 %v7444_v18, 16 }
  0xcf   : > { %5795 = vmatmul.mubr.msk.bf16.gmra.mrb[24].mxu1 %vm715_vm3, %v8501_v43  ;;  %5952 = vmatprep.mubr.msk.bf16.mxu0 %vm715_vm3, %v6387_v21  ;;  %v3659_v21 = vsel %vm6681_vm4, %v3654_v46, %v7387_v7  ;;  %v5113_v24 = vrot.slane %v1231_v25, 9  ;;  %v6442_v43 = vld [vmem:[%s6655_s11 + $0x88] sm:$0xf]  ;;  %v7468_v7 = vld [vmem:[%s6655_s11 + $0x40] sm:$0xf]  ;;  %v3678_v12 = vrot.slane %v3677_v10, 4  ;;  %v8505_v62 = vcombine.low %v7064_v14, %v7073_v42 }
  0xd0   : > { %5798 = vmatprep.mubr.msk.bf16.mxu1 %vm715_vm3, %v8502_v52  ;;  %v3669_v31 = vsel %vm6681_vm4, %v3664_v54, %v3668_v61  ;;  %v1351_v6 = vrot.slane %v6442_v43, 5  ;;  %8504 = vst [vmem:[#allocation10_spill] sm:$0xff] %v7468_v7  ;;  %v3688_v52 = vrot.slane %v3687_v20, 4  ;;  %v1346_v46 = vrot.slane %v1344_v30, 4  ;;  %v6443_v54 = vld [vmem:[%s6655_s11 + $0x80] sm:$0x1] }
  0xd1   : > { %v1347_v61 = vrot.slane %v6443_v54, 5  ;;  %v3702_v9 = vrot.slane %v3701_v38, 4  ;;  %v5114_v25 = vrot.slane %v1232_v16, 9  ;;  %v3719_v8 = vshrl.u32 %v5437_v5, 16  ;;  %v6391_v10 = vld [vmem:[%s6655_s11 + $0x84] sm:$0xff]  }
  0xd2   : > { %v3722_v43 = vshll.u32 %v5437_v5, 16  ;;  %v7482_v20 = vcombine.low %v3659_v21, %v3669_v31  ;;  %v7486_v14 = vsel %vm764_vm0, %v7286_v26, 0  ;;  %v3732_v38 = vshrl.u32 %v7468_v7, 16  ;;  %v6392_v21 = vld [vmem:[%s6655_s11 + $0x90] sm:$0xff]   ;;  %v6448_v18 = vld [vmem:[%s6655_s11 + $0xa0] sm:$0xf] }
  0xd3   : > { %v3712_v16 = vrot.slane %v3711_v39, 4  ;;  %v3716_v5 = vrot.slane %v3714_v55, 5  ;;  %v1353_v54 = vrot.slane %v1351_v6, 4  ;;  %v3683_v31 = vsel %vm6681_vm4, %v3678_v12, %v7408_v37 }
  0xd4   : > { %v3693_v26 = vsel %vm6681_vm4, %v3688_v52, %v7460_v50  ;;  %v7501_v39 = vsel %vm6907_vm7, %v5113_v24, %v1344_v30  ;;  %v7505_v55 = vsel %vm6907_vm7, %v1346_v46, %v1347_v61  ;;  %v3707_v37 = vsel %vm6681_vm4, %v3702_v9, %v7435_v35  ;;  %v5443_v30 = vld [vmem:[%s6655_s11 + $0x54] sm:$0xf]  ;;  %v7522_v24 = vld [vmem:[%s6655_s11 + $0x58] sm:$0xf]  ;;  %v7527_v61 = vld [vmem:[%s6655_s11 + $0x90] sm:$0xe] }
  0xd5   : > { %v7518_v12 = vsel %vm6907_vm7, %v5114_v25, %v1351_v6  ;;  %v3721_v50 = vrot.slane %v3719_v8, 4  ;;  %v3724_v52 = vrot.slane %v3722_v43, 5  ;;  %v3734_v46 = vrot.slane %v3732_v38, 4 }
  0xd6   : > { %5953 = vmatmul.mubr.msk.bf16.gmra.mrb[12].mxu0 %vm715_vm3, %v6389_v33  ;;  %v8506_v33 = vcombine.low %v7271_v0, %v7290_v23  ;;  %v6444_v0 = vld [vmem:[%s6655_s11 + $0x8c] sm:$0x1]  ;;  %v3717_v36 = vsel %vm6681_vm4, %v3712_v16, %v3716_v5  ;;  %v3767_v25 = vshrl.u32 %v5443_v30, 16  ;;  %v3770_v8 = vshll.u32 %v5443_v30, 16 }
  0xd7   : > { %5799 = vmatmul.mubr.msk.bf16.gmra.mrb[28].mxu1 %vm715_vm3, %v8505_v62  ;;  %5956 = vmatprep.mubr.msk.bf16.mxu0 %vm715_vm3, %v6390_v48  ;;  %v3728_v48 = vshll.u32 %v7468_v7, 16  ;;  %v1354_v23 = vrot.slane %v6444_v0, 5  ;;  %v5440_v62 = vld [vmem:[%s6655_s11 + $0x48] sm:$0xf]  ;;  %v7511_v0 = vld [vmem:[%s6655_s11 + $0x4c] sm:$0xf]  ;;  %v8508_v38 = vcombine.low %v7275_v29, %v7279_v53  ;;  %v7545_v16 = vcombine.low %v3683_v31, %v3693_v26 }
  0xd8   : > { %5804 = vmatprep.mubr.msk.bf16.mxu1 %vm715_vm3, %v8506_v33  ;;  %v7508_v33 = vld [vmem:[%s6655_s11 + $0x44] sm:$0x1]  ;;  %v3743_v27 = vshrl.u32 %v5440_v62, 16  ;;  %v3746_v15 = vshll.u32 %v5440_v62, 16  ;;  %v3752_v6 = vshll.u32 %v7511_v0, 16  ;;  %v3756_v9 = vshrl.u32 %v7511_v0, 16 }
  0xd9   : > { %8507 = vst [vmem:[#allocation11_spill] sm:$0xff] %v7508_v33  ;;  %v7524_v28 = vrot.slane %v3728_v48, 5  ;;  %v7533_v35 = vsel %vm6907_vm7, %v1353_v54, %v1354_v23  ;;  %v3776_v43 = vshll.u32 %v7522_v24, 16  ;;  %v3780_v48 = vshrl.u32 %v7522_v24, 16  ;;  %v5446_v31 = vld [vmem:[%s6655_s11 + $0x60] sm:$0xf] }
  0xda   : > { %v3738_v5 = vshll.u32 %v7508_v33, 16  ;;  %v5115_v54 = vrot.slane %v7527_v61, 9  ;;  %v8509_v23 = vcombine.low %v7316_v34, %v7332_v4  ;;  %v7556_v29 = vcombine.low %v3707_v37, %v3717_v36  ;;  %v6393_v26 = vld [vmem:[%s6655_s11 + $0x9c] sm:$0xff]   ;;  %v6394_v30 = vld [vmem:[%s6655_s11 + $0xa8] sm:$0xff]  }
  0xdb   : > { %v3725_v53 = vor.u32 %v3724_v52, %v3721_v50  ;;  %v3745_v62 = vrot.slane %v3743_v27, 4  ;;  %v7567_v34 = vrot.slane %v3752_v6, 5  ;;  %v3758_v4 = vrot.slane %v3756_v9, 4  ;;  %v6445_v36 = vld [vmem:[%s8475_s1 + $0x8] sm:$0x3] }
  0xdc   : > { %v3769_v27 = vrot.slane %v3767_v25, 4  ;;  %v3772_v37 = vrot.slane %v3770_v8, 5  ;;  %v7576_v50 = vrot.slane %v3776_v43, 5  ;;  %v3782_v52 = vrot.slane %v3780_v48, 4  ;;  %v6446_v6 = vld [vmem:[%s6655_s11 + $0x94] sm:$0xf] }
  0xdd   : > { %v7582_v9 = vld [vmem:[%s6655_s11 + $0x64] sm:$0xf]  ;;  %v3791_v61 = vshrl.u32 %v5446_v31, 16  ;;  %v7584_v22 = vrot.slane %v3725_v53, 4  ;;  %v1365_v25 = vrot.slane %v6448_v18, 5  ;;  %v3759_v43 = vor.u32 %v3758_v4, %v7567_v34 }
  0xde   : > { %5957 = vmatmul.mubr.msk.bf16.gmra.mrb[16].mxu0 %vm715_vm3, %v6391_v10  ;;  %8510 = vst [vmem:[#allocation12_spill] sm:$0xff] %v7582_v9  ;;  %v3794_v10 = vshll.u32 %v5446_v31, 16  ;;  %v3773_v31 = vor.u32 %v3772_v37, %v3769_v27  ;;  %v3783_v53 = vor.u32 %v3782_v52, %v7576_v50  ;;  %v8511_v18 = vcombine.low %v7323_v19, %v7336_v58  ;;  %v6395_v37 = vld [vmem:[%s6655_s11 + $0xb4] sm:$0xff]  }
  0xdf   : > { %5805 = vmatmul.mubr.msk.bf16.vlgmr.msra.gmra.mrb[0].mxu1 %vm715_vm3, %v8508_v38  ;;  %5960 = vmatprep.mubr.msk.bf16.mxu0 %vm715_vm3, %v6392_v21  ;;  %v3748_v21 = vrot.slane %v3746_v15, 5  ;;  %v7565_v38 = vld [vmem:[%s6655_s11 + $0x50] sm:$0x1]  ;;  %v7574_v15 = vld [vmem:[%s6655_s11 + $0x5c] sm:$0x1]  ;;  %v8512_v27 = vcombine.low %v7341_v2, %v7345_v1  ;;  %v1367_v52 = vrot.slane %v1365_v25, 4 }
  0xe0   : > { %5837 = vmatpush3.bf16.msra.mxu1 %v7312_v49  ;;  %5808 = vmatprep.mubr.msk.bf16.mxu1 %vm715_vm3, %v8509_v23  ;;  %v3735_v49 = vor.u32 %v3734_v46, %v7524_v28  ;;  %v7578_v46 = vrot.slane %v3738_v5, 5  ;;  %v1358_v23 = vrot.slane %v6446_v6, 5  ;;  %v3762_v48 = vshll.u32 %v7565_v38, 16  ;;  %v1234_v5 = vld [vmem:[%s6655_s11 + $0x9c] sm:$0xe] }
  0xe1   : > { %6303 = vmatprep.subr.msk.bf16.mxu1 %vm764_vm0, %v6445_v36  ;;  %v6447_v36 = vld [vmem:[%s6655_s11 + $0x98] sm:$0x1]  ;;  %v3749_v7 = vor.u32 %v3748_v21, %v3745_v62  ;;  %v3786_v6 = vshll.u32 %v7574_v15, 16  ;;  %v3804_v62 = vshrl.u32 %v7582_v9, 16  ;;  %v3796_v4 = vrot.slane %v3794_v10, 5 }
  0xe2   : > { %v1361_v33 = vrot.slane %v6447_v36, 5  ;;  %v3736_v8 = vrot.slane %v3735_v49, 4  ;;  %v3800_v36 = vshll.u32 %v7582_v9, 16  ;;  %v7603_v21 = vsel %vm6907_vm7, %v5115_v54, %v1358_v23  ;;  %v7614_v2 = vld [vmem:[%s6655_s11 + $0x68] sm:$0x1] }
  0xe3   : > { %v3793_v49 = vrot.slane %v3791_v61, 4  ;;  %v3750_v19 = vrot.slane %v3749_v7, 4  ;;  %v5116_v58 = vrot.slane %v1234_v5, 9  ;;  %v3760_v3 = vrot.slane %v3759_v43, 4  ;;  %8513 = vst [vmem:[#allocation13_spill] sm:$0xff] %v7614_v2  ;;  %v6396_v5 = vld [vmem:[%s6655_s11 + $0xc0] sm:$0xff]  }
  0xe4   : > { %v3764_v54 = vrot.slane %v3762_v48, 5  ;;  %v3788_v63 = vrot.slane %v3786_v6, 5  ;;  %v1372_v61 = vrot.slane %v7049_v56, 5  ;;  %v3774_v10 = vrot.slane %v3773_v31, 4  ;;  %v1236_v31 = vld [vmem:[%s6655_s11 + $0xb4] sm:$0xe] }
  0xe5   : > { %v3784_v51 = vrot.slane %v3783_v53, 4  ;;  %v7616_v1 = vrot.slane %v3800_v36, 5  ;;  %v3806_v7 = vrot.slane %v3804_v62, 4  ;;  %v3731_v43 = vsel %vm6681_vm4, %v7584_v22, %v7524_v28  ;;  %v6450_v62 = vld [vmem:[%s6655_s11 + $0xb0] sm:$0x1] }
  0xe6   : > { %5961 = vmatmul.mubr.msk.bf16.gmra.mrb[20].mxu0 %vm715_vm3, %v6393_v26  ;;  %v1360_v26 = vrot.slane %v1358_v23, 4  ;;  %v1235_v23 = vld [vmem:[%s6655_s11 + $0xa8] sm:$0xe]  ;;  %v3741_v48 = vsel %vm6681_vm4, %v3736_v8, %v7578_v46  ;;  %v3797_v6 = vor.u32 %v3796_v4, %v3793_v49  ;;  %v3755_v53 = vsel %vm6681_vm4, %v3750_v19, %v7567_v34  ;;  %v5449_v46 = vld [vmem:[%s6655_s11 + $0x6c] sm:$0xf] }
  0xe7   : > { %5809 = vmatmul.mubr.msk.bf16.gmra.mrb[4].mxu1 %vm715_vm3, %v8511_v18  ;;  %5964 = vmatprep.mubr.msk.bf16.mxu0 %vm715_vm3, %v6394_v30  ;;  %v6449_v18 = vld [vmem:[%s6655_s11 + $0xa4] sm:$0x1]  ;;  %v7636_v36 = vsel %vm6907_vm7, %v5116_v58, %v1365_v25  ;;  %v5117_v28 = vrot.slane %v1235_v23, 9  ;;  %v1374_v8 = vrot.slane %v1372_v61, 4  ;;  %v3810_v49 = vshll.u32 %v7614_v2, 16 }
  0xe8   : > { %5812 = vmatprep.mubr.msk.bf16.mxu1 %vm715_vm3, %v8512_v27  ;;  %v1368_v30 = vrot.slane %v6449_v18, 5  ;;  %v7628_v56 = vsel %vm6907_vm7, %v1360_v26, %v1361_v33  ;;  %v3765_v33 = vsel %vm6681_vm4, %v3760_v3, %v3764_v54  ;;  %v1375_v26 = vrot.slane %v6450_v62, 5  ;;  %v5452_v18 = vld [vmem:[%s6655_s11 + $0x78] sm:$0xf]  ;;  %v7691_v54 = vld [vmem:[%s6655_s11 + $0xbc] sm:$0x1] }
  0xe9   : > { %v3779_v34 = vsel %vm6681_vm4, %v3774_v10, %v7576_v50  ;;  %v3789_v25 = vsel %vm6681_vm4, %v3784_v51, %v3788_v63  ;;  %v3807_v4 = vor.u32 %v3806_v7, %v7616_v1  ;;  %v5118_v27 = vrot.slane %v1236_v31, 9  ;;  %v7665_v51 = vld [vmem:[%s6655_s11 + $0x70] sm:$0xf]  ;;  %v7695_v10 = vld [vmem:[%s6655_s11 + $0x7c] sm:$0xf] }
  0xea   : > { %v7640_v22 = vsel %vm6907_vm7, %v1367_v52, %v1368_v30  ;;  %v8515_v3 = vcombine.low %v7358_v45, %v7362_v59  ;;  %v7661_v19 = vrot.slane %v3797_v6, 4  ;;  %v1379_v50 = vrot.slane %v7073_v42, 5  ;;  %8516 = vst [vmem:[#allocation15_spill] sm:$0xff] %v7665_v51  ;;  %8518 = vst [vmem:[#allocation16_spill] sm:$0xff] %v7695_v10  ;;  %v5455_v7 = vld [vmem:[%s6655_s11 + $0x84] sm:$0xf] }
  0xeb   : > { %8514 = vst [vmem:[#allocation14_spill] sm:$0xff] %v7640_v22  ;;  %v3815_v63 = vshrl.u32 %v5449_v46, 16  ;;  %v8517_v45 = vcombine.low %v7366_v47, %v7393_v41  ;;  %v7673_v58 = vcombine.low %v3755_v53, %v3765_v33  ;;  %v7679_v42 = vsel %vm6907_vm7, %v5117_v28, %v1372_v61  ;;  %v6397_v61 = vld [vmem:[%s6655_s11 + $0xcc] sm:$0xff]   ;;  %v7707_v31 = vld [vmem:[%s6655_s11 + $0x88] sm:$0xf] }
  0xec   : > { %v7682_v30 = vcombine.low %v3779_v34, %v3789_v25  ;;  %v7686_v47 = vsel %vm6907_vm7, %v1374_v8, %v1375_v26  ;;  %v7688_v41 = vrot.slane %v3810_v49, 5  ;;  %v3824_v6 = vshll.u32 %v7665_v51, 16  ;;  %8519 = vst [vmem:[#allocation17_spill] sm:$0xff] %v7707_v31  ;;  %v5458_v62 = vld [vmem:[%s6655_s11 + $0x90] sm:$0xf] }
  0xed   : > { %v7713_v28 = vrot.slane %v1379_v50, 4  ;;  %v7715_v33 = vrot.slane %v3815_v63, 4  ;;  %v3828_v8 = vshrl.u32 %v7665_v51, 16  ;;  %v3839_v26 = vshrl.u32 %v5452_v18, 16  ;;  %v7722_v25 = vld [vmem:[%s6655_s11 + $0x94] sm:$0xf] }
  0xee   : > { %5965 = vmatmul.mubr.msk.bf16.gmra.mrb[24].mxu0 %vm715_vm3, %v6395_v37  ;;  %v7659_v37 = vcombine.low %v3731_v43, %v3741_v48  ;;  %v7703_v43 = vsel %vm6907_vm7, %v5118_v27, %v1379_v50  ;;  %v3818_v48 = vshll.u32 %v5449_v46, 16  ;;  %v3842_v49 = vshll.u32 %v5452_v18, 16  ;;  %8520 = vst [vmem:[#allocation18_spill] sm:$0xff] %v7722_v25  ;;  %v7760_v2 = vld [vmem:[%s6655_s11 + $0x8c] sm:$0x1] }
  0xef   : > { %5813 = vmatmul.mubr.msk.bf16.gmra.mrb[8].mxu1 %vm715_vm3, %v8515_v3  ;;  %5968 = vmatprep.mubr.msk.bf16.mxu0 %vm715_vm3, %v6396_v5  ;;  %v7699_v5 = vrot.slane %v3807_v4, 4  ;;  %v3848_v46 = vshll.u32 %v7695_v10, 16  ;;  %v3852_v34 = vshrl.u32 %v7695_v10, 16  ;;  %v3863_v4 = vshrl.u32 %v5455_v7, 16 }
  0xf0   : > { %5816 = vmatprep.mubr.msk.bf16.mxu1 %vm715_vm3, %v8517_v45  ;;  %v3866_v27 = vshll.u32 %v5455_v7, 16  ;;  %v3872_v3 = vshll.u32 %v7707_v31, 16  ;;  %v3876_v50 = vshrl.u32 %v7707_v31, 16  ;;  %v7732_v45 = vld [vmem:[%s6655_s11 + $0x74] sm:$0x1]  ;;  %v3820_v18 = vrot.slane %v3818_v48, 5 }
  0xf1   : > { %v3887_v52 = vshrl.u32 %v5458_v62, 16  ;;  %v3890_v53 = vshll.u32 %v5458_v62, 16  ;;  %v8521_v7 = vcombine.low %v7377_v60, %v7402_v44  ;;  %v3830_v59 = vrot.slane %v3828_v8, 4  ;;  %v5461_v48 = vld [vmem:[%s6655_s11 + $0x9c] sm:$0xf] }
  0xf2   : > { %v3896_v63 = vshll.u32 %v7722_v25, 16  ;;  %v3900_v23 = vshrl.u32 %v7722_v25, 16  ;;  %v8522_v62 = vcombine.low %v7417_v17, %v7421_v57  ;;  %v7750_v44 = vld [vmem:[%s6655_s11 + $0x80] sm:$0x1]  ;;  %v3841_v60 = vrot.slane %v3839_v26, 4 }
  0xf3   : > { %8523 = vst [vmem:[#allocation19_spill] sm:$0xff] %v7750_v44  ;;  %v3865_v31 = vrot.slane %v3863_v4, 4  ;;  %v3868_v8 = vrot.slane %v3866_v27, 5  ;;  %v7754_v10 = vrot.slane %v3872_v3, 5  ;;  %v3878_v51 = vrot.slane %v3876_v50, 4 }
  0xf4   : > { %v7757_v25 = vld [vmem:[%s6655_s11 + $0xa0] sm:$0xf]  ;;  %v3889_v17 = vrot.slane %v3887_v52, 4  ;;  %v3892_v57 = vrot.slane %v3890_v53, 5  ;;  %v3914_v9 = vshll.u32 %v5461_v48, 16  ;;  %v3821_v26 = vor.u32 %v3820_v18, %v7715_v33 }
  0xf5   : > { %v3858_v27 = vshll.u32 %v7750_v44, 16  ;;  %v7769_v3 = vld [vmem:[%s6655_s11 + $0x98] sm:$0x1]  ;;  %v3920_v50 = vshll.u32 %v7757_v25, 16  ;;  %v3924_v52 = vshrl.u32 %v7757_v25, 16  ;;  %v3869_v22 = vor.u32 %v3868_v8, %v3865_v31 }
  0xf6   : > { %5969 = vmatmul.mubr.msk.bf16.gmra.mrb[28].mxu0 %vm715_vm3, %v6397_v61  ;;  %v7740_v61 = vrot.slane %v3824_v6, 5  ;;  %v3854_v6 = vrot.slane %v3852_v34, 4  ;;  %v3902_v34 = vrot.slane %v3900_v23, 4  ;;  %v3882_v33 = vshll.u32 %v7760_v2, 16 }
  0xf7   : > { %5817 = vmatmul.mubr.msk.bf16.gmra.mrb[12].mxu1 %vm715_vm3, %v8521_v7  ;;  %5974 = vmatprep.mubr.msk.bf16.mxu0 %vm715_vm3, %v7482_v20  ;;  %v3844_v7 = vrot.slane %v3842_v49, 5  ;;  %v7752_v20 = vrot.slane %v3848_v46, 5  ;;  %v3834_v49 = vshll.u32 %v7732_v45, 16  ;;  %v7764_v46 = vrot.slane %v3896_v63, 5 }
  0xf8   : > { %5820 = vmatprep.mubr.msk.bf16.mxu1 %vm715_vm3, %v8522_v62  ;;  %v3911_v62 = vshrl.u32 %v5461_v48, 16  ;;  %v3831_v4 = vor.u32 %v3830_v59, %v7740_v61  ;;  %v3879_v23 = vor.u32 %v3878_v51, %v7754_v10  ;;  %v3893_v59 = vor.u32 %v3892_v57, %v3889_v17  ;;  %v7802_v57 = vld [vmem:[%s6655_s11 + $0xa4] sm:$0x1] }
  0xf9   : > { %v3845_v53 = vor.u32 %v3844_v7, %v3841_v60  ;;  %v3855_v48 = vor.u32 %v3854_v6, %v7752_v20  ;;  %v3916_v18 = vrot.slane %v3914_v9, 5  ;;  %v8524_v44 = vcombine.low %v7429_v11, %v7433_v40 }
  0xfa   : > { %v3913_v63 = vrot.slane %v3911_v62, 4  ;;  %v8525_v31 = vrot.slane %v7691_v54, 5  ;;  %v3836_v51 = vrot.slane %v3834_v49, 5  ;;  %v3903_v60 = vor.u32 %v3902_v34, %v7764_v46  ;;  %v7805_v34 = vld [vmem:[%s6655_s11 + $0xac] sm:$0xf] }
  0xfb   : > { %v3906_v9 = vshll.u32 %v7769_v3, 16  ;;  %v8526_v11 = vcombine.low %v7501_v39, %v7505_v55  ;;  %v3822_v40 = vrot.slane %v3821_v26, 4  ;;  %v7798_v54 = vrot.slane %v3920_v50, 5 }
  0xfc   : > { %v3846_v7 = vrot.slane %v3845_v53, 4  ;;  %v3856_v6 = vrot.slane %v3855_v48, 4  ;;  %v3860_v8 = vrot.slane %v3858_v27, 5  ;;  %v3884_v17 = vrot.slane %v3882_v33, 5  ;;  %v7815_v48 = vld [vmem:[%s6655_s11 + $0xb0] sm:$0x1] }
  0xfd   : > { %v3870_v39 = vrot.slane %v3869_v22, 4  ;;  %v3880_v55 = vrot.slane %v3879_v23, 4  ;;  %v3894_v62 = vrot.slane %v3893_v59, 4  ;;  %v3917_v49 = vor.u32 %v3916_v18, %v3913_v63 }
  0xfe   : > { %5975 = vmatmul.mubr.msk.bf16.vlgmr.msra.gmra.mrb[0].mxu0 %vm715_vm3, %v7545_v16  ;;  %v7788_v16 = vsel %vm6907_vm7, %v7713_v28, %v8525_v31  ;;  %v3926_v28 = vrot.slane %v3924_v52, 4  ;;  %v3908_v26 = vrot.slane %v3906_v9, 5  ;;  %v3827_v52 = vsel %vm6681_vm4, %v3822_v40, %v7740_v61 }
  0xff   : > { %5821 = vmatmul.mubr.msk.bf16.gmra.mrb[16].mxu1 %vm715_vm3, %v8524_v44  ;;  %6007 = vmatpush3.bf16.msra.mxu0 %v7486_v14  ;;  %v3832_v14 = vrot.slane %v3831_v4, 4  ;;  %v5464_v44 = vld [vmem:[%s6655_s11 + $0xa8] sm:$0xf]  ;;  %v3930_v22 = vshll.u32 %v7802_v57, 16  ;;  %v3851_v33 = vsel %vm6681_vm4, %v3846_v7, %v7752_v20  ;;  %v3861_v23 = vsel %vm6681_vm4, %v3856_v6, %v3860_v8 }
 0x100   : > { %5824 = vmatprep.mubr.msk.bf16.mxu1 %vm715_vm3, %v8526_v11  ;;  %5978 = vmatprep.mubr.msk.bf16.mxu0 %vm715_vm3, %v7556_v29  ;;  %v3904_v29 = vrot.slane %v3903_v60, 4  ;;  %v3935_v4 = vshrl.u32 %v5464_v44, 16  ;;  %v3938_v50 = vshll.u32 %v5464_v44, 16  ;;  %v3927_v53 = vor.u32 %v3926_v28, %v7798_v54  ;;  %v5513_v11 = vld [vmem:[%s6655_s11 + $0x48] sm:$0xe] }
 0x101   : > { %v3837_v27 = vsel %vm6681_vm4, %v3832_v14, %v3836_v51  ;;  %v3944_v59 = vshll.u32 %v7805_v34, 16  ;;  %v3948_v61 = vshrl.u32 %v7805_v34, 16  ;;  %v3875_v63 = vsel %vm6681_vm4, %v3870_v39, %v7754_v10  ;;  %v7880_v39 = vld [vmem:[%s6655_s11 + $0xb8] sm:$0xf] }
 0x102   : > { %v3885_v18 = vsel %vm6681_vm4, %v3880_v55, %v3884_v17  ;;  %v3899_v20 = vsel %vm6681_vm4, %v3894_v62, %v7764_v46  ;;  %v3918_v31 = vrot.slane %v3917_v49, 4  ;;  %v8527_v51 = vcombine.low %v7518_v12, %v7533_v35 }
 0x103   : > { %v3937_v10 = vrot.slane %v3935_v4, 4  ;;  %v3940_v60 = vrot.slane %v3938_v50, 5  ;;  %v3954_v9 = vshll.u32 %v7815_v48, 16  ;;  %v8528_v46 = vcombine.low %v7603_v21, %v7628_v56  ;;  %v5467_v21 = vld [vmem:[%s6655_s11 + $0xb4] sm:$0xf] }
 0x104   : > { %v5134_v12 = vcombine.low %v7679_v42, %v7686_v47  ;;  %v8529_v35 = vsel %vm6681_vm4, %v7699_v5, %v7688_v41  ;;  %v3928_v14 = vrot.slane %v3927_v53, 4  ;;  %v3932_v28 = vrot.slane %v3930_v22, 5  ;;  %v5515_v4 = vld [vmem:[%s6655_s11 + $0x60] sm:$0xe]  ;;  %v5516_v53 = vld [vmem:[%s6655_s11 + $0x6c] sm:$0xe] }
 0x105   : > { %v5135_v56 = vcombine.low %v7703_v43, %v7788_v16  ;;  %v7863_v44 = vcombine.low %v3827_v52, %v3837_v27  ;;  %v7865_v42 = vrot.slane %v3944_v59, 5  ;;  %v3950_v47 = vrot.slane %v3948_v61, 4  ;;  %v8538_v16 = vld [vmem:[#allocation7_spill] sm:$0xff] }
 0x106   : > { %5979 = vmatmul.mubr.msk.bf16.gmra.mrb[4].mxu0 %vm715_vm3, %v7659_v37  ;;  %v3909_v37 = vsel %vm6681_vm4, %v3904_v29, %v3908_v26  ;;  %v7867_v41 = vcombine.low %v3851_v33, %v3861_v23  ;;  %v7869_v5 = vcombine.low %v3875_v63, %v3885_v18  ;;  %v3923_v6 = vsel %vm6681_vm4, %v3918_v31, %v7798_v54  ;;  %v8531_v23 = vld [vmem:[#allocation14_spill] sm:$0xff]  ;;  %v5470_v63 = vld [vmem:[%s6655_s11 + $0xc0] sm:$0xf]  ;;  %v8533_v18 = vld [vmem:[#allocation12_spill] sm:$0xff] }
 0x107   : > { %5825 = vmatmul.mubr.msk.bf16.gmra.mrb[20].mxu1 %vm715_vm3, %v8527_v51  ;;  %5982 = vmatprep.mubr.msk.bf16.mxu0 %vm715_vm3, %v7673_v58  ;;  %v8530_v58 = vsel %vm6681_vm4, %v7661_v19, %v7616_v1  ;;  %v7871_v7 = vcombine.low %v3899_v20, %v3909_v37  ;;  %v5529_v1 = vrot.slane %v5513_v11, 9  ;;  %v5514_v19 = vld [vmem:[%s6655_s11 + $0x54] sm:$0xe]  ;;  %v3941_v8 = vor.u32 %v3940_v60, %v3937_v10 }
 0x108   : > { %5828 = vmatprep.mubr.msk.bf16.mxu1 %vm715_vm3, %v8528_v46  ;;  %v5483_v40 = vcombine.low %v8530_v58, %v8529_v35  ;;  %v7877_v17 = vrot.slane %v3954_v9, 5  ;;  %v3959_v55 = vshrl.u32 %v5467_v21, 16  ;;  %v3933_v62 = vsel %vm6681_vm4, %v3928_v14, %v3932_v28  ;;  %v8534_v31 = vld [vmem:[#allocation13_spill] sm:$0xff]  ;;  %v8535_v9 = vld [vmem:[#allocation15_spill] sm:$0xff]  ;;  %v7929_v35 = vld [vmem:[%s6655_s11 + $0xbc] sm:$0x1] }
 0x109   : > { %v3962_v49 = vshll.u32 %v5467_v21, 16  ;;  %v4418_v29 = vrot.slane %v7511_v0, 5  ;;  %v4421_v26 = vrot.slane %v7565_v38, 5  ;;  %v3951_v50 = vor.u32 %v3950_v47, %v7865_v42  ;;  %v7932_v58 = vld [vmem:[%s6655_s11 + $0xc4] sm:$0xf] }
 0x10a   : > { %v5530_v52 = vrot.slane %v5514_v19, 9  ;;  %v4425_v54 = vrot.slane %v7522_v24, 5  ;;  %v4428_v27 = vrot.slane %v7574_v15, 5  ;;  %v3968_v22 = vshll.u32 %v7880_v39, 16  ;;  %v5517_v19 = vld [vmem:[%s6655_s11 + $0x78] sm:$0xe] }
 0x10b   : > { %v3972_v33 = vshrl.u32 %v7880_v39, 16  ;;  %v7897_v0 = vsel %vm6907_vm7, %v5529_v1, %v4418_v29  ;;  %v4420_v38 = vrot.slane %v4418_v29, 4  ;;  %v8532_v59 = vcombine.low %v7636_v36, %v8531_v23  ;;  %v8536_v23 = vld [vmem:[#allocation16_spill] sm:$0xff] }
 0x10c   : > { %v7904_v24 = vcombine.low %v3923_v6, %v3933_v62  ;;  %v7908_v15 = vsel %vm6907_vm7, %v5530_v52, %v4425_v54  ;;  %v5531_v61 = vrot.slane %v5515_v4, 9  ;;  %v4432_v20 = vrot.slane %v8533_v18, 5  ;;  %v6398_v6 = vld [vmem:[%s6655_s11 + $0xc] sm:$0xff]  }
 0x10d   : > { %v7914_v36 = vsel %vm6907_vm7, %v4420_v38, %v4421_v26  ;;  %v4435_v51 = vrot.slane %v8534_v31, 5  ;;  %v5532_v37 = vrot.slane %v5516_v53, 9  ;;  %v4439_v11 = vrot.slane %v8535_v9, 5 }
 0x10e   : > { %5983 = vmatmul.mubr.msk.bf16.gmra.mrb[8].mxu0 %vm715_vm3, %v7682_v30  ;;  %v4427_v30 = vrot.slane %v4425_v54, 4  ;;  %v5546_v10 = vcombine.low %v7897_v0, %v7914_v36  ;;  %v4442_v46 = vrot.slane %v7732_v45, 5  ;;  %v7938_v14 = vsel %vm6907_vm7, %v5531_v61, %v4432_v20 }
 0x10f   : > { %5829 = vmatmul.mubr.msk.bf16.gmra.mrb[24].mxu1 %vm715_vm3, %v8532_v59  ;;  %5986 = vmatprep.mubr.msk.bf16.mxu0 %vm715_vm3, %v5483_v40  ;;  %v4434_v28 = vrot.slane %v4432_v20, 4  ;;  %v7940_v21 = vrot.slane %v3959_v55, 4  ;;  %v3983_v47 = vshrl.u32 %v5470_v63, 16  ;;  %v7944_v45 = vsel %vm6907_vm7, %v5532_v37, %v4439_v11  ;;  %v5244_v55 = vld [vmem:[%s6655_s11 + $0x78] sm:$0xf]  ;;  %v8537_v59 = vld [vmem:[#allocation19_spill] sm:$0xff] }
 0x110   : > { %5832 = vmatprep.mubr.msk.bf16.mxu1 %vm715_vm3, %v5134_v12  ;;  %v7922_v60 = vsel %vm6907_vm7, %v4427_v30, %v4428_v27  ;;  %v7926_v12 = vrot.slane %v3941_v8, 4  ;;  %v4441_v1 = vrot.slane %v4439_v11, 4  ;;  %v7948_v8 = vrot.slane %v3951_v50, 4 }
 0x111   : > { %v5547_v40 = vcombine.low %v7908_v15, %v7922_v60  ;;  %v7950_v62 = vrot.slane %v3962_v49, 5  ;;  %v3986_v29 = vshll.u32 %v5470_v63, 16  ;;  %v7954_v26 = vsel %vm6907_vm7, %v4434_v28, %v4435_v51  ;;  %v8540_v28 = vld [vmem:[#allocation17_spill] sm:$0xff]  ;;  %v6461_v60 = vld [vmem:[%s6655_s11 + $0xa0] sm:$0xf] }
 0x112   : > { %v7957_v4 = vrot.slane %v3968_v22, 5  ;;  %v7959_v52 = vrot.slane %v3972_v33, 4  ;;  %v5548_v54 = vcombine.low %v7938_v14, %v7954_v26  ;;  %v7965_v27 = vsel %vm6907_vm7, %v4441_v1, %v4442_v46  ;;  %v5518_v33 = vld [vmem:[%s6655_s11 + $0x84] sm:$0xe]  ;;  %v6399_v1 = vld [vmem:[%s6655_s11 + $0x18] sm:$0xff]  }
 0x113   : > { %v3978_v49 = vshll.u32 %v7929_v35, 16  ;;  %v3992_v50 = vshll.u32 %v7932_v58, 16  ;;  %v5549_v53 = vcombine.low %v7944_v45, %v7965_v27  ;;  %v5533_v22 = vrot.slane %v5517_v19, 9  ;;  %v6465_v27 = vld [vmem:[%s6655_s11 + $0xac] sm:$0xf] }
 0x114   : > { %v3985_v38 = vrot.slane %v3983_v47, 4  ;;  %v4449_v30 = vrot.slane %v8537_v59, 5  ;;  %v2305_v61 = vshrl.u32 %v5244_v55, 16  ;;  %v3988_v63 = vrot.slane %v3986_v29, 5  ;;  %v5473_v29 = vld [vmem:[%s6655_s11 + $0xcc] sm:$0xf] }
 0x115   : > { %v3996_v18 = vshrl.u32 %v7932_v58, 16  ;;  %v2308_v43 = vshll.u32 %v5244_v55, 16  ;;  %v5534_v37 = vrot.slane %v5518_v33, 9  ;;  %v3947_v9 = vsel %vm6681_vm4, %v7926_v12, %v7865_v42  ;;  %v8008_v55 = vld [vmem:[%s6655_s11 + $0xd0] sm:$0xf] }
 0x116   : > { %5987 = vmatmul.mubr.msk.bf16.gmra.mrb[12].mxu0 %vm715_vm3, %v7863_v44  ;;  %v4446_v44 = vrot.slane %v8536_v23, 5  ;;  %v2307_v51 = vrot.slane %v2305_v61, 4  ;;  %v3965_v11 = vor.u32 %v7950_v62, %v7940_v21  ;;  %v4453_v47 = vrot.slane %v8540_v28, 5  ;;  %v6400_v21 = vld [vmem:[%s6655_s11 + $0x24] sm:$0xff]  }
 0x117   : > { %5833 = vmatmul.mubr.msk.bf16.gmra.mrb[28].mxu1 %vm715_vm3, %v5135_v56  ;;  %5990 = vmatprep.mubr.msk.bf16.mxu0 %vm715_vm3, %v7867_v41  ;;  %v8539_v56 = vld [vmem:[#allocation8_spill] sm:$0xff]  ;;  %v2310_v46 = vrot.slane %v2308_v43, 5  ;;  %v3957_v19 = vsel %vm6681_vm4, %v7948_v8, %v7877_v17  ;;  %v4456_v12 = vrot.slane %v7760_v2, 5  ;;  %v8016_v62 = vrot.slane %v3992_v50, 5  ;;  %v5519_v8 = vld [vmem:[%s6655_s11 + $0x90] sm:$0xe] }
 0x118   : > { %5838 = vmatprep.mubr.msk.bf16.mxu1 %vm715_vm3, %v6398_v6  ;;  %v2327_v41 = vsel %vm6681_vm4, %v8539_v56, %v8538_v16  ;;  %v7990_v20 = vsel %vm6907_vm7, %v5533_v22, %v4446_v44  ;;  %v4448_v31 = vrot.slane %v4446_v44, 4  ;;  %v3975_v6 = vor.u32 %v7959_v52, %v7957_v4  ;;  %v8022_v52 = vld [vmem:[%s6655_s11 + $0xc8] sm:$0x1]  ;;  %v8542_v16 = vld [vmem:[#allocation5_spill] sm:$0xff] }
 0x119   : > { %v3998_v22 = vrot.slane %v3996_v18, 4  ;;  %v2311_v17 = vor.u32 %v2310_v46, %v2307_v51  ;;  %v3980_v23 = vrot.slane %v3978_v49, 5  ;;  %v3989_v44 = vor.u32 %v3988_v63, %v3985_v38  ;;  %v8543_v51 = vld [vmem:[#allocation6_spill] sm:$0xff] }
 0x11a   : > { %v8012_v42 = vsel %vm6907_vm7, %v4448_v31, %v4449_v30  ;;  %v8026_v59 = vsel %vm6907_vm7, %v5534_v37, %v4453_v47  ;;  %v4455_v30 = vrot.slane %v4453_v47, 4  ;;  %v4007_v2 = vshrl.u32 %v5473_v29, 16 }
 0x11b   : > { %v5550_v33 = vcombine.low %v7990_v20, %v8012_v42  ;;  %v4010_v50 = vshll.u32 %v5473_v29, 16  ;;  %v4016_v61 = vshll.u32 %v8008_v55, 16  ;;  %v2312_v18 = vrot.slane %v2311_v17, 4  ;;  %v6401_v29 = vld [vmem:[%s6655_s11 + $0x30] sm:$0xff]  }
 0x11c   : > { %v4020_v49 = vshrl.u32 %v8008_v55, 16  ;;  %v8037_v38 = vsel %vm6907_vm7, %v4455_v30, %v4456_v12  ;;  %v5535_v63 = vrot.slane %v5519_v8, 9  ;;  %v3999_v56 = vor.u32 %v3998_v22, %v8016_v62 }
 0x11d   : > { %v4002_v31 = vshll.u32 %v8022_v52, 16  ;;  %v5551_v37 = vcombine.low %v8026_v59, %v8037_v38  ;;  %v5489_v46 = vcombine.low %v3947_v9, %v3957_v19  ;;  %v3966_v28 = vrot.slane %v3965_v11, 4  ;;  %v5520_v11 = vld [vmem:[%s6655_s11 + $0x9c] sm:$0xe] }
 0x11e   : > { %5991 = vmatmul.mubr.msk.bf16.gmra.mrb[16].mxu0 %vm715_vm3, %v7869_v5  ;;  %v8541_v5 = vld [vmem:[#allocation18_spill] sm:$0xff]  ;;  %v3976_v47 = vrot.slane %v3975_v6, 4  ;;  %v3990_v12 = vrot.slane %v3989_v44, 4  ;;  %v4463_v8 = vrot.slane %v7769_v3, 5  ;;  %v4009_v30 = vrot.slane %v4007_v2, 4 }
 0x11f   : > { %5839 = vmatmul.mubr.msk.bf16.vlgmr.msra.gmra.mrb[0].mxu1 %vm715_vm3, %v6399_v1  ;;  %5994 = vmatprep.mubr.msk.bf16.mxu0 %vm715_vm3, %v7871_v7  ;;  %v4460_v43 = vrot.slane %v8541_v5, 5  ;;  %v2317_v7 = vsel %vm6681_vm4, %v2312_v18, %v8543_v51  ;;  %v4012_v18 = vrot.slane %v4010_v50, 5  ;;  %v8060_v5 = vrot.slane %v4016_v61, 5  ;;  %v6402_v19 = vld [vmem:[%s6655_s11 + $0x3c] sm:$0xff]  }
 0x120   : > { %6041 = vmatpush3.bf16.msra.mxu1 %v8542_v16  ;;  %5842 = vmatprep.mubr.msk.bf16.mxu1 %vm715_vm3, %v6400_v21  ;;  %v8049_v1 = vcombine.low %v2317_v7, %v2327_v41  ;;  %v8053_v21 = vld [vmem:[%s6655_s11 + $0xd4] sm:$0x1]  ;;  %v4022_v9 = vrot.slane %v4020_v49, 4  ;;  %v4000_v41 = vrot.slane %v3999_v56, 4  ;;  %v4004_v6 = vrot.slane %v4002_v31, 5 }
 0x121   : > { %v8057_v22 = vsel %vm6907_vm7, %v5535_v63, %v4460_v43  ;;  %v4462_v17 = vrot.slane %v4460_v43, 4  ;;  %v3971_v63 = vsel %vm6681_vm4, %v3966_v28, %v7957_v4  ;;  %v3981_v2 = vsel %vm6681_vm4, %v3976_v47, %v3980_v23  ;;  %v6452_v16 = vld [vmem:[%s6655_s11 + $0x1c] sm:$0xf]  ;;  %v5521_v28 = vld [vmem:[%s6655_s11 + $0xa8] sm:$0xe] }
 0x122   : > { %v4026_v50 = vshll.u32 %v8053_v21, 16  ;;  %v5536_v61 = vrot.slane %v5520_v11, 9  ;;  %v4467_v49 = vrot.slane %v7757_v25, 5  ;;  %v3995_v4 = vsel %vm6681_vm4, %v3990_v12, %v8016_v62  ;;  %v5509_v62 = vld [vmem:[%s6655_s11 + $0x18] sm:$0xe]  ;;  %v6403_v47 = vld [vmem:[%s6655_s11 + $0x48] sm:$0xff]  }
 0x123   : > { %v8066_v44 = vsel %vm6907_vm7, %v4462_v17, %v4463_v8  ;;  %v4023_v43 = vor.u32 %v4022_v9, %v8060_v5  ;;  %v4470_v23 = vrot.slane %v7802_v57, 5  ;;  %v4005_v25 = vsel %vm6681_vm4, %v4000_v41, %v4004_v6  ;;  %v6453_v11 = vld [vmem:[%s6655_s11 + $0x20] sm:$0x1] }
 0x124   : > { %v5552_v3 = vcombine.low %v8057_v22, %v8066_v44  ;;  %v4390_v56 = vrot.slane %v6452_v16, 5  ;;  %v8092_v31 = vsel %vm6907_vm7, %v5536_v61, %v4467_v49  ;;  %v4469_v51 = vrot.slane %v4467_v49, 4  ;;  %v5522_v49 = vld [vmem:[%s6655_s11 + $0xb4] sm:$0xe] }
 0x125   : > { %v5490_v7 = vcombine.low %v3971_v63, %v3981_v2  ;;  %v4024_v17 = vrot.slane %v4023_v43, 4  ;;  %v5537_v41 = vrot.slane %v5521_v28, 9  ;;  %v4474_v6 = vrot.slane %v7805_v34, 5  ;;  %v5510_v2 = vld [vmem:[%s6655_s11 + $0x24] sm:$0xe] }
 0x126   : > { %5995 = vmatmul.mubr.msk.bf16.gmra.mrb[20].mxu0 %vm715_vm3, %v7904_v24  ;;  %v4013_v24 = vor.u32 %v4012_v18, %v4009_v30  ;;  %v8097_v57 = vsel %vm6907_vm7, %v4469_v51, %v4470_v23  ;;  %v6404_v30 = vld [vmem:[%s6655_s11 + $0x54] sm:$0xff]   ;;  %v5525_v18 = vrot.slane %v5509_v62, 9  ;;  %v4392_v9 = vrot.slane %v4390_v56, 4  ;;  %v6456_v28 = vld [vmem:[%s6655_s11 + $0x2c] sm:$0x1] }
 0x127   : > { %5843 = vmatmul.mubr.msk.bf16.gmra.mrb[4].mxu1 %vm715_vm3, %v6401_v29  ;;  %5998 = vmatprep.mubr.msk.bf16.mxu0 %vm715_vm3, %v5489_v46  ;;  %v4028_v46 = vrot.slane %v4026_v50, 5  ;;  %v5491_v29 = vcombine.low %v3995_v4, %v4005_v25  ;;  %v5553_v8 = vcombine.low %v8092_v31, %v8097_v57  ;;  %v4477_v63 = vrot.slane %v7815_v48, 5  ;;  %v6454_v50 = vld [vmem:[%s6655_s11 + $0x28] sm:$0xf]  ;;  %v5511_v25 = vld [vmem:[%s6655_s11 + $0x30] sm:$0xe] }
 0x128   : > { %5846 = vmatprep.mubr.msk.bf16.mxu1 %vm715_vm3, %v6402_v19  ;;  %v4014_v12 = vrot.slane %v4013_v24, 4  ;;  %v4393_v19 = vrot.slane %v6453_v11, 5  ;;  %v4397_v61 = vrot.slane %v6454_v50, 5  ;;  %v8120_v48 = vsel %vm6907_vm7, %v5537_v41, %v4474_v6  ;;  %v6406_v11 = vld [vmem:[%s6655_s11 + $0x6c] sm:$0xff]   ;;  %v5523_v50 = vld [vmem:[%s6655_s11 + $0xc0] sm:$0xe] }
 0x129   : > { %v4029_v34 = vsel %vm6681_vm4, %v4024_v17, %v4028_v46  ;;  %v4476_v24 = vrot.slane %v4474_v6, 4  ;;  %v4391_v43 = vsel %vm6907_vm7, %v5525_v18, %v4390_v56  ;;  %v5526_v51 = vrot.slane %v5510_v2, 9  ;;  %v8544_v41 = vld [vmem:[#allocation9_spill] sm:$0xff]  ;;  %v6470_v31 = vld [vmem:[%s6655_s11 + $0xc8] sm:$0x1] }
 0x12a   : > { %v4019_v4 = vsel %vm6681_vm4, %v4014_v12, %v8060_v5  ;;  %v4394_v23 = vsel %vm6907_vm7, %v4392_v9, %v4393_v19  ;;  %v6455_v5 = vld [vmem:[%s6655_s11 + $0x34] sm:$0xf]  ;;  %v6405_v12 = vld [vmem:[%s6655_s11 + $0x60] sm:$0xff]   ;;  %v5527_v18 = vrot.slane %v5511_v25, 9  ;;  %v4484_v9 = vrot.slane %v7929_v35, 5 }
 0x12b   : > { %v4404_v16 = vrot.slane %v6455_v5, 5  ;;  %v8131_v62 = vsel %vm6907_vm7, %v4476_v24, %v4477_v63  ;;  %v5492_v46 = vcombine.low %v4019_v4, %v4029_v34  ;;  %v5542_v17 = vcombine.low %v4391_v43, %v4394_v23  ;;  %v5512_v24 = vld [vmem:[%s6655_s11 + $0x3c] sm:$0xe] }
 0x12c   : > { %v5554_v56 = vcombine.low %v8120_v48, %v8131_v62  ;;  %v4407_v6 = vrot.slane %v8544_v41, 5  ;;  %v4398_v35 = vsel %vm6907_vm7, %v5526_v51, %v4397_v61  ;;  %v5539_v5 = vrot.slane %v5523_v50, 9 }
 0x12d   : > { %v4406_v19 = vrot.slane %v4404_v16, 4  ;;  %v4405_v23 = vsel %vm6907_vm7, %v5527_v18, %v4404_v16  ;;  %v4491_v51 = vrot.slane %v8022_v52, 5  ;;  %v2468_v57 = vshll.u32 %v6470_v31, 16 }
 0x12e   : > { %5999 = vmatmul.mubr.msk.bf16.gmra.mrb[24].mxu0 %vm715_vm3, %v5490_v7  ;;  %v5538_v7 = vrot.slane %v5522_v49, 9 }
 0x12f   : > { %5847 = vmatmul.mubr.msk.bf16.gmra.mrb[8].mxu1 %vm715_vm3, %v6403_v47  ;;  %6002 = vmatprep.mubr.msk.bf16.mxu0 %vm715_vm3, %v5491_v29  ;;  %v4400_v47 = vrot.slane %v6456_v28, 5  ;;  %v4481_v29 = vrot.slane %v7880_v39, 5  ;;  %v8545_v39 = vld [vmem:[#allocation10_spill] sm:$0xff]  ;;  %v4408_v25 = vsel %vm6907_vm7, %v4406_v19, %v4407_v6  ;;  %v5528_v28 = vrot.slane %v5512_v24, 9 }
 0x130   : > { %5850 = vmatprep.mubr.msk.bf16.mxu1 %vm715_vm3, %v6404_v30  ;;  %v4399_v30 = vrot.slane %v4397_v61, 4  ;;  %v4411_v49 = vrot.slane %v8545_v39, 5  ;;  %v4488_v61 = vrot.slane %v7932_v58, 5  ;;  %v6457_v39 = vld [vmem:[%s6655_s11 + $0x70] sm:$0xf]  ;;  %v4495_v24 = vrot.slane %v8008_v55, 5 }
 0x131   : > { %v8143_v63 = vsel %vm6907_vm7, %v5538_v7, %v4481_v29  ;;  %v4483_v2 = vrot.slane %v4481_v29, 4  ;;  %v5241_v7 = vld [vmem:[%s6655_s11 + $0x6c] sm:$0xf]  ;;  %v8546_v29 = vld [vmem:[#allocation11_spill] sm:$0xff] }
 0x132   : > { %v4401_v34 = vsel %vm6907_vm7, %v4399_v30, %v4400_v47  ;;  %v4413_v47 = vrot.slane %v4411_v49, 4  ;;  %v6407_v30 = vld [vmem:[%s6655_s11 + $0x78] sm:$0xff]   ;;  %v8174_v16 = vsel %vm6907_vm7, %v5539_v5, %v4488_v61  ;;  %v4490_v18 = vrot.slane %v4488_v61, 4 }
 0x133   : > { %v8150_v4 = vsel %vm6907_vm7, %v4483_v2, %v4484_v9  ;;  %v5544_v9 = vcombine.low %v4405_v23, %v4408_v25  ;;  %v2281_v19 = vshrl.u32 %v5241_v7, 16  ;;  %v2284_v41 = vshll.u32 %v5241_v7, 16 }
 0x134   : > { %v5555_v43 = vcombine.low %v8143_v63, %v8150_v4  ;;  %v8179_v58 = vsel %vm6907_vm7, %v4490_v18, %v4491_v51  ;;  %v4412_v6 = vsel %vm6907_vm7, %v5528_v28, %v4411_v49  ;;  %v4498_v49 = vrot.slane %v8053_v21, 5  ;;  %v6409_v51 = vld [vmem:[%s6655_s11 + $0x90] sm:$0xff]   ;;  %v6410_v21 = vld [vmem:[%s6655_s11 + $0x9c] sm:$0xff]  }
 0x135   : > { %v5556_v50 = vcombine.low %v8174_v16, %v8179_v58  ;;  %v2283_v23 = vrot.slane %v2281_v19, 4  ;;  %v2286_v25 = vrot.slane %v2284_v41, 5  ;;  %v4497_v7 = vrot.slane %v4495_v24, 4 }
 0x136   : > { %6003 = vmatmul.mubr.msk.bf16.gmra.mrb[28].mxu0 %vm715_vm3, %v5492_v46  ;;  %v5543_v46 = vcombine.low %v4398_v35, %v4401_v34  ;;  %v2290_v35 = vshll.u32 %v6457_v39, 16  ;;  %v2294_v34 = vshrl.u32 %v6457_v39, 16 }
 0x137   : > { %5851 = vmatmul.mubr.msk.bf16.gmra.mrb[12].mxu1 %vm715_vm3, %v6405_v12  ;;  %6008 = vmatprep.mubr.msk.bf16.mxu0 %vm715_vm3, %v5542_v17  ;;  %v4414_v12 = vrot.slane %v8546_v29, 5  ;;  %v5524_v17 = vld [vmem:[%s6655_s11 + $0xcc] sm:$0xe]  ;;  %v8201_v55 = vsel %vm6907_vm7, %v4497_v7, %v4498_v49 }
 0x138   : > { %5854 = vmatprep.mubr.msk.bf16.mxu1 %vm715_vm3, %v6406_v11  ;;  %v6408_v11 = vld [vmem:[%s6655_s11 + $0x84] sm:$0xff]   ;;  %v5540_v52 = vrot.slane %v5524_v17, 9  ;;  %v2296_v28 = vrot.slane %v2294_v34, 4  ;;  %v6458_v17 = vld [vmem:[%s6655_s11 + $0x74] sm:$0x1] }
 0x139   : > { %v4415_v2 = vsel %vm6907_vm7, %v4413_v47, %v4414_v12  ;;  %v5247_v47 = vld [vmem:[%s6655_s11 + $0x84] sm:$0xf]  ;;  %v2287_v12 = vor.u32 %v2286_v25, %v2283_v23  ;;  %v6412_v34 = vld [vmem:[%s6655_s11 + $0xb4] sm:$0xff]  }
 0x13a   : > { %v8196_v5 = vsel %vm6907_vm7, %v5540_v52, %v4495_v24  ;;  %v5545_v61 = vcombine.low %v4412_v6, %v4415_v2  ;;  %v2332_v18 = vshll.u32 %v5247_v47, 16  ;;  %v5250_v6 = vld [vmem:[%s6655_s11 + $0x90] sm:$0xf]  ;;  %v6411_v2 = vld [vmem:[%s6655_s11 + $0xa8] sm:$0xff]  }
 0x13b   : > { %v5557_v29 = vcombine.low %v8196_v5, %v8201_v55  ;;  %v2288_v52 = vrot.slane %v2287_v12, 4  ;;  %v2353_v23 = vshrl.u32 %v5250_v6, 16  ;;  %v2356_v25 = vshll.u32 %v5250_v6, 16 }
 0x13c   : > { %v2386_v12 = vshll.u32 %v6461_v60, 16 }
 0x13d   : > { %v2358_v14 = vrot.slane %v2356_v25, 5  ;;  %v6464_v25 = vld [vmem:[%s6655_s11 + $0xa4] sm:$0x1] }
 0x13e   : > { %6009 = vmatmul.mubr.msk.bf16.vlgmr.msra.gmra.mrb[0].mxu0 %vm715_vm3, %v5543_v46  ;;  %v2292_v46 = vrot.slane %v2290_v35, 5  ;;  %v5253_v35 = vld [vmem:[%s6655_s11 + $0x9c] sm:$0xf]  ;;  %v8243_v6 = vrot.slane %v2386_v12, 5 }
 0x13f   : > { %5855 = vmatmul.mubr.msk.bf16.gmra.mrb[16].mxu1 %vm715_vm3, %v6407_v30  ;;  %6012 = vmatprep.mubr.msk.bf16.mxu0 %vm715_vm3, %v5544_v9  ;;  %v2300_v30 = vshll.u32 %v6458_v17, 16  ;;  %v2329_v9 = vshrl.u32 %v5247_v47, 16  ;;  %v2380_v47 = vshll.u32 %v5253_v35, 16  ;;  %v6462_v17 = vld [vmem:[%s6655_s11 + $0x8c] sm:$0x1] }
 0x140   : > { %5858 = vmatprep.mubr.msk.bf16.mxu1 %vm715_vm3, %v6408_v11  ;;  %v2297_v13 = vor.u32 %v2296_v28, %v2292_v46  ;;  %v6459_v11 = vld [vmem:[%s6655_s11 + $0x88] sm:$0xf]  ;;  %v2293_v7 = vsel %vm6681_vm4, %v2288_v52, %v2292_v46 }
 0x141   : > { %v2338_v19 = vshll.u32 %v6459_v11, 16  ;;  %v2342_v41 = vshrl.u32 %v6459_v11, 16  ;;  %v2302_v0 = vrot.slane %v2300_v30, 5  ;;  %v2331_v36 = vrot.slane %v2329_v9, 4 }
 0x142   : > { %v2298_v39 = vrot.slane %v2297_v13, 4  ;;  %v2348_v30 = vshll.u32 %v6462_v17, 16  ;;  %v2355_v9 = vrot.slane %v2353_v23, 4  ;;  %v2382_v11 = vrot.slane %v2380_v47, 5 }
 0x143   : > { %v8220_v24 = vrot.slane %v2338_v19, 5  ;;  %v2344_v49 = vrot.slane %v2342_v41, 4  ;;  %v6413_v19 = vld [vmem:[%s6655_s11 + $0xc0] sm:$0xff]  }
 0x144   : > { %v2303_v46 = vsel %vm6681_vm4, %v2298_v39, %v2302_v0  ;;  %v5256_v39 = vld [vmem:[%s6655_s11 + $0xa8] sm:$0xf] }
 0x145   : > { %v2345_v13 = vor.u32 %v2344_v49, %v8220_v24  ;;  %v5274_v41 = vcombine.low %v2293_v7, %v2303_v46  ;;  %v2396_v7 = vshll.u32 %v6464_v25, 16  ;;  %v2404_v45 = vshll.u32 %v5256_v39, 16 }
 0x146   : > { %6013 = vmatmul.mubr.msk.bf16.gmra.mrb[4].mxu0 %vm715_vm3, %v5545_v61  ;;  %v6460_v61 = vld [vmem:[%s6655_s11 + $0x94] sm:$0xf] }
 0x147   : > { %5859 = vmatmul.mubr.msk.bf16.gmra.mrb[20].mxu1 %vm715_vm3, %v6409_v51  ;;  %6016 = vmatprep.mubr.msk.bf16.mxu0 %vm715_vm3, %v5546_v10  ;;  %v2334_v10 = vrot.slane %v2332_v18, 5  ;;  %v2362_v51 = vshll.u32 %v6460_v61, 16  ;;  %v2366_v28 = vshrl.u32 %v6460_v61, 16  ;;  %v2346_v0 = vrot.slane %v2345_v13, 4 }
 0x148   : > { %5862 = vmatprep.mubr.msk.bf16.mxu1 %vm715_vm3, %v6410_v21  ;;  %v2377_v21 = vshrl.u32 %v5253_v35, 16  ;;  %v6463_v35 = vld [vmem:[%s6655_s11 + $0x98] sm:$0x1]  ;;  %v2401_v61 = vshrl.u32 %v5256_v39, 16  ;;  %v5262_v39 = vld [vmem:[%s6655_s11 + $0xc0] sm:$0xf] }
 0x149   : > { %v2335_v15 = vor.u32 %v2334_v10, %v2331_v36  ;;  %v8240_v26 = vrot.slane %v2362_v51, 5  ;;  %v2350_v36 = vrot.slane %v2348_v30, 5  ;;  %v2359_v10 = vor.u32 %v2358_v14, %v2355_v9  ;;  %v5259_v51 = vld [vmem:[%s6655_s11 + $0xb4] sm:$0xf] }
 0x14a   : > { %v2379_v18 = vrot.slane %v2377_v21, 4  ;;  %v2414_v21 = vshrl.u32 %v6465_v27, 16  ;;  %v2425_v20 = vshrl.u32 %v5259_v51, 16  ;;  %v2428_v42 = vshll.u32 %v5259_v51, 16 }
 0x14b   : > { %v2336_v52 = vrot.slane %v2335_v15, 4  ;;  %v2351_v46 = vsel %vm6681_vm4, %v2346_v0, %v2350_v36  ;;  %v2360_v15 = vrot.slane %v2359_v10, 4  ;;  %v2398_v30 = vrot.slane %v2396_v7, 5 }
 0x14c   : > { %v2383_v23 = vor.u32 %v2382_v11, %v2379_v18  ;;  %v2403_v9 = vrot.slane %v2401_v61, 4  ;;  %v2416_v11 = vrot.slane %v2414_v21, 4  ;;  %v6469_v61 = vld [vmem:[%s6655_s11 + $0xbc] sm:$0x1] }
 0x14d   : > { %v2341_v47 = vsel %vm6681_vm4, %v2336_v52, %v8220_v24  ;;  %v2365_v0 = vsel %vm6681_vm4, %v2360_v15, %v8240_v26  ;;  %v2444_v22 = vshll.u32 %v6469_v61, 16 }
 0x14e   : > { %6017 = vmatmul.mubr.msk.bf16.gmra.mrb[8].mxu0 %vm715_vm3, %v5547_v40  ;;  %v2390_v40 = vshrl.u32 %v6461_v60, 16  ;;  %v2384_v17 = vrot.slane %v2383_v23, 4  ;;  %v5276_v24 = vcombine.low %v2341_v47, %v2351_v46 }
 0x14f   : > { %5863 = vmatmul.mubr.msk.bf16.gmra.mrb[24].mxu1 %vm715_vm3, %v6411_v2  ;;  %6020 = vmatprep.mubr.msk.bf16.mxu0 %vm715_vm3, %v5548_v54  ;;  %v2368_v54 = vrot.slane %v2366_v28, 4 }
 0x150   : > { %5866 = vmatprep.mubr.msk.bf16.mxu1 %vm715_vm3, %v6412_v34  ;;  %v2392_v2 = vrot.slane %v2390_v40, 4  ;;  %v2372_v34 = vshll.u32 %v6463_v35, 16  ;;  %v2389_v10 = vsel %vm6681_vm4, %v2384_v17, %v8243_v6  ;;  %v2470_v17 = vrot.slane %v2468_v57, 5 }
 0x151   : > { %v2369_v49 = vor.u32 %v2368_v54, %v8240_v26  ;;  %v2406_v54 = vrot.slane %v2404_v45, 5  ;;  %v6467_v26 = vld [vmem:[%s6655_s11 + $0xb0] sm:$0x1] }
 0x152   : > { %v2393_v28 = vor.u32 %v2392_v2, %v8243_v6  ;;  %v2374_v60 = vrot.slane %v2372_v34, 5  ;;  %v2420_v35 = vshll.u32 %v6467_v26, 16  ;;  %v2449_v34 = vshrl.u32 %v5262_v39, 16 }
 0x153   : > { %v2370_v13 = vrot.slane %v2369_v49, 4  ;;  %v2407_v38 = vor.u32 %v2406_v54, %v2403_v9  ;;  %v2452_v6 = vshll.u32 %v5262_v39, 16  ;;  %v6468_v49 = vld [vmem:[%s6655_s11 + $0xc4] sm:$0xf] }
 0x154   : > { %v2394_v14 = vrot.slane %v2393_v28, 4  ;;  %v2458_v23 = vshll.u32 %v6468_v49, 16  ;;  %v2462_v25 = vshrl.u32 %v6468_v49, 16  ;;  %v2422_v45 = vrot.slane %v2420_v35, 5 }
 0x155   : > { %v2375_v36 = vsel %vm6681_vm4, %v2370_v13, %v2374_v60  ;;  %v2408_v51 = vrot.slane %v2407_v38, 4  ;;  %v2446_v60 = vrot.slane %v2444_v22, 5 }
 0x156   : > { %6021 = vmatmul.mubr.msk.bf16.gmra.mrb[12].mxu0 %vm715_vm3, %v5549_v53  ;;  %v2410_v53 = vshll.u32 %v6465_v27, 16  ;;  %v2399_v59 = vsel %vm6681_vm4, %v2394_v14, %v2398_v30  ;;  %v5277_v44 = vcombine.low %v2365_v0, %v2375_v36  ;;  %v2451_v27 = vrot.slane %v2449_v34, 4 }
 0x157   : > { %5867 = vmatmul.mubr.msk.bf16.gmra.mrb[28].mxu1 %vm715_vm3, %v6413_v19  ;;  %6024 = vmatprep.mubr.msk.bf16.mxu0 %vm715_vm3, %v5550_v33  ;;  %v6466_v33 = vld [vmem:[%s6655_s11 + $0xb8] sm:$0xf]  ;;  %v2427_v19 = vrot.slane %v2425_v20, 4  ;;  %v2460_v21 = vrot.slane %v2458_v23, 5  ;;  %v2464_v47 = vrot.slane %v2462_v25, 4 }
 0x158   : > { %5888 = vmatprep.mubr.msk.bf16.mxu1 %vm715_vm3, %v5274_v41  ;;  %v2434_v12 = vshll.u32 %v6466_v33, 16  ;;  %v2438_v40 = vshrl.u32 %v6466_v33, 16  ;;  %v2412_v18 = vrot.slane %v2410_v53, 5  ;;  %v2430_v41 = vrot.slane %v2428_v42, 5 }
 0x159   : > { %v2454_v53 = vrot.slane %v2452_v6, 5 }
 0x15a   : > { %v2436_v52 = vrot.slane %v2434_v12, 5  ;;  %v2440_v2 = vrot.slane %v2438_v40, 4  ;;  %v2413_v20 = vsel %vm6681_vm4, %v2408_v51, %v2412_v18  ;;  %v2465_v12 = vor.u32 %v2464_v47, %v2460_v21 }
 0x15b   : > { %v2455_v33 = vor.u32 %v2454_v53, %v2451_v27 }
 0x15c   : > { %v2441_v7 = vor.u32 %v2440_v2, %v2436_v52  ;;  %v2466_v13 = vrot.slane %v2465_v12, 4  ;;  %v8343_v2 = vld [vmem:[%s8476_s2] ss:$0 sm:$0xff] }
 0x15d   : > { %v2456_v40 = vrot.slane %v2455_v33, 4 }
 0x15e   : > { %6025 = vmatmul.mubr.msk.bf16.gmra.mrb[16].mxu0 %vm715_vm3, %v5551_v37  ;;  %v2417_v37 = vor.u32 %v2416_v11, %v2412_v18  ;;  %v2442_v15 = vrot.slane %v2441_v7, 4  ;;  %v2471_v9 = vsel %vm6681_vm4, %v2466_v13, %v2470_v17 }
 0x15f   : > { %5889 = vmatmul.mubr.msk.bf16.vlgmr.msra.gmra.mrb[16].mxu1 %vm715_vm3, %v8049_v1  ;;  %6028 = vmatprep.mubr.msk.bf16.mxu0 %vm715_vm3, %v5552_v3  ;;  %v2431_v1 = vor.u32 %v2430_v41, %v2427_v19  ;;  %v5278_v3 = vcombine.low %v2389_v10, %v2399_v59  ;;  %v2461_v30 = vsel %vm6681_vm4, %v2456_v40, %v2460_v21 }
 0x160   : > { %5892 = vmatprep.mubr.msk.bf16.mxu1 %vm715_vm3, %v5276_v24  ;;  %v2418_v28 = vrot.slane %v2417_v37, 4  ;;  %v2447_v48 = vsel %vm6681_vm4, %v2442_v15, %v2446_v60  ;;  %v5281_v14 = vcombine.low %v2461_v30, %v2471_v9 }
 0x161   : > { %v2432_v46 = vrot.slane %v2431_v1, 4 }
 0x162   : > { %v2423_v42 = vsel %vm6681_vm4, %v2418_v28, %v2422_v45 }
 0x163   : > { %v5279_v62 = vcombine.low %v2413_v20, %v2423_v42 }
 0x166   : > { %6029 = vmatmul.mubr.msk.bf16.gmra.mrb[20].mxu0 %vm715_vm3, %v5553_v8  ;;  %v2437_v8 = vsel %vm6681_vm4, %v2432_v46, %v2436_v52 }
 0x167   : > { %5893 = vmatmul.mubr.msk.bf16.gmra.mrb[20].mxu1 %vm715_vm3, %v5277_v44  ;;  %6032 = vmatprep.mubr.msk.bf16.mxu0 %vm715_vm3, %v5554_v56  ;;  %v5280_v56 = vcombine.low %v2437_v8, %v2447_v48 }
 0x168   : > { %5896 = vmatprep.mubr.msk.bf16.mxu1 %vm715_vm3, %v5278_v3 }
 0x16e   : > { %6033 = vmatmul.mubr.msk.bf16.gmra.mrb[24].mxu0 %vm715_vm3, %v5555_v43 }
 0x16f   : > { %5897 = vmatmul.mubr.msk.bf16.gmra.mrb[24].mxu1 %vm715_vm3, %v5279_v62  ;;  %6036 = vmatprep.mubr.msk.bf16.mxu0 %vm715_vm3, %v5556_v50 }
 0x170   : > { %5900 = vmatprep.mubr.msk.bf16.mxu1 %vm715_vm3, %v5280_v56 }
 0x176   : > { %6037 = vmatmul.mubr.msk.bf16.gmra.mrb[28].mxu0 %vm715_vm3, %v5557_v29 }
 0x177   : > { %5901 = vmatmul.mubr.msk.bf16.gmra.mrb[28].mxu1 %vm715_vm3, %v5281_v14 }
 0x1f2   : > { %v5840_v63 = vpop.f32.mrb[0].mxu1 }
 0x1f3   : > { %v1881_v4 = vpop.f32.mrb[1].mxu1 }
 0x1f4   : > { %v5841_v43 = vpop.f32.mrb[2].mxu1 }
 0x1f5   : > { %v1884_v16 = vpop.f32.mrb[3].mxu1 }
 0x1fa   : > { %v5844_v58 = vpop.f32.mrb[4].mxu1 }
 0x1fb   : > { %v1897_v50 = vpop.f32.mrb[5].mxu1 }
 0x1fc   : > { %v5845_v54 = vpop.f32.mrb[6].mxu1 }
 0x1fd   : > { %v1900_v18 = vpop.f32.mrb[7].mxu1 }
 0x202   : > { %v5848_v32 = vpop.f32.mrb[8].mxu1 }
 0x203   : > { %v1913_v11 = vpop.f32.mrb[9].mxu1 }
 0x204   : > { %v5849_v24 = vpop.f32.mrb[10].mxu1 }
 0x205   : > { %v1916_v19 = vpop.f32.mrb[11].mxu1 }
 0x20a   : > { %v8331_v41 = vpop.f32.mrb[12].mxu1 }
 0x20b   : > { %v8333_v5 = vpop.f32.mrb[13].mxu1 }
 0x20c   : > { %v8335_v55 = vpop.f32.mrb[14].mxu1 }
 0x20d   : > { %v8337_v29 = vpop.f32.mrb[15].mxu1 }
 0x211   : > { %v6010_v52 = vpop.f32.mrb[0].mxu0 }
 0x212   : > { %v6042_v39 = vadd.f32 %v6010_v52, %v5840_v63  ;;  %v4635_v0 = vpop.f32.mrb[1].mxu0 }
 0x213   : > { %v6043_v36 = vadd.f32 %v4635_v0, %v1881_v4  ;;  %v6011_v10 = vpop.f32.mrb[2].mxu0 }
 0x214   : > { %v4803_v59 = vadd.f32 %v6042_v39, %v8343_v2  ;;  %v6044_v38 = vadd.f32 %v6011_v10, %v5841_v43  ;;  %v4638_v37 = vpop.f32.mrb[3].mxu0 }
 0x215   : > { %v4801_v26 = vadd.f32 %v6043_v36, %v8343_v2  ;;  %v6045_v35 = vadd.f32 %v4638_v37, %v1884_v16 }
 0x216   : > { %v4835_v34 = vmax.f32 %v4803_v59, 0.0  ;;  %v4804_v6 = vadd.f32 %v6044_v38, %v8343_v2 }
 0x217   : > { %v4833_v49 = vmax.f32 %v4801_v26, 0.0  ;;  %v4802_v23 = vadd.f32 %v6045_v35, %v8343_v2 }
 0x218   : > { %4867 = vst [vmem:[%s8351_s19 + $0x10] sm:$0xff] %v4835_v34  ;;  %v4836_v25 = vmax.f32 %v4804_v6, 0.0 }
 0x219   : > { %4865 = vst [vmem:[%s8351_s19] sm:$0xff] %v4833_v49  ;;  %v4834_v1 = vmax.f32 %v4802_v23, 0.0  ;;  %v6014_v7 = vpop.f32.mrb[4].mxu0 }
 0x21a   : > { %4868 = vst [vmem:[%s8351_s19 + $0x18] sm:$0xff] %v4836_v25  ;;  %v6046_v61 = vadd.f32 %v6014_v7, %v5844_v58  ;;  %v4651_v22 = vpop.f32.mrb[5].mxu0 }
 0x21b   : > { %4866 = vst [vmem:[%s8351_s19 + $0x8] sm:$0xff] %v4834_v1  ;;  %v6047_v44 = vadd.f32 %v4651_v22, %v1897_v50  ;;  %v6015_v3 = vpop.f32.mrb[6].mxu0 }
 0x21c   : > { %v4807_v51 = vadd.f32 %v6046_v61, %v8343_v2  ;;  %v6048_v28 = vadd.f32 %v6015_v3, %v5845_v54  ;;  %v4654_v45 = vpop.f32.mrb[7].mxu0 }
 0x21d   : > { %v4805_v27 = vadd.f32 %v6047_v44, %v8343_v2  ;;  %v6049_v53 = vadd.f32 %v4654_v45, %v1900_v18 }
 0x21e   : > { %v4839_v21 = vmax.f32 %v4807_v51, 0.0  ;;  %v4808_v47 = vadd.f32 %v6048_v28, %v8343_v2 }
 0x21f   : > { %v4837_v46 = vmax.f32 %v4805_v27, 0.0  ;;  %v4806_v15 = vadd.f32 %v6049_v53, %v8343_v2 }
 0x220   : > { %4871 = vst [vmem:[%s8351_s19 + $0x30] sm:$0xff] %v4839_v21  ;;  %v4840_v60 = vmax.f32 %v4808_v47, 0.0 }
 0x221   : > { %4869 = vst [vmem:[%s8351_s19 + $0x20] sm:$0xff] %v4837_v46  ;;  %v4838_v20 = vmax.f32 %v4806_v15, 0.0  ;;  %v6018_v42 = vpop.f32.mrb[8].mxu0 }
 0x222   : > { %4872 = vst [vmem:[%s8351_s19 + $0x38] sm:$0xff] %v4840_v60  ;;  %v6050_v33 = vadd.f32 %v6018_v42, %v5848_v32  ;;  %v4667_v12 = vpop.f32.mrb[9].mxu0 }
 0x223   : > { %4870 = vst [vmem:[%s8351_s19 + $0x28] sm:$0xff] %v4838_v20  ;;  %v6051_v31 = vadd.f32 %v4667_v12, %v1913_v11  ;;  %v6019_v57 = vpop.f32.mrb[10].mxu0 }
 0x224   : > { %v4811_v8 = vadd.f32 %v6050_v33, %v8343_v2  ;;  %v6052_v48 = vadd.f32 %v6019_v57, %v5849_v24  ;;  %v4670_v62 = vpop.f32.mrb[11].mxu0 }
 0x225   : > { %v4809_v56 = vadd.f32 %v6051_v31, %v8343_v2  ;;  %v6053_v40 = vadd.f32 %v4670_v62, %v1916_v19 }
 0x226   : > { %v4843_v13 = vmax.f32 %v4811_v8, 0.0  ;;  %v4812_v17 = vadd.f32 %v6052_v48, %v8343_v2 }
 0x227   : > { %v4841_v30 = vmax.f32 %v4809_v56, 0.0  ;;  %v4810_v9 = vadd.f32 %v6053_v40, %v8343_v2 }
 0x228   : > { %4875 = vst [vmem:[%s8351_s19 + $0x50] sm:$0xff] %v4843_v13  ;;  %v4844_v14 = vmax.f32 %v4812_v17, 0.0 }
 0x229   : > { %4873 = vst [vmem:[%s8351_s19 + $0x40] sm:$0xff] %v4841_v30  ;;  %v4842_v63 = vmax.f32 %v4810_v9, 0.0  ;;  %v6022_v4 = vpop.f32.mrb[12].mxu0 }
 0x22a   : > { %4876 = vst [vmem:[%s8351_s19 + $0x58] sm:$0xff] %v4844_v14  ;;  %v6054_v43 = vadd.f32 %v6022_v4, %v8331_v41  ;;  %v4683_v16 = vpop.f32.mrb[13].mxu0 }
 0x22b   : > { %4874 = vst [vmem:[%s8351_s19 + $0x48] sm:$0xff] %v4842_v63  ;;  %v6055_v58 = vadd.f32 %v4683_v16, %v8333_v5  ;;  %v6023_v50 = vpop.f32.mrb[14].mxu0 }
 0x22c   : > { %v4815_v54 = vadd.f32 %v6054_v43, %v8343_v2  ;;  %v6056_v18 = vadd.f32 %v6023_v50, %v8335_v55  ;;  %v4686_v32 = vpop.f32.mrb[15].mxu0 }
 0x22d   : > { %v4813_v11 = vadd.f32 %v6055_v58, %v8343_v2  ;;  %v6057_v24 = vadd.f32 %v4686_v32, %v8337_v29 }
 0x22e   : > { %v4847_v19 = vmax.f32 %v4815_v54, 0.0  ;;  %v4816_v41 = vadd.f32 %v6056_v18, %v8343_v2 }
 0x22f   : > { %v4845_v52 = vmax.f32 %v4813_v11, 0.0  ;;  %v4814_v39 = vadd.f32 %v6057_v24, %v8343_v2 }
 0x230   : > { %4879 = vst [vmem:[%s8351_s19 + $0x70] sm:$0xff] %v4847_v19  ;;  %v4848_v5 = vmax.f32 %v4816_v41, 0.0 }
 0x231   : > { %4877 = vst [vmem:[%s8351_s19 + $0x60] sm:$0xff] %v4845_v52  ;;  %v4846_v0 = vmax.f32 %v4814_v39, 0.0  ;;  %v6026_v36 = vpop.f32.mrb[16].mxu0 }
 0x232   : > { %4880 = vst [vmem:[%s8351_s19 + $0x78] sm:$0xff] %v4848_v5  ;;  %v5890_v10 = vpop.f32.mrb[16].mxu1  ;;  %v4699_v55 = vpop.f32.mrb[17].mxu0 }
 0x233   : > { %4878 = vst [vmem:[%s8351_s19 + $0x68] sm:$0xff] %v4846_v0  ;;  %v6058_v59 = vadd.f32 %v6026_v36, %v5890_v10  ;;  %v2671_v38 = vpop.f32.mrb[17].mxu1  ;;  %v6027_v37 = vpop.f32.mrb[18].mxu0 }
 0x234   : > { %v6059_v29 = vadd.f32 %v4699_v55, %v2671_v38  ;;  %v5891_v26 = vpop.f32.mrb[18].mxu1  ;;  %v4702_v35 = vpop.f32.mrb[19].mxu0 }
 0x235   : > { %v4819_v34 = vadd.f32 %v6058_v59, %v8343_v2  ;;  %v6060_v6 = vadd.f32 %v6027_v37, %v5891_v26  ;;  %v2674_v49 = vpop.f32.mrb[19].mxu1 }
 0x236   : > { %v4817_v23 = vadd.f32 %v6059_v29, %v8343_v2  ;;  %v6061_v25 = vadd.f32 %v4702_v35, %v2674_v49 }
 0x237   : > { %v4851_v1 = vmax.f32 %v4819_v34, 0.0  ;;  %v4820_v7 = vadd.f32 %v6060_v6, %v8343_v2 }
 0x238   : > { %v4849_v61 = vmax.f32 %v4817_v23, 0.0  ;;  %v4818_v22 = vadd.f32 %v6061_v25, %v8343_v2 }
 0x239   : > { %4883 = vst [vmem:[%s8351_s19 + $0x90] sm:$0xff] %v4851_v1  ;;  %v4852_v44 = vmax.f32 %v4820_v7, 0.0  ;;  %v6030_v3 = vpop.f32.mrb[20].mxu0 }
 0x23a   : > { %4881 = vst [vmem:[%s8351_s19 + $0x80] sm:$0xff] %v4849_v61  ;;  %v4850_v51 = vmax.f32 %v4818_v22, 0.0  ;;  %v5894_v28 = vpop.f32.mrb[20].mxu1  ;;  %v4715_v45 = vpop.f32.mrb[21].mxu0 }
 0x23b   : > { %4884 = vst [vmem:[%s8351_s19 + $0x98] sm:$0xff] %v4852_v44  ;;  %v6062_v27 = vadd.f32 %v6030_v3, %v5894_v28  ;;  %v2687_v53 = vpop.f32.mrb[21].mxu1  ;;  %v6031_v21 = vpop.f32.mrb[22].mxu0 }
 0x23c   : > { %4882 = vst [vmem:[%s8351_s19 + $0x88] sm:$0xff] %v4850_v51  ;;  %v6063_v47 = vadd.f32 %v4715_v45, %v2687_v53  ;;  %v5895_v46 = vpop.f32.mrb[22].mxu1  ;;  %v4718_v15 = vpop.f32.mrb[23].mxu0 }
 0x23d   : > { %v4823_v60 = vadd.f32 %v6062_v27, %v8343_v2  ;;  %v6064_v20 = vadd.f32 %v6031_v21, %v5895_v46  ;;  %v2690_v42 = vpop.f32.mrb[23].mxu1 }
 0x23e   : > { %v4821_v33 = vadd.f32 %v6063_v47, %v8343_v2  ;;  %v6065_v12 = vadd.f32 %v4718_v15, %v2690_v42 }
 0x23f   : > { %v4855_v31 = vmax.f32 %v4823_v60, 0.0  ;;  %v4824_v57 = vadd.f32 %v6064_v20, %v8343_v2 }
 0x240   : > { %v4853_v8 = vmax.f32 %v4821_v33, 0.0  ;;  %v4822_v48 = vadd.f32 %v6065_v12, %v8343_v2 }
 0x241   : > { %4887 = vst [vmem:[%s8351_s19 + $0xb0] sm:$0xff] %v4855_v31  ;;  %v4856_v62 = vmax.f32 %v4824_v57, 0.0  ;;  %v6034_v56 = vpop.f32.mrb[24].mxu0 }
 0x242   : > { %4885 = vst [vmem:[%s8351_s19 + $0xa0] sm:$0xff] %v4853_v8  ;;  %v4854_v40 = vmax.f32 %v4822_v48, 0.0  ;;  %v5898_v13 = vpop.f32.mrb[24].mxu1  ;;  %v4731_v17 = vpop.f32.mrb[25].mxu0 }
 0x243   : > { %4888 = vst [vmem:[%s8351_s19 + $0xb8] sm:$0xff] %v4856_v62  ;;  %v6066_v30 = vadd.f32 %v6034_v56, %v5898_v13  ;;  %v2703_v9 = vpop.f32.mrb[25].mxu1  ;;  %v6035_v14 = vpop.f32.mrb[26].mxu0 }
 0x244   : > { %4886 = vst [vmem:[%s8351_s19 + $0xa8] sm:$0xff] %v4854_v40  ;;  %v6067_v63 = vadd.f32 %v4731_v17, %v2703_v9  ;;  %v5899_v4 = vpop.f32.mrb[26].mxu1  ;;  %v4734_v43 = vpop.f32.mrb[27].mxu0 }
 0x245   : > { %v4827_v16 = vadd.f32 %v6066_v30, %v8343_v2  ;;  %v6068_v58 = vadd.f32 %v6035_v14, %v5899_v4  ;;  %v2706_v50 = vpop.f32.mrb[27].mxu1 }
 0x246   : > { %v4825_v54 = vadd.f32 %v6067_v63, %v8343_v2  ;;  %v6069_v18 = vadd.f32 %v4734_v43, %v2706_v50 }
 0x247   : > { %v4859_v32 = vmax.f32 %v4827_v16, 0.0  ;;  %v4828_v11 = vadd.f32 %v6068_v58, %v8343_v2 }
 0x248   : > { %v4857_v24 = vmax.f32 %v4825_v54, 0.0  ;;  %v4826_v19 = vadd.f32 %v6069_v18, %v8343_v2 }
 0x249   : > { %4891 = vst [vmem:[%s8351_s19 + $0xd0] sm:$0xff] %v4859_v32  ;;  %v4860_v41 = vmax.f32 %v4828_v11, 0.0  ;;  %v6038_v52 = vpop.f32.mrb[28].mxu0 }
 0x24a   : > { %4889 = vst [vmem:[%s8351_s19 + $0xc0] sm:$0xff] %v4857_v24  ;;  %v4858_v39 = vmax.f32 %v4826_v19, 0.0  ;;  %v5902_v5 = vpop.f32.mrb[28].mxu1  ;;  %v4747_v0 = vpop.f32.mrb[29].mxu0 }
 0x24b   : > { %4892 = vst [vmem:[%s8351_s19 + $0xd8] sm:$0xff] %v4860_v41  ;;  %v6070_v36 = vadd.f32 %v6038_v52, %v5902_v5  ;;  %v2719_v10 = vpop.f32.mrb[29].mxu1  ;;  %v6039_v55 = vpop.f32.mrb[30].mxu0 }
 0x24c   : > { %4890 = vst [vmem:[%s8351_s19 + $0xc8] sm:$0xff] %v4858_v39  ;;  %v6071_v59 = vadd.f32 %v4747_v0, %v2719_v10  ;;  %v5903_v38 = vpop.f32.mrb[30].mxu1  ;;  %v4750_v37 = vpop.f32.mrb[31].mxu0 }
 0x24d   : > { %v4831_v29 = vadd.f32 %v6070_v36, %v8343_v2  ;;  %v6072_v26 = vadd.f32 %v6039_v55, %v5903_v38  ;;  %v2722_v35 = vpop.f32.mrb[31].mxu1 }
 0x24e   : > { %v4829_v34 = vadd.f32 %v6071_v59, %v8343_v2  ;;  %v6073_v6 = vadd.f32 %v4750_v37, %v2722_v35 }
 0x24f   : > { %v4863_v49 = vmax.f32 %v4831_v29, 0.0  ;;  %v4832_v23 = vadd.f32 %v6072_v26, %v8343_v2 }
 0x250   : > { %v4861_v25 = vmax.f32 %v4829_v34, 0.0  ;;  %v4830_v1 = vadd.f32 %v6073_v6, %v8343_v2 }
 0x251   : > { %4895 = vst [vmem:[%s8351_s19 + $0xf0] sm:$0xff] %v4863_v49  ;;  %v4864_v7 = vmax.f32 %v4832_v23, 0.0 }
 0x252   : > { %4893 = vst [vmem:[%s8351_s19 + $0xe0] sm:$0xff] %v4861_v25  ;;  %v4862_v61 = vmax.f32 %v4830_v1, 0.0 }
 0x253   : > { %4896 = vst [vmem:[%s8351_s19 + $0xf8] sm:$0xff] %v4864_v7 }
 0x254   : > { %4894 = vst [vmem:[%s8351_s19 + $0xe8] sm:$0xff] %v4862_v61 }
 0x255   : > { %6484 = shalt.err (!%p6481_p5)
}
 0x256   : > { %s6485_s6 = scalar_lea.hbm %s8419_s28, 4096  ;;  %s6489_s9 = scalar_lea.hbm %s8477_s3, 8192 }
 0x257   : > { %p6486_p6 = scmp.ne.s32.totalorder %s8419_s28, %s6485_s6  ;;  %p6490_p10 = scmp.lt.u32.totalorder %s8419_s28, %s8477_s3 }
 0x258   : > { %p6491_p11 = scmp.lt.u32.totalorder %s6489_s9, %s6485_s6  ;;  %p6493_p13 = scmp.lt.u32.totalorder %s6485_s6, %s8419_s28 }
 0x259   : > { %p6487_p7 = pnand %p6486_p6, %p6614_p4 }
 0x25a   : > { %p6492_p12 = por %p6491_p11, %p6490_p10 }
 0x25b   : > { %p6488_p9 = pneg %p6487_p7 }
 0x25c   : > { %p6494_p0 = por %p6493_p13, %p6492_p12 }
 0x25e   : > { %p6495_p1 = pnand %p6494_p0, %p6488_p9 }
 0x260   : > { %6498 = shalt.err (!%p6495_p1)
}
 0x261   : > { %s6552_s18 = smov 128   ;;  %s6553_s19 = smov 8  }
 0x262   : > { %6309 = dma.vmem_to_hbm [thread:$0]  (%p6614_p4), %s8421_s23, 4096, %s8419_s28, %s8428_s15, %s6552_s18, %s6552_s18, %s6553_s19  }
 0x263 PF: > { %p6315_p2 = scmp.ge.s32.totalorder %s6549_s17, 2  ;;  %s4930_s21 = sand.u32 1, %s6529_s12  }
 0x264   : > { %s4931_s26 = scalar_lea.sflag [#allocation3], %s4930_s21 }
 0x265   : > { %p6312_p3 = pnand %p6315_p2, %p6621_p8 }
 0x267   : > { %6524 = dma.done.wait (!%p6312_p3), %s4931_s26, 4096  }
 0x268   : > { %6526 = vsyncadd (!%p6312_p3), %s4931_s26, 4294963200  ;;  %s16_s17 = sadd.s32 1, %s6549_s17   ;;  %s8547_s12 = smov %s6533_s13 }
 0x269   : > { %p13_p5 = scmp.ge.s32.totalorder %s16_s17, 4   ;;  %s8548_s13 = smov %s6537_s14 }
 0x26a   : > { %s8549_s14 = smov %s6627_s25  ;;  %s8550_s15 = smov %s6545_s16 }
 0x26b   : > { %s8551_s16 = smov %s8553_s20  ;;  %15 = sbr.rel (!%p13_p5) target bundleno = 4 (0x4), region = 84 }
 0x272   :  { %4936 = vsyncpa [#allocation3], 1 }
 0x273   :  { %4938 = vsyncpa [#allocation3 + $0x1], 1 }

</bundles_post_ra>
